<compile_context>
chip_gen: v6e
topology: v6e:2x2x1
jax: 0.10.0
libtpu: 0.0.40
codegen_flags: <defaults>
</compile_context>

<pallas_src>
import functools

import numpy as np

import jax
import jax.numpy as jnp
from jax import lax
from jax.experimental import pallas as pl
from jax.experimental.pallas import tpu as pltpu


def _round_up(x, m):
    return ((x + m - 1) // m) * m


def _render_kernel(min_t_ref, max_t_ref, rows_ref, out_ref,
                   best_z_ref, best_v_ref, *, TI, TN):
    """Streams TI-point input tiles against one TN-pixel output tile.

    rows_ref: (1, 8, TI) f32 = [xpix, ypix, z, target, 0, 0, 0, 0] per point.
    min_t_ref / max_t_ref: (B, n_k) int32 per-input-tile target range (SMEM).
    """
    b = pl.program_id(0)          # batch
    t = pl.program_id(1)          # output-pixel tile index
    k = pl.program_id(2)          # input-point tile index (sequential, increasing)

    # ---- init running z-buffer state for this output tile -------------------
    @pl.when(k == 0)
    def _init():
        best_z_ref[...] = jnp.full((1, TN), jnp.inf, jnp.float32)
        best_v_ref[...] = jnp.zeros((8, TN), jnp.float32)

    # ---- cull: can any point of input tile k land in output tile t? ---------
    lo = t * TN
    hi = lo + TN
    hit = (max_t_ref[b, k] >= lo) & (min_t_ref[b, k] < hi)

    @pl.when(hit)
    def _update():
        rows = rows_ref[0]                               # (8, TI) f32
        z = rows[2:3, :]                                 # (1, TI)
        target = rows[3:4, :].astype(jnp.int32)          # (1, TI), -1 = never matches
        target_rel = target - lo                         # relative to this output tile

        # ---- (TN, TI) lattice: rows = output pixels of this tile, cols = points
        row_p = lax.broadcasted_iota(jnp.int32, (TN, TI), 0)
        match = row_p == target_rel                      # point i lands on pixel p
        zb = jnp.where(match, z, jnp.inf)                # (TN, TI)
        zmin = jnp.min(zb, axis=1, keepdims=True)        # (TN, 1) tile z-buffer

        col_i = lax.broadcasted_iota(jnp.int32, (TN, TI), 1)
        cand = (zb == zmin) & (zmin < jnp.inf)           # min-depth hits on pixel p
        idx = jnp.where(cand, col_i, TI)
        imin = jnp.min(idx, axis=1, keepdims=True)       # first (lowest index) hit
        sel = (col_i == imin).astype(jnp.float32)        # one-hot per pixel (or all-zero)

        # ---- MXU: gather the winner's (xpix, ypix, z) per output pixel ------
        # sel is exactly one-hot and HIGHEST keeps the f32 values bit-exact;
        # post-cull the MXU is far from the binding unit, so keep exactness.
        tile_v = lax.dot_general(                        # (8, TI) x (TN, TI)^T -> (8, TN)
            rows, sel,
            dimension_numbers=(((1,), (1,)), ((), ())),
            precision=lax.Precision.HIGHEST,
            preferred_element_type=jnp.float32)

        # ---- streaming z-buffer update (strict '<' keeps first-occurrence ties)
        tile_z = tile_v[2:3, :]                          # winner depth, 0 if none this tile
        better = (tile_z > 0.0) & (tile_z < best_z_ref[...])
        best_z_ref[...] = jnp.where(better, tile_z, best_z_ref[...])
        best_v_ref[...] = jnp.where(better, tile_v, best_v_ref[...])

    @pl.when(k == pl.num_programs(2) - 1)
    def _finalize():
        out_ref[0, :, :] = best_v_ref[0:3, :]            # lane-dense (3, TN) store


def dense_3d_points_to_rendered_subpixel_depth(
        points, *,
        fy=589.3664541825391 * 0.5, fx=589.3664541825391 * 0.5,
        cy=240.5 * 0.5, cx=320.5 * 0.5,
        tile_out=512, tile_in=512):
    B, C, H, W = points.shape
    assert C == 3
    assert fy > 0 and fx > 0 and cy >= 0 and cx >= 0
    assert cx < W and cy < H

    orig_dtype = points.dtype
    N = H * W
    assert N < (1 << 24)                              # target ids stored exactly in f32

    TN = int(min(tile_out, _round_up(N, 128)))        # output-pixel tile (mult. of 128)
    TI = int(min(tile_in, _round_up(N, 128)))         # input-point  tile (mult. of 128)
    N_out = _round_up(N, TN)
    N_in = _round_up(N, TI)
    n_k = N_in // TI

    pts = points.astype(jnp.float32).reshape(B, 3, N)
    if N_in > N:
        # padded points have z == 0 -> rejected (target = -1) below
        pts = jnp.pad(pts, ((0, 0), (0, 0), (0, N_in - N)))

    # ---- one-shot projection (cheap elementwise XLA pass) -------------------
    x, y, z = pts[:, 0], pts[:, 1], pts[:, 2]         # (B, N_in) each
    pos = z > 0.0
    inv_z = 1.0 / jnp.where(pos, z, 1.0)              # finite everywhere
    xpix = x * inv_z * jnp.float32(fx) + jnp.float32(cx)
    ypix = y * inv_z * jnp.float32(fy) + jnp.float32(cy)
    xr = jnp.floor(xpix + 0.5)
    yr = jnp.floor(ypix + 0.5)
    valid = pos & (xr >= 0.0) & (xr < float(W)) & (yr >= 0.0) & (yr < float(H))
    # clamp before the int cast so invalid lanes stay well-defined (then discarded)
    xr_i = jnp.clip(xr, -1.0, float(W)).astype(jnp.int32)
    yr_i = jnp.clip(yr, -1.0, float(H)).astype(jnp.int32)
    target = jnp.where(valid, yr_i * W + xr_i, -1)    # (B, N_in) int32 flat pixel id

    zeros = jnp.zeros_like(xpix)
    rows = jnp.stack([xpix, ypix, z, target.astype(jnp.float32),
                      zeros, zeros, zeros, zeros], axis=1)   # (B, 8, N_in)

    # ---- per-input-tile target range for the culling guard ------------------
    tgt_t = target.reshape(B, n_k, TI)
    val_t = tgt_t >= 0
    tile_min = jnp.min(jnp.where(val_t, tgt_t, jnp.int32(1 << 30)), axis=-1)  # (B, n_k)
    tile_max = jnp.max(jnp.where(val_t, tgt_t, jnp.int32(-1)), axis=-1)       # (B, n_k)

    kernel = functools.partial(_render_kernel, TI=TI, TN=TN)

    out = pl.pallas_call(
        kernel,
        out_shape=jax.ShapeDtypeStruct((B, 3, N_out), jnp.float32),
        grid_spec=pltpu.PrefetchScalarGridSpec(
            num_scalar_prefetch=2,
            grid=(B, N_out // TN, n_k),
            in_specs=[pl.BlockSpec((1, 8, TI), lambda b, t, k, mn, mx: (b, 0, k))],
            out_specs=pl.BlockSpec((1, 3, TN), lambda b, t, k, mn, mx: (b, 0, t)),
            scratch_shapes=[
                pltpu.VMEM((1, TN), jnp.float32),     # running min depth
                pltpu.VMEM((8, TN), jnp.float32),     # running winner (xpix, ypix, z, ...)
            ]),
        compiler_params=pltpu.CompilerParams(
            dimension_semantics=("parallel", "parallel", "arbitrary"),
            vmem_limit_bytes=32 * 1024 * 1024),
    )(tile_min, tile_max, rows)

    out = out[:, :, :N].reshape(B, 3, H, W)
    return out.astype(orig_dtype)


def _reference_np(points, fy, fx, cy, cx):
    """Sequential z-buffer scatter (mirrors the C extension forward)."""
    points = np.asarray(points, dtype=np.float32)
    B, C, H, W = points.shape
    out = np.zeros_like(points)
    for b in range(B):
        depth = np.full((H, W), np.inf, dtype=np.float32)
        for r in range(H):
            for c in range(W):
                x, y, z = points[b, :, r, c]
                if z <= 0:
                    continue
                inv_z = np.float32(1.0) / z
                xpix = x * inv_z * np.float32(fx) + np.float32(cx)
                ypix = y * inv_z * np.float32(fy) + np.float32(cy)
                xr = int(np.floor(xpix + 0.5))
                yr = int(np.floor(ypix + 0.5))
                if 0 <= xr < W and 0 <= yr < H and z < depth[yr, xr]:
                    depth[yr, xr] = z
                    out[b, 0, yr, xr] = xpix
                    out[b, 1, yr, xr] = ypix
                    out[b, 2, yr, xr] = z
    return out


if __name__ == "__main__":
    def _run_case(B, H, W, fy, fx, cy, cx, tile_out, tile_in, neg_frac=0.0):
        key = jax.random.PRNGKey(0)
        kz, kxy, kneg = jax.random.split(key, 3)
        z = jax.random.uniform(kz, (B, 1, H, W), minval=0.5, maxval=3.0,
                               dtype=jnp.float32)
        if neg_frac > 0.0:
            flip = jax.random.uniform(kneg, (B, 1, H, W)) < neg_frac
            z = jnp.where(flip, -z, z)               # z <= 0 points must be rejected
        xy = jax.random.uniform(kxy, (B, 2, H, W), minval=-1.2, maxval=1.2,
                                dtype=jnp.float32) * z
        points = jnp.concatenate([xy, z], axis=1)    # (B, 3, H, W)

        out = dense_3d_points_to_rendered_subpixel_depth(
            points, fy=fy, fx=fx, cy=cy, cx=cx,
            tile_out=tile_out, tile_in=tile_in)
        out = jax.block_until_ready(out)

        ref = _reference_np(points, fy, fx, cy, cx)
        np.testing.assert_allclose(np.asarray(out), ref, rtol=1e-4, atol=1e-4)

    # single-tile path: whole 16x16 image handled in one (TN, TI) lattice
    _run_case(B=2, H=16, W=16, fy=8.0, fx=8.0, cy=7.5, cx=7.5,
              tile_out=512, tile_in=512)
    # multi-tile streaming + culling + ragged padding: N=300 -> 384, 3x3 tile grid
    _run_case(B=2, H=15, W=20, fy=8.0, fx=8.0, cy=7.0, cx=9.5,
              tile_out=128, tile_in=128, neg_frac=0.15)

    print("KERNEL_OK")
</pallas_src>

<mosaic_0001>
module attributes {stable_mosaic.version = 11 : i64} {
  func.func @_render_kernel(%arg0: i32, %arg1: i32, %arg2: i32, %arg3: memref<2x1xi32, #tpu.memory_space<smem>>, %arg4: memref<2x1xi32, #tpu.memory_space<smem>>, %arg5: memref<1x8x256xf32, #tpu.memory_space<vmem>>, %arg6: memref<1x3x256xf32, #tpu.memory_space<vmem>>, %arg7: memref<1x256xf32, #tpu.memory_space<vmem>>, %arg8: memref<8x256xf32, #tpu.memory_space<vmem>>) attributes {dimension_semantics = [#tpu.dimension_semantics<parallel>, #tpu.dimension_semantics<parallel>, #tpu.dimension_semantics<arbitrary>], iteration_bounds = array<i64: 2, 1, 1>, scalar_prefetch = 2 : i64, scratch_operands = 2 : i64, tpu.core_type = #tpu.core_type<tc>, window_params = [{transform_indices = @transform_0, window_bounds = array<i64: 1, 8, 256>}, {transform_indices = @transform_1, window_bounds = array<i64: 1, 3, 256>}]} {
    %c0_i32 = arith.constant 0 : i32
    %0 = arith.cmpi eq, %arg2, %c0_i32 : i32
    %1 = arith.extui %0 : i1 to i32
    %c0_i32_0 = arith.constant 0 : i32
    %2 = arith.cmpi ne, %1, %c0_i32_0 : i32
    scf.if %2 {
      %cst = arith.constant 0x7F800000 : f32
      %19 = vector.broadcast %cst : f32 to vector<1x256xf32>
      %c0 = arith.constant 0 : index
      %c0_5 = arith.constant 0 : index
      %20 = vector.load %arg7[%c0, %c0_5] : memref<1x256xf32, #tpu.memory_space<vmem>>, vector<1x256xf32>
      tpu.vector_store %arg7[%c0, %c0_5], %19 {strides = array<i32>} : memref<1x256xf32, #tpu.memory_space<vmem>>, vector<1x256xf32>,
      %cst_6 = arith.constant 0.000000e+00 : f32
      %21 = vector.broadcast %cst_6 : f32 to vector<8x256xf32>
      %c0_7 = arith.constant 0 : index
      %c0_8 = arith.constant 0 : index
      %22 = vector.load %arg8[%c0_7, %c0_8] : memref<8x256xf32, #tpu.memory_space<vmem>>, vector<8x256xf32>
      tpu.vector_store %arg8[%c0_7, %c0_8], %21 {strides = array<i32>} : memref<8x256xf32, #tpu.memory_space<vmem>>, vector<8x256xf32>,
    } else {
    }
    %c256_i32 = arith.constant 256 : i32
    %3 = arith.muli %arg1, %c256_i32 : i32
    %c256_i32_1 = arith.constant 256 : i32
    %4 = arith.addi %3, %c256_i32_1 : i32
    %5 = arith.index_cast %arg0 : i32 to index
    %6 = arith.index_cast %arg2 : i32 to index
    %7 = memref.load %arg4[%5, %6] : memref<2x1xi32, #tpu.memory_space<smem>>
    %8 = arith.cmpi sge, %7, %3 : i32
    %9 = arith.index_cast %arg0 : i32 to index
    %10 = arith.index_cast %arg2 : i32 to index
    %11 = memref.load %arg3[%9, %10] : memref<2x1xi32, #tpu.memory_space<smem>>
    %12 = arith.cmpi slt, %11, %4 : i32
    %13 = arith.andi %8, %12 : i1
    %14 = arith.extui %13 : i1 to i32
    %c0_i32_2 = arith.constant 0 : i32
    %15 = arith.cmpi ne, %14, %c0_i32_2 : i32
    scf.if %15 {
      %c0 = arith.constant 0 : index
      %c0_5 = arith.constant 0 : index
      %c0_6 = arith.constant 0 : index
      %19 = vector.load %arg5[%c0, %c0_5, %c0_6] : memref<1x8x256xf32, #tpu.memory_space<vmem>>, vector<1x8x256xf32>
      %20 = vector.shape_cast %19 : vector<1x8x256xf32> to vector<8x256xf32>
      %21 = vector.extract_strided_slice %20 {offsets = [2, 0], sizes = [1, 256], strides = [1, 1]} : vector<8x256xf32> to vector<1x256xf32>
      %22 = vector.extract_strided_slice %20 {offsets = [3, 0], sizes = [1, 256], strides = [1, 1]} : vector<8x256xf32> to vector<1x256xf32>
      %23 = arith.fptosi %22 : vector<1x256xf32> to vector<1x256xi32>
      %24 = vector.broadcast %3 : i32 to vector<1x256xi32>
      %25 = arith.subi %23, %24 : vector<1x256xi32>
      %26 = tpu.iota {dimensions = array<i32: 0>} : vector<256x256xi32>
      %27 = vector.broadcast %25 : vector<1x256xi32> to vector<256x256xi32>
      %28 = arith.cmpi eq, %26, %27 : vector<256x256xi32>
      %cst = arith.constant 0x7F800000 : f32
      %29 = vector.shape_cast %21 : vector<1x256xf32> to vector<1x256xf32>
      %30 = vector.broadcast %29 : vector<1x256xf32> to vector<256x256xf32>
      %31 = vector.broadcast %cst : f32 to vector<256x256xf32>
      %32 = arith.select %28, %30, %31 : vector<256x256xi1>, vector<256x256xf32>
      %cst_7 = arith.constant dense<0x7F800000> : vector<256xf32>
      %33 = vector.multi_reduction <minimumf>, %32, %cst_7 [1] : vector<256x256xf32> to vector<256xf32>
      %34 = vector.shape_cast %33 : vector<256xf32> to vector<256x1xf32>
      %35 = tpu.iota {dimensions = array<i32: 1>} : vector<256x256xi32>
      %36 = vector.broadcast %34 : vector<256x1xf32> to vector<256x256xf32>
      %37 = arith.cmpf oeq, %32, %36 : vector<256x256xf32>
      %cst_8 = arith.constant 0x7F800000 : f32
      %38 = vector.broadcast %cst_8 : f32 to vector<256x1xf32>
      %39 = arith.cmpf olt, %34, %38 : vector<256x1xf32>
      %40 = vector.broadcast %39 : vector<256x1xi1> to vector<256x256xi1>
      %41 = arith.andi %37, %40 : vector<256x256xi1>
      %c256_i32_9 = arith.constant 256 : i32
      %42 = vector.broadcast %c256_i32_9 : i32 to vector<256x256xi32>
      %43 = arith.select %41, %35, %42 : vector<256x256xi1>, vector<256x256xi32>
      %cst_10 = arith.constant dense<2147483647> : vector<256xi32>
      %44 = vector.multi_reduction <minsi>, %43, %cst_10 [1] : vector<256x256xi32> to vector<256xi32>
      %45 = vector.shape_cast %44 : vector<256xi32> to vector<256x1xi32>
      %46 = vector.broadcast %45 : vector<256x1xi32> to vector<256x256xi32>
      %47 = arith.cmpi eq, %35, %46 : vector<256x256xi32>
      %48 = arith.extui %47 : vector<256x256xi1> to vector<256x256xi32>
      %49 = arith.sitofp %48 : vector<256x256xi32> to vector<256x256xf32>
      %cst_11 = arith.constant dense<0.000000e+00> : vector<8x256xf32>
      %50 = tpu.matmul %20, %49, %cst_11 {dimension_numbers = #tpu.dot_dimension_numbers<[1], [1], [0], [0], [0, 0, 1, 0], [], []>, precision = #tpu.contract_precision<fp32>} : vector<8x256xf32>, vector<256x256xf32>, vector<8x256xf32> -> vector<8x256xf32>
      %51 = vector.extract_strided_slice %50 {offsets = [2, 0], sizes = [1, 256], strides = [1, 1]} : vector<8x256xf32> to vector<1x256xf32>
      %cst_12 = arith.constant 0.000000e+00 : f32
      %52 = vector.broadcast %cst_12 : f32 to vector<1x256xf32>
      %53 = arith.cmpf ogt, %51, %52 : vector<1x256xf32>
      %c0_13 = arith.constant 0 : index
      %c0_14 = arith.constant 0 : index
      %54 = vector.load %arg7[%c0_13, %c0_14] : memref<1x256xf32, #tpu.memory_space<vmem>>, vector<1x256xf32>
      %55 = arith.cmpf olt, %51, %54 : vector<1x256xf32>
      %56 = arith.andi %53, %55 : vector<1x256xi1>
      %c0_15 = arith.constant 0 : index
      %c0_16 = arith.constant 0 : index
      %57 = vector.load %arg7[%c0_15, %c0_16] : memref<1x256xf32, #tpu.memory_space<vmem>>, vector<1x256xf32>
      %58 = arith.select %56, %51, %57 : vector<1x256xi1>, vector<1x256xf32>
      %c0_17 = arith.constant 0 : index
      %c0_18 = arith.constant 0 : index
      %59 = vector.load %arg7[%c0_17, %c0_18] : memref<1x256xf32, #tpu.memory_space<vmem>>, vector<1x256xf32>
      tpu.vector_store %arg7[%c0_17, %c0_18], %58 {strides = array<i32>} : memref<1x256xf32, #tpu.memory_space<vmem>>, vector<1x256xf32>,
      %c0_19 = arith.constant 0 : index
      %c0_20 = arith.constant 0 : index
      %60 = vector.load %arg8[%c0_19, %c0_20] : memref<8x256xf32, #tpu.memory_space<vmem>>, vector<8x256xf32>
      %61 = vector.shape_cast %56 : vector<1x256xi1> to vector<1x256xi1>
      %62 = vector.broadcast %61 : vector<1x256xi1> to vector<8x256xi1>
      %63 = arith.select %62, %50, %60 : vector<8x256xi1>, vector<8x256xf32>
      %c0_21 = arith.constant 0 : index
      %c0_22 = arith.constant 0 : index
      %64 = vector.load %arg8[%c0_21, %c0_22] : memref<8x256xf32, #tpu.memory_space<vmem>>, vector<8x256xf32>
      tpu.vector_store %arg8[%c0_21, %c0_22], %63 {strides = array<i32>} : memref<8x256xf32, #tpu.memory_space<vmem>>, vector<8x256xf32>,
    } else {
    }
    %c0_i32_3 = arith.constant 0 : i32
    %16 = arith.cmpi eq, %arg2, %c0_i32_3 : i32
    %17 = arith.extui %16 : i1 to i32
    %c0_i32_4 = arith.constant 0 : i32
    %18 = arith.cmpi ne, %17, %c0_i32_4 : i32
    scf.if %18 {
      %c0 = arith.constant 0 : index
      %c0_5 = arith.constant 0 : index
      %19 = vector.load %arg8[%c0, %c0_5] : memref<8x256xf32, #tpu.memory_space<vmem>>, vector<3x256xf32>
      %c0_6 = arith.constant 0 : index
      %c0_7 = arith.constant 0 : index
      %c0_8 = arith.constant 0 : index
      %20 = vector.load %arg6[%c0_6, %c0_7, %c0_8] : memref<1x3x256xf32, #tpu.memory_space<vmem>>, vector<1x3x256xf32>
      %21 = vector.shape_cast %20 : vector<1x3x256xf32> to vector<3x256xf32>
      %22 = vector.shape_cast %19 : vector<3x256xf32> to vector<1x3x256xf32>
      tpu.vector_store %arg6[%c0_6, %c0_7, %c0_8], %22 {strides = array<i32>} : memref<1x3x256xf32, #tpu.memory_space<vmem>>, vector<1x3x256xf32>,
    } else {
    }
    return
  }
  func.func @transform_0(%arg0: i32, %arg1: i32, %arg2: i32, %arg3: memref<2x1xi32, #tpu.memory_space<smem>>, %arg4: memref<2x1xi32, #tpu.memory_space<smem>>) -> (i32, i32, i32) {
    %c0_i32 = arith.constant 0 : i32
    %c0_i32_0 = arith.constant 0 : i32
    return %arg0, %c0_i32, %arg2 : i32, i32, i32
  }
  func.func @transform_1(%arg0: i32, %arg1: i32, %arg2: i32, %arg3: memref<2x1xi32, #tpu.memory_space<smem>>, %arg4: memref<2x1xi32, #tpu.memory_space<smem>>) -> (i32, i32, i32) {
    %c0_i32 = arith.constant 0 : i32
    %c0_i32_0 = arith.constant 0 : i32
    return %arg0, %c0_i32, %arg1 : i32, i32, i32
  }
}

</mosaic_0001>

<bundles_post_ra>
// kernel: tpu_custom_call.1
= control target key start
LH: loop header
LB: loop body
LE: loop exit
PB: predicated region body
PF: predicated region fallthrough
CT: control target
= control target key end

     0   :  { %s6556_s0 = inlined_call_operand.vmem [shape: s32[2,1], index: 0, kind: input, shape index: {}]   ;;  %s6557_s2 = inlined_call_operand.hbm [shape: f32[2,8,256], index: 2, kind: input, shape index: {}]   ;;  %s6558_s3 = inlined_call_operand.vmem [shape: f32[2,3,256], index: 3, kind: output, shape index: {}]   ;;  %s6559_s1 = inlined_call_operand.vmem [shape: s32[2,1], index: 1, kind: input, shape index: {}]  }
   0x1   :  { %s8_s14 = sshll.u32 %s6556_s0, 4  ;;  %s12_s17 = sshll.u32 %s6559_s1, 4  ;;  %s9_s14 = int_to_ptr.vmem [resolvable:$true] %s8_s14  ;;  %s13_s17 = int_to_ptr.vmem [resolvable:$true] %s12_s17 }
   0x2   :  { %s3281_s18 = scalar_lea.vmem %s9_s14, 32  ;;  %p3286_p1 = scmp.lt.s32.totalorder %s9_s14, %s9_s14 }
   0x3   :  { %p3282_p0 = scmp.ne.s32.totalorder %s9_s14, %s3281_s18  ;;  %p3287_p2 = scmp.lt.s32.totalorder %s3281_s18, %s3281_s18 }
   0x5   :  { %p3288_p3 = por %p3287_p2, %p3286_p1 }
   0x7   :  { %p3289_p4 = pnand %p3288_p3, %p3282_p0 }
   0x9   :  { %3292 = shalt.err (!%p3289_p4)  }
   0xa   :  { %s3387_s19 = smov [#allocation5]   ;;  %s3293_s20 = scalar_lea.vmem %s13_s17, 32 }
   0xb   :  { %11 = dma.vmem_to_smem %s9_s14, 32, %s3387_s19, [#allocation4] }
   0xc   :  { %p3294_p5 = scmp.ne.s32.totalorder %s13_s17, %s3293_s20  ;;  %p3298_p6 = scmp.lt.s32.totalorder %s13_s17, %s13_s17 }
   0xd   :  { %p3299_p7 = scmp.lt.s32.totalorder %s3293_s20, %s3293_s20 }
   0xf   :  { %p3300_p8 = por %p3299_p7, %p3298_p6 }
  0x11   :  { %p3301_p9 = pnand %p3300_p8, %p3294_p5 }
  0x13   :  { %3304 = shalt.err (!%p3301_p9)  }
  0x14   :  { %s3388_s0 = smov [#allocation6]  }
  0x15   :  { %15 = dma.vmem_to_smem %s13_s17, 32, %s3388_s0, [#allocation4] }
  0x16   :  { %3357 = dma.done.wait [#allocation4], 64 }
  0x17   :  { %3358 = vsyncadd [#allocation4], 4294967232 }
  0x18   :  { %17 = sfence }
  0x19   :  { %18 = vsyncpa [#allocation8], 0 }
  0x1a   :  { %20 = vsyncpa [#allocation8 + $0x1], 0  ;;  %s3422_s1 = smov 0   ;;  %s3424_s21 = smov 0  }
  0x1b   :  { %s3426_s22 = smov 0   ;;  %s3428_s23 = smov 0  }
  0x1c   :  { %s3430_s24 = smov 0   ;;  %s3432_s25 = smov 0  }
  0x1d LB: > { %s2939_s26 = sadd.s32 4294967295, %s3385_s25   ;;  %s45_s27 = sadd.s32 1, %s3381_s24  ;;  %s3385_s25 = sphi %s3432_s25, %s26_s25   ;;  %s3381_s24 = sphi %s3430_s24, %s7282_s24   ;;  %s3377_s23 = sphi %s3428_s23, %s7281_s23   ;;  %s3373_s22 = sphi %s3426_s22, %s7280_s22   ;;  %s3369_s21 = sphi %s3424_s21, %s7279_s21   ;;  %s3365_s1 = sphi %s3422_s1, %s7278_s1  }
  0x1e   : > { %p47_p10 = scmp.ge.s32.totalorder %s45_s27, 2  ;;  %s54_s28 = sadd.s32 1, %s3373_s22 }
  0x1f   : > { %p61_p11 = scmp.ne.s32.totalorder %s3373_s22, %s3369_s21  ;;  %p62_p12 = scmp.eq.s32.totalorder %s3385_s25, 0 }
  0x20   : > { %s7284_s27 = smov (%p47_p10, %s45_s27), 0  ;;  %p67_p0 = scmp.ne.s32.totalorder %s3369_s21, %s3365_s1 }
  0x21   : > { %p3458_p13 = por %p62_p12, %p61_p11  ;;  %s49_s30 = ssub.s32 %s3381_s24, %s7284_s27 }
  0x22   : > { %p68_p1 = scmp.eq.s32.totalorder %s2939_s26, 0  ;;  %p52_p2 = scmp.eq.s32.totalorder %s49_s30, 0 }
  0x23   : > { %p3221_p4 = scmp.lt.s32.totalorder %s3385_s25, 2  ;;  %s119_s6 = sand.u32 1, %s3373_s22  }
  0x24   : > { %p3465_p3 = por %p68_p1, %p67_p0  ;;  %s3209_s7 = sshll.u32 %s3381_s24, 8 }
  0x25   : > { %s3471_s5 = scalar_select %p52_p2, %s3373_s22, %s54_s28  }
  0x26   : > { %s2943_s8 = sshll.u32 %s119_s6, 4  ;;  %s131_s11 = scalar_lea.hbm %s6557_s2, %s3209_s7 }
  0x27   : > { %s123_s12 = scalar_lea.vmem [#allocation7], %s2943_s8  ;;  %p3480_p5 = pnand %p3221_p4, %p3458_p13 }
  0x28   : > { %s133_s13 = sshll.u32 %s123_s12, 4  ;;  %p2946_p6 = scmp.ge.s32.totalorder %s3385_s25, 1  ;;  %s134_s13 = int_to_ptr.vmem [resolvable:$true] %s133_s13 }
  0x29   : > { %p138_p7 = scmp.lt.s32.totalorder %s3385_s25, 3  ;;  %s120_s15 = scalar_lea.sflag [#allocation8], %s119_s6 }
  0x2a   : > { %p3307_p8 = pneg %p3480_p5  ;;  %s3318_s16 = scalar_lea.vmem %s134_s13, 256 }
  0x2b   : > { %p3319_p9 = scmp.ne.s32.totalorder %s134_s13, %s3318_s16  ;;  %s3389_s17 = smov [#allocation7]  }
  0x2c   : > { %s3323_s18 = sshll.u32 %s3389_s17, 4  ;;  %s3324_s18 = int_to_ptr.vmem [resolvable:$false] %s3323_s18 }
  0x2d   : > { %p3321_p10 = pnand %p3319_p9, %p3307_p8  ;;  %s3325_s19 = scalar_lea.vmem %s3324_s18, 512 }
  0x2e   : > { %p3326_p12 = scmp.lt.s32.totalorder %s134_s13, %s3324_s18  ;;  %p3327_p13 = scmp.lt.s32.totalorder %s3325_s19, %s3318_s16 }
  0x2f   : > { %p3322_p11 = pneg %p3321_p10 }
  0x30   : > { %p3328_p0 = por %p3327_p13, %p3326_p12 }
  0x32   : > { %p3329_p1 = pnand %p3328_p0, %p3322_p11 }
  0x34   : > { %3332 = shalt.err (!%p3329_p1)
}
  0x35   : > { %3220 = dma.hbm_to_vmem [thread:$0]  (!%p3480_p5), %s131_s11, 256, %s134_s13, %s120_s15  }
  0x36   : > { %p139_p2 = pnand %p2946_p6, %p138_p7 }
  0x38   : > { %142 = sbr.rel (%p139_p2) target bundleno = 1134 (0x46e), region = 24 }
  0x3d   : > { %s144_s20 = sand.u32 1, %s3369_s21  }
  0x3e   : > { %s2947_s0 = sshll.u32 %s144_s20, 4  ;;  %s145_s1 = scalar_lea.sflag [#allocation8], %s144_s20 }
  0x3f   : > { %s3495_s26 = scalar_lea.vmem [#allocation7], %s2947_s0 }
  0x40   : > { %3360 = dma.done.wait (%p3465_p3), %s145_s1, 256  }
  0x41   : > { %3362 = vsyncadd (%p3465_p3), %s145_s1, 4294967040  ;;  %s2950_s28 = sshll.u32 %s3377_s23, 7  ;;  %p173_p4 = scmp.lt.s32.totalorder %s3377_s23, 1  ;;  %v6560_v0 = vlaneseq  ;;  %v3390_v1 = vmov 0.0   ;;  %v6832_v2 = vmov 0  ;;  %v3391_v3 = vmov inf  }
  0x42   : > { %s202_s29 = sld [smem:[#allocation6 + %s2950_s28]]  ;;  %191 = vst [vmem:[#allocation3] sm:$0xff] %v3390_v1  ;;  %192 = vst [vmem:[#allocation3 + $0x8] sm:$0xff] %v3390_v1 }
  0x43   : > { %s204_s30 = sld [smem:[#allocation5 + %s2950_s28]]  ;;  %vm3504_vm0 = vcmp.lt.s32.totalorder %v6560_v0, 256  ;;  %s7286_s23 = smov (!%p173_p4, %s3377_s23), 1 }
  0x44   : > { %v6833_v2 = vsel %vm3504_vm0, 4294967295, %v6832_v2  ;;  %190 = vst.msk [vmem:[#allocation2] sm:$0x3] %vm3504_vm0, %v3391_v3  ;;  %s3210_s4 = sshll.u32 %s7286_s23, 3 }
  0x45   : > { %6834 = vst [vmem:[#allocation11_spill] sm:$0xff] %v6833_v2  ;;  %s3514_s8 = scalar_lea.vmem %s6558_s3, %s3210_s4 }
  0x48   : > { %p203_p3 = scmp.ge.s32.totalorder %s202_s29, 0 }
  0x49   : > { %p205_p5 = scmp.lt.s32.totalorder %s204_s30, 256 }
  0x4b   : > { %p206_p6 = pnand %p205_p5, %p203_p3 }
  0x4d   : > { %209 = sbr.rel (%p206_p6) target bundleno = 1130 (0x46a), region = 36 }
  0x52   : > { %v210_v4 = vld [vmem:[%s3495_s26] sm:$0xff]  ;;  %v211_v5 = vld [vmem:[%s3495_s26 + $0x8] sm:$0xff]  ;;  %v3519_v6 = vshrl.u32 %v6560_v0, 7 }
  0x53   : > { %v3211_v7 = vtrunc.f32 %v210_v4  ;;  %v3213_v8 = vtrunc.f32 %v211_v5 }
  0x54   : > { %6835 = vst [vmem:[#allocation12_spill] sm:$0xff] %v3519_v6  ;;  %v233_v9 = vadd.s32 120, %v3519_v6  ;;  %v252_v10 = vsub.s32 3, %v3519_v6  ;;  %v3524_v11 = vsub.s32 2, %v3519_v6  ;;  %v231_v14 = vadd.s32 104, %v3519_v6 }
  0x55   : > { %v3212_v12 = vcvt.f32.s32 %v3211_v7  ;;  %v3214_v13 = vcvt.f32.s32 %v3213_v8  ;;  %v232_v15 = vadd.s32 112, %v3519_v6  ;;  %v230_v18 = vadd.s32 96, %v3519_v6 }
  0x56   : > { %6836 = vst [vmem:[#allocation13_spill] sm:$0xff] %v3524_v11  ;;  %v3529_v16 = vrot.slane %v210_v4, %v3524_v11  ;;  %v3532_v17 = vrot.slane %v211_v5, %v3524_v11  ;;  %v229_v19 = vadd.s32 88, %v3519_v6  ;;  %v228_v22 = vadd.s32 80, %v3519_v6 }
  0x57   : > { %v3536_v20 = vrot.slane %v3212_v12, %v252_v10  ;;  %v3538_v21 = vrot.slane %v3214_v13, %v252_v10  ;;  %v227_v23 = vadd.s32 72, %v3519_v6  ;;  %v226_v24 = vadd.s32 64, %v3519_v6 }
  0x58   : > { %v225_v25 = vadd.s32 56, %v3519_v6  ;;  %v224_v26 = vadd.s32 48, %v3519_v6  ;;  %v3546_v27 = vadd.s32 40, %v3519_v6  ;;  %v222_v50 = vadd.s32 32, %v3519_v6 }
  0x59   : > { %vm288_vm1 = vcmp.eq.s32.totalorder %v233_v9, %v3536_v20  ;;  %vm289_vm2 = vcmp.eq.s32.totalorder %v233_v9, %v3538_v21  ;;  %vm284_vm3 = vcmp.eq.s32.totalorder %v231_v14, %v3536_v20  ;;  %vm285_vm4 = vcmp.eq.s32.totalorder %v231_v14, %v3538_v21 }
  0x5a   : > { %v3553_v28 = vsel %vm288_vm1, %v3529_v16, inf  ;;  %v3556_v29 = vsel %vm289_vm2, %v3532_v17, inf  ;;  %v3559_v30 = vsel %vm284_vm3, %v3529_v16, inf  ;;  %v3562_v31 = vsel %vm285_vm4, %v3532_v17, inf }
  0x5b   : > { %v439_v32 = vmin.f32 %v3553_v28, %v3556_v29  ;;  %v433_v33 = vmin.f32 %v3559_v30, %v3562_v31  ;;  %vm286_vm5 = vcmp.eq.s32.totalorder %v232_v15, %v3536_v20  ;;  %vm287_vm6 = vcmp.eq.s32.totalorder %v232_v15, %v3538_v21 }
  0x5c   : > { %v3571_v34 = vsel %vm286_vm5, %v3529_v16, inf  ;;  %v3574_v35 = vsel %vm287_vm6, %v3532_v17, inf  ;;  %vm282_vm7 = vcmp.eq.s32.totalorder %v230_v18, %v3536_v20  ;;  %vm283_vm8 = vcmp.eq.s32.totalorder %v230_v18, %v3538_v21 }
  0x5d   : > { %440 = vmin.xlane.f32.xlu0 %v439_v32  ;;  %434 = vmin.xlane.f32.xlu1 %v433_v33  ;;  %v436_v36 = vmin.f32 %v3571_v34, %v3574_v35  ;;  %v3581_v37 = vsel %vm282_vm7, %v3529_v16, inf  ;;  %v3584_v38 = vsel %vm283_vm8, %v3532_v17, inf  ;;  %vm280_vm9 = vcmp.eq.s32.totalorder %v229_v19, %v3536_v20 }
  0x5e   : > { %v430_v39 = vmin.f32 %v3581_v37, %v3584_v38  ;;  %vm281_vm10 = vcmp.eq.s32.totalorder %v229_v19, %v3538_v21  ;;  %v3591_v40 = vsel %vm280_vm9, %v3529_v16, inf  ;;  %vm278_vm11 = vcmp.eq.s32.totalorder %v228_v22, %v3536_v20 }
  0x5f   : > { %v3595_v41 = vsel %vm281_vm10, %v3532_v17, inf  ;;  %vm279_vm12 = vcmp.eq.s32.totalorder %v228_v22, %v3538_v21  ;;  %v3599_v42 = vsel %vm278_vm11, %v3529_v16, inf  ;;  %vm276_vm13 = vcmp.eq.s32.totalorder %v227_v23, %v3536_v20 }
  0x60   : > { %v427_v43 = vmin.f32 %v3591_v40, %v3595_v41  ;;  %v3605_v44 = vsel %vm279_vm12, %v3532_v17, inf  ;;  %vm277_vm14 = vcmp.eq.s32.totalorder %v227_v23, %v3538_v21  ;;  %v3609_v45 = vsel %vm276_vm13, %v3529_v16, inf }
  0x61   : > { %437 = vmin.xlane.f32.xlu0 %v436_v36  ;;  %431 = vmin.xlane.f32.xlu1 %v430_v39  ;;  %v424_v46 = vmin.f32 %v3599_v42, %v3605_v44  ;;  %v3614_v47 = vsel %vm277_vm14, %v3532_v17, inf  ;;  %vm274_vm15 = vcmp.eq.s32.totalorder %v226_v24, %v3536_v20  ;;  %vm275_vm1 = vcmp.eq.s32.totalorder %v226_v24, %v3538_v21 }
  0x62   : > { %v3619_v48 = vsel %vm274_vm15, %v3529_v16, inf  ;;  %v3622_v49 = vsel %vm275_vm1, %v3532_v17, inf  ;;  %vm272_vm2 = vcmp.eq.s32.totalorder %v225_v25, %v3536_v20  ;;  %vm273_vm3 = vcmp.eq.s32.totalorder %v225_v25, %v3538_v21 }
  0x63   : > { %vm270_vm4 = vcmp.eq.s32.totalorder %v224_v26, %v3536_v20  ;;  %v421_v51 = vmin.f32 %v3609_v45, %v3614_v47  ;;  %v418_v52 = vmin.f32 %v3619_v48, %v3622_v49  ;;  %vm271_vm5 = vcmp.eq.s32.totalorder %v224_v26, %v3538_v21 }
  0x64   : > { %v3634_v53 = vsel %vm272_vm2, %v3529_v16, inf  ;;  %v3637_v54 = vsel %vm273_vm3, %v3532_v17, inf  ;;  %v3640_v55 = vsel %vm270_vm4, %v3529_v16, inf  ;;  %vm268_vm6 = vcmp.eq.s32.totalorder %v3546_v27, %v3536_v20 }
  0x65   : > { %428 = vmin.xlane.f32.xlu0 %v427_v43  ;;  %425 = vmin.xlane.f32.xlu1 %v424_v46  ;;  %v3645_v56 = vsel %vm271_vm5, %v3532_v17, inf  ;;  %vm269_vm7 = vcmp.eq.s32.totalorder %v3546_v27, %v3538_v21  ;;  %vm266_vm8 = vcmp.eq.s32.totalorder %v222_v50, %v3536_v20  ;;  %vm267_vm9 = vcmp.eq.s32.totalorder %v222_v50, %v3538_v21 }
  0x66   : > { %v221_v57 = vadd.s32 24, %v3519_v6  ;;  %v415_v58 = vmin.f32 %v3634_v53, %v3637_v54  ;;  %v3655_v59 = vsel %vm268_vm6, %v3529_v16, inf  ;;  %v220_v60 = vadd.s32 16, %v3519_v6 }
  0x67   : > { %v412_v61 = vmin.f32 %v3640_v55, %v3645_v56  ;;  %v3661_v62 = vsel %vm269_vm7, %v3532_v17, inf  ;;  %v3664_v63 = vsel %vm266_vm8, %v3529_v16, inf  ;;  %v3667_v1 = vsel %vm267_vm9, %v3532_v17, inf }
  0x68   : > { %vm264_vm10 = vcmp.eq.s32.totalorder %v221_v57, %v3536_v20  ;;  %vm265_vm11 = vcmp.eq.s32.totalorder %v221_v57, %v3538_v21  ;;  %v219_v3 = vadd.s32 8, %v3519_v6  ;;  %vm262_vm12 = vcmp.eq.s32.totalorder %v220_v60, %v3536_v20 }
  0x69   : > { %422 = vmin.xlane.f32.xlu0 %v421_v51  ;;  %419 = vmin.xlane.f32.xlu1 %v418_v52  ;;  %vm263_vm13 = vcmp.eq.s32.totalorder %v220_v60, %v3538_v21  ;;  %v409_v4 = vmin.f32 %v3655_v59, %v3661_v62  ;;  %v406_v5 = vmin.f32 %v3664_v63, %v3667_v1  ;;  %v3679_v7 = vsel %vm264_vm10, %v3529_v16, inf }
  0x6a   : > { %v3682_v8 = vsel %vm265_vm11, %v3532_v17, inf  ;;  %vm258_vm14 = vcmp.eq.s32.totalorder %v3519_v6, %v3536_v20  ;;  %vm259_vm15 = vcmp.eq.s32.totalorder %v3519_v6, %v3538_v21  ;;  %v3689_v9 = vsel %vm262_vm12, %v3529_v16, inf }
  0x6b   : > { %v3692_v10 = vsel %vm263_vm13, %v3532_v17, inf  ;;  %vm260_vm1 = vcmp.eq.s32.totalorder %v219_v3, %v3536_v20  ;;  %v249_v12 = vadd.s32 248, %v3519_v6  ;;  %vm261_vm2 = vcmp.eq.s32.totalorder %v219_v3, %v3538_v21 }
  0x6c   : > { %v248_v13 = vadd.s32 240, %v3519_v6  ;;  %v3699_v14 = vsel %vm258_vm14, %v3529_v16, inf  ;;  %v247_v15 = vadd.s32 232, %v3519_v6  ;;  %v403_v18 = vmin.f32 %v3679_v7, %v3682_v8 }
  0x6d   : > { %416 = vmin.xlane.f32.xlu0 %v415_v58  ;;  %413 = vmin.xlane.f32.xlu1 %v412_v61  ;;  %v400_v19 = vmin.f32 %v3689_v9, %v3692_v10  ;;  %v3707_v22 = vsel %vm260_vm1, %v3529_v16, inf  ;;  %v3710_v23 = vsel %vm259_vm15, %v3532_v17, inf  ;;  %v3713_v24 = vsel %vm261_vm2, %v3532_v17, inf }
  0x6e   : > { %vm320_vm3 = vcmp.eq.s32.totalorder %v249_v12, %v3536_v20  ;;  %vm321_vm4 = vcmp.eq.s32.totalorder %v249_v12, %v3538_v21  ;;  %v246_v25 = vadd.s32 224, %v3519_v6  ;;  %vm318_vm5 = vcmp.eq.s32.totalorder %v248_v13, %v3536_v20 }
  0x6f   : > { %vm319_vm6 = vcmp.eq.s32.totalorder %v248_v13, %v3538_v21  ;;  %v394_v26 = vmin.f32 %v3699_v14, %v3710_v23  ;;  %vm316_vm7 = vcmp.eq.s32.totalorder %v247_v15, %v3536_v20  ;;  %vm317_vm8 = vcmp.eq.s32.totalorder %v247_v15, %v3538_v21 }
  0x70   : > { %v397_v27 = vmin.f32 %v3707_v22, %v3713_v24  ;;  %v3727_v32 = vsel %vm320_vm3, %v3529_v16, inf  ;;  %v3730_v33 = vsel %vm321_vm4, %v3532_v17, inf  ;;  %v245_v36 = vadd.s32 216, %v3519_v6 }
  0x71   : > { %410 = vmin.xlane.f32.xlu0 %v409_v4  ;;  %407 = vmin.xlane.f32.xlu1 %v406_v5  ;;  %v3734_v39 = vsel %vm318_vm5, %v3529_v16, inf  ;;  %v3737_v43 = vsel %vm319_vm6, %v3532_v17, inf  ;;  %vm314_vm9 = vcmp.eq.s32.totalorder %v246_v25, %v3536_v20  ;;  %vm315_vm10 = vcmp.eq.s32.totalorder %v246_v25, %v3538_v21 }
  0x72   : > { %v3742_v46 = vsel %vm316_vm7, %v3529_v16, inf  ;;  %v3745_v50 = vsel %vm317_vm8, %v3532_v17, inf  ;;  %v244_v51 = vadd.s32 208, %v3519_v6  ;;  %v487_v52 = vmin.f32 %v3727_v32, %v3730_v33 }
  0x73   : > { %v484_v57 = vmin.f32 %v3734_v39, %v3737_v43  ;;  %v3753_v58 = vsel %vm314_vm9, %v3529_v16, inf  ;;  %v3756_v60 = vsel %vm315_vm10, %v3532_v17, inf  ;;  %vm312_vm11 = vcmp.eq.s32.totalorder %v245_v36, %v3536_v20 }
  0x74   : > { %6837 = vst [vmem:[#allocation14_spill] sm:$0xff] %v3753_v58  ;;  %6838 = vst [vmem:[#allocation15_spill] sm:$0xff] %v3756_v60  ;;  %v481_v61 = vmin.f32 %v3742_v46, %v3745_v50  ;;  %vm313_vm12 = vcmp.eq.s32.totalorder %v245_v36, %v3538_v21  ;;  %vm310_vm13 = vcmp.eq.s32.totalorder %v244_v51, %v3536_v20  ;;  %v239_v3 = vadd.s32 168, %v3519_v6 }
  0x75   : > { %404 = vmin.xlane.f32.xlu0 %v403_v18  ;;  %401 = vmin.xlane.f32.xlu1 %v400_v19  ;;  %v238_v4 = vadd.s32 160, %v3519_v6  ;;  %v237_v5 = vadd.s32 152, %v3519_v6  ;;  %v478_v12 = vmin.f32 %v3753_v58, %v3756_v60  ;;  %v3769_v13 = vsel %vm312_vm11, %v3529_v16, inf }
  0x76   : > { %6839 = vst [vmem:[#allocation16_spill] sm:$0xff] %v3769_v13  ;;  %vm311_vm14 = vcmp.eq.s32.totalorder %v244_v51, %v3538_v21  ;;  %v236_v15 = vadd.s32 144, %v3519_v6  ;;  %v3774_v18 = vsel %vm313_vm12, %v3532_v17, inf  ;;  %v243_v19 = vadd.s32 200, %v3519_v6 }
  0x77   : > { %6840 = vst [vmem:[#allocation17_spill] sm:$0xff] %v3774_v18  ;;  %vm300_vm15 = vcmp.eq.s32.totalorder %v239_v3, %v3536_v20  ;;  %vm301_vm1 = vcmp.eq.s32.totalorder %v239_v3, %v3538_v21  ;;  %v3780_v25 = vsel %vm310_vm13, %v3529_v16, inf  ;;  %vm298_vm2 = vcmp.eq.s32.totalorder %v238_v4, %v3536_v20 }
  0x78   : > { %6841 = vst [vmem:[#allocation18_spill] sm:$0xff] %v3780_v25  ;;  %v3790_v36 = vsel %vm311_vm14, %v3532_v17, inf  ;;  %vm299_vm3 = vcmp.eq.s32.totalorder %v238_v4, %v3538_v21  ;;  %v3794_v51 = vsel %vm298_vm2, %v3529_v16, inf  ;;  %vm296_vm4 = vcmp.eq.s32.totalorder %v237_v5, %v3536_v20 }
  0x79   : > { %398 = vmin.xlane.f32.xlu0 %v397_v27  ;;  %395 = vmin.xlane.f32.xlu1 %v394_v26  ;;  %v3783_v26 = vsel %vm300_vm15, %v3529_v16, inf  ;;  %v3786_v27 = vsel %vm301_vm1, %v3532_v17, inf  ;;  %6842 = vst [vmem:[#allocation19_spill] sm:$0xff] %v3790_v36  ;;  %vm297_vm5 = vcmp.eq.s32.totalorder %v237_v5, %v3538_v21  ;;  %vm294_vm6 = vcmp.eq.s32.totalorder %v236_v15, %v3536_v20 }
  0x7a   : > { %v475_v3 = vmin.f32 %v3769_v13, %v3774_v18  ;;  %v3808_v4 = vsel %vm297_vm5, %v3532_v17, inf  ;;  %vm295_vm7 = vcmp.eq.s32.totalorder %v236_v15, %v3538_v21  ;;  %v3812_v0 = vsel %vm294_vm6, %v3529_v16, inf }
  0x7b   : > { %6843 = vst [vmem:[#allocation20_spill] sm:$0xff] %v3808_v4  ;;  %v3815_v5 = vsel %vm295_vm7, %v3532_v17, inf  ;;  %v235_v2 = vadd.s32 136, %v3519_v6  ;;  %v234_v11 = vadd.s32 128, %v3519_v6  ;;  %vm308_vm8 = vcmp.eq.s32.totalorder %v243_v19, %v3536_v20 }
  0x7c   : > { %vm309_vm9 = vcmp.eq.s32.totalorder %v243_v19, %v3538_v21  ;;  %v3841_v18 = vsel %vm308_vm8, %v3529_v16, inf  ;;  %v240_v58 = vadd.s32 176, %v3519_v6 }
  0x7d   : > { %488 = vmin.xlane.f32.xlu0 %v487_v52  ;;  %485 = vmin.xlane.f32.xlu1 %v484_v57  ;;  %v3798_v52 = vsel %vm299_vm3, %v3532_v17, inf  ;;  %v3802_v57 = vsel %vm296_vm4, %v3529_v16, inf  ;;  %vm292_vm10 = vcmp.eq.s32.totalorder %v235_v2, %v3536_v20  ;;  %vm293_vm11 = vcmp.eq.s32.totalorder %v235_v2, %v3538_v21 }
  0x7e   : > { %vm290_vm12 = vcmp.eq.s32.totalorder %v234_v11, %v3536_v20  ;;  %vm291_vm13 = vcmp.eq.s32.totalorder %v234_v11, %v3538_v21  ;;  %v3829_v15 = vsel %vm292_vm10, %v3529_v16, inf  ;;  %v3844_v2 = vsel %vm309_vm9, %v3532_v17, inf }
  0x7f   : > { %v3838_v19 = vsel %vm291_vm13, %v3532_v17, inf  ;;  %6844 = vst [vmem:[#allocation21_spill] sm:$0xff] %v3844_v2  ;;  %v241_v11 = vadd.s32 184, %v3519_v6  ;;  %vm302_vm3 = vcmp.eq.s32.totalorder %v240_v58, %v3536_v20  ;;  %vm303_vm4 = vcmp.eq.s32.totalorder %v240_v58, %v3538_v21 }
  0x81   : > { %482 = vmin.xlane.f32.xlu0 %v481_v61  ;;  %479 = vmin.xlane.f32.xlu1 %v478_v12  ;;  %v472_v61 = vmin.f32 %v3780_v25, %v3790_v36  ;;  %v242_v12 = vadd.s32 192, %v3519_v6  ;;  %v3832_v36 = vsel %vm293_vm11, %v3532_v17, inf  ;;  %v3835_v25 = vsel %vm290_vm12, %v3529_v16, inf }
  0x82   : > { %vm304_vm1 = vcmp.eq.s32.totalorder %v241_v11, %v3536_v20  ;;  %vm305_vm2 = vcmp.eq.s32.totalorder %v241_v11, %v3538_v21  ;;  %v3873_v6 = vsel %vm302_vm3, %v3529_v16, inf  ;;  %v445_v58 = vmin.f32 %v3829_v15, %v3832_v36 }
  0x83   : > { %vm306_vm14 = vcmp.eq.s32.totalorder %v242_v12, %v3536_v20  ;;  %vm307_vm15 = vcmp.eq.s32.totalorder %v242_v12, %v3538_v21  ;;  %v457_v20 = vmin.f32 %v3783_v26, %v3786_v27  ;;  %v454_v21 = vmin.f32 %v3794_v51, %v3798_v52 }
  0x84   : > { %v3852_v13 = vsel %vm306_vm14, %v3529_v16, inf  ;;  %v3855_v60 = vsel %vm307_vm15, %v3532_v17, inf }
  0x85   : > { %476 = vmin.xlane.f32.xlu1 %v475_v3  ;;  %v469_v3 = vmin.f32 %v3841_v18, %v3844_v2  ;;  %6845 = vst [vmem:[#allocation22_spill] sm:$0xff] %v3855_v60  ;;  %v466_v12 = vmin.f32 %v3852_v13, %v3855_v60  ;;  %v3866_v2 = vsel %vm305_vm2, %v3532_v17, inf }
  0x89   : > { %473 = vmin.xlane.f32.xlu1 %v472_v61  ;;  %v3863_v61 = vsel %vm304_vm1, %v3529_v16, inf  ;;  %v451_v16 = vmin.f32 %v3802_v57, %v3808_v4 }
  0x8a   : > { %v463_v11 = vmin.f32 %v3863_v61, %v3866_v2 }
  0x8d   : > { %470 = vmin.xlane.f32.xlu1 %v469_v3  ;;  %v3876_v3 = vsel %vm303_vm4, %v3532_v17, inf  ;;  %v448_v17 = vmin.f32 %v3812_v0, %v3815_v5 }
  0x8e   : > { %v460_v60 = vmin.f32 %v3873_v6, %v3876_v3 }
  0x91   : > { %467 = vmin.xlane.f32.xlu1 %v466_v12  ;;  %v6846_v12 = vlaneseq }
  0x95   : > { %464 = vmin.xlane.f32.xlu1 %v463_v11  ;;  %v3893_v11 = vand.u32 127, %v6846_v12 }
  0x97   : > { %6847 = vst [vmem:[#allocation23_spill] sm:$0xff] %v3893_v11  ;;  %v3896_v4 = vadd.s32 128, %v3893_v11 }
  0x99   : > { %461 = vmin.xlane.f32.xlu1 %v460_v60  ;;  %v442_v60 = vmin.f32 %v3835_v25, %v3838_v19  ;;  %6848 = vst [vmem:[#allocation24_spill] sm:$0xff] %v3896_v4 }
  0x9d   : > { %458 = vmin.xlane.f32.xlu1 %v457_v20 }
  0xa1   : > { %455 = vmin.xlane.f32.xlu1 %v454_v21 }
  0xa5   : > { %452 = vmin.xlane.f32.xlu1 %v451_v16 }
  0xa9   : > { %449 = vmin.xlane.f32.xlu1 %v448_v17 }
  0xad   : > { %446 = vmin.xlane.f32.xlu1 %v445_v58 }
  0xb1   : > { %443 = vmin.xlane.f32.xlu1 %v442_v60 }
  0xe6   : > { %v441_v20 = vpop.xlane.xlu0 %440  ;;  %v435_v21 = vpop.xlane.xlu1 %434 }
  0xe7   : > { %vm523_vm5 = vcmp.eq.f32.partialorder %v3553_v28, %v441_v20  ;;  %vm524_vm6 = vcmp.eq.f32.partialorder %v3556_v29, %v441_v20  ;;  %vm572_vm7 = vcmp.lt.f32.partialorder %v441_v20, inf  ;;  %vm519_vm8 = vcmp.eq.f32.partialorder %v3559_v30, %v435_v21 }
  0xe8   : > { %vm683_vm9 = vmand %vm523_vm5, %vm572_vm7  ;;  %vm520_vm10 = vcmp.eq.f32.partialorder %v3562_v31, %v435_v21  ;;  %vm570_vm11 = vcmp.lt.f32.partialorder %v435_v21, inf }
  0xe9   : > { %vm684_vm12 = vmand %vm524_vm6, %vm572_vm7  ;;  %v747_v16 = vsel %vm683_vm9, %v3893_v11, 256 }
  0xea   : > { %vm679_vm13 = vmand %vm519_vm8, %vm570_vm11  ;;  %v438_v17 = vpop.xlane.xlu0 %437  ;;  %v432_v58 = vpop.xlane.xlu1 %431  ;;  %v748_v60 = vsel %vm684_vm12, %v3896_v4, 256 }
  0xeb   : > { %vm680_vm14 = vmand %vm520_vm10, %vm570_vm11  ;;  %vm521_vm15 = vcmp.eq.f32.partialorder %v3571_v34, %v438_v17  ;;  %vm522_vm1 = vcmp.eq.f32.partialorder %v3574_v35, %v438_v17  ;;  %vm571_vm2 = vcmp.lt.f32.partialorder %v438_v17, inf  ;;  %vm517_vm3 = vcmp.eq.f32.partialorder %v3581_v37, %v432_v58 }
  0xec   : > { %vm681_vm4 = vmand %vm521_vm15, %vm571_vm2  ;;  %vm518_vm5 = vcmp.eq.f32.partialorder %v3584_v38, %v432_v58  ;;  %vm569_vm0 = vcmp.lt.f32.partialorder %v432_v58, inf  ;;  %vm1021_vm6 = vcmp.lt.s32.totalorder %v747_v16, %v748_v60  ;;  %v743_v28 = vsel %vm679_vm13, %v3893_v11, 256 }
  0xed   : > { %vm682_vm7 = vmand %vm522_vm1, %vm571_vm2  ;;  %v3909_v29 = vsel %vm1021_vm6, %v747_v16, %v748_v60  ;;  %v745_v30 = vsel %vm681_vm4, %v3893_v11, 256  ;;  %v744_v31 = vsel %vm680_vm14, %v3896_v4, 256 }
  0xee   : > { %vm3913_vm8 = vmand %vm517_vm3, %vm569_vm0  ;;  %v429_v35 = vpop.xlane.xlu0 %428  ;;  %v426_v37 = vpop.xlane.xlu1 %425  ;;  %v1024_v12 = vshra.s32 %v3909_v29, 16  ;;  %v746_v38 = vsel %vm682_vm7, %v3896_v4, 256  ;;  %vm989_vm9 = vcmp.lt.s32.totalorder %v743_v28, %v744_v31 }
  0xef   : > { %vm678_vm10 = vmand %vm518_vm5, %vm569_vm0  ;;  %vm515_vm11 = vcmp.eq.f32.partialorder %v3591_v40, %v429_v35  ;;  %vm516_vm12 = vcmp.eq.f32.partialorder %v3595_v41, %v429_v35  ;;  %vm568_vm13 = vcmp.lt.f32.partialorder %v429_v35, inf  ;;  %vm513_vm15 = vcmp.eq.f32.partialorder %v3599_v42, %v426_v37 }
  0xf0   : > { %vm3922_vm14 = vmand %vm515_vm11, %vm568_vm13  ;;  %vm514_vm1 = vcmp.eq.f32.partialorder %v3605_v44, %v426_v37  ;;  %vm567_vm2 = vcmp.lt.f32.partialorder %v426_v37, inf  ;;  %v3927_v21 = vcvt.s32.f32 %v1024_v12  ;;  %vm1005_vm3 = vcmp.lt.s32.totalorder %v745_v30, %v746_v38 }
  0xf1   : > { %vm3929_vm4 = vmand %vm516_vm12, %vm568_vm13  ;;  %v3933_v40 = vsel %vm1005_vm3, %v745_v30, %v746_v38  ;;  %v3935_v41 = vsel %vm989_vm9, %v743_v28, %v744_v31  ;;  %v741_v42 = vsel %vm3913_vm8, %v3893_v11, 256  ;;  %v742_v17 = vsel %vm678_vm10, %v3896_v4, 256 }
  0xf2   : > { %vm3942_vm0 = vmand %vm513_vm15, %vm567_vm2  ;;  %1027 = vmin.xlane.f32.xlu0 %v3927_v21  ;;  %v423_v60 = vpop.xlane.xlu0 %422  ;;  %v420_v35 = vpop.xlane.xlu1 %419  ;;  %v1008_v30 = vshra.s32 %v3933_v40, 16  ;;  %v992_v28 = vshra.s32 %v3935_v41, 16  ;;  %vm973_vm5 = vcmp.lt.s32.totalorder %v741_v42, %v742_v17  ;;  %v739_v31 = vsel %vm3922_vm14, %v3893_v11, 256 }
  0xf3   : > { %vm674_vm6 = vmand %vm514_vm1, %vm567_vm2  ;;  %vm511_vm7 = vcmp.eq.f32.partialorder %v3609_v45, %v423_v60  ;;  %vm512_vm8 = vcmp.eq.f32.partialorder %v3614_v47, %v423_v60  ;;  %vm566_vm9 = vcmp.lt.f32.partialorder %v423_v60, inf  ;;  %vm509_vm10 = vcmp.eq.f32.partialorder %v3619_v48, %v420_v35 }
  0xf4   : > { %vm3958_vm11 = vmand %vm511_vm7, %vm566_vm9  ;;  %vm510_vm12 = vcmp.eq.f32.partialorder %v3622_v49, %v420_v35  ;;  %vm565_vm13 = vcmp.lt.f32.partialorder %v420_v35, inf  ;;  %v3963_v12 = vcvt.s32.f32 %v1008_v30  ;;  %v3969_v44 = vsel %vm973_vm5, %v741_v42, %v742_v17 }
  0xf5   : > { %vm3965_vm15 = vmand %vm512_vm8, %vm566_vm9  ;;  %v740_v45 = vsel %vm3929_vm4, %v3896_v4, 256  ;;  %v737_v47 = vsel %vm3942_vm0, %v3893_v11, 256  ;;  %v738_v48 = vsel %vm674_vm6, %v3896_v4, 256  ;;  %v3983_v42 = vcvt.s32.f32 %v992_v28 }
  0xf6   : > { %vm3978_vm14 = vmand %vm509_vm10, %vm565_vm13  ;;  %1011 = vmin.xlane.f32.xlu0 %v3963_v12  ;;  %v417_v20 = vpop.xlane.xlu0 %416  ;;  %v414_v60 = vpop.xlane.xlu1 %413  ;;  %v976_v17 = vshra.s32 %v3969_v44, 16  ;;  %vm957_vm1 = vcmp.lt.s32.totalorder %v739_v31, %v740_v45  ;;  %vm941_vm9 = vcmp.lt.s32.totalorder %v737_v47, %v738_v48 }
  0xf7   : > { %vm3988_vm2 = vmand %vm510_vm12, %vm565_vm13  ;;  %vm507_vm3 = vcmp.eq.f32.partialorder %v3634_v53, %v417_v20  ;;  %vm508_vm4 = vcmp.eq.f32.partialorder %v3637_v54, %v417_v20  ;;  %vm564_vm0 = vcmp.lt.f32.partialorder %v417_v20, inf  ;;  %vm505_vm5 = vcmp.eq.f32.partialorder %v3640_v55, %v414_v60 }
  0xf8   : > { %vm3995_vm6 = vmand %vm507_vm3, %vm564_vm0  ;;  %vm506_vm7 = vcmp.eq.f32.partialorder %v3645_v56, %v414_v60  ;;  %vm563_vm8 = vcmp.lt.f32.partialorder %v414_v60, inf  ;;  %v4000_v30 = vsel %vm957_vm1, %v739_v31, %v740_v45  ;;  %v735_v53 = vsel %vm3958_vm11, %v3893_v11, 256 }
  0xf9   : > { %vm4002_vm10 = vmand %vm508_vm4, %vm564_vm0  ;;  %v736_v54 = vsel %vm3965_vm15, %v3896_v4, 256  ;;  %v4017_v31 = vcvt.s32.f32 %v976_v17  ;;  %v960_v45 = vshra.s32 %v4000_v30, 16  ;;  %v733_v34 = vsel %vm3978_vm14, %v3893_v11, 256 }
  0xfa   : > { %vm4012_vm12 = vmand %vm505_vm5, %vm563_vm8  ;;  %995 = vmin.xlane.f32.xlu0 %v3983_v42  ;;  %v411_v35 = vpop.xlane.xlu0 %410  ;;  %v408_v28 = vpop.xlane.xlu1 %407  ;;  %v734_v38 = vsel %vm3988_vm2, %v3896_v4, 256  ;;  %v4035_v17 = vsel %vm941_vm9, %v737_v47, %v738_v48  ;;  %vm925_vm3 = vcmp.lt.s32.totalorder %v735_v53, %v736_v54  ;;  %v731_v37 = vsel %vm3995_vm6, %v3893_v11, 256 }
  0xfb   : > { %vm4028_vm11 = vmand %vm506_vm7, %vm563_vm8  ;;  %vm503_vm13 = vcmp.eq.f32.partialorder %v3655_v59, %v411_v35  ;;  %vm504_vm15 = vcmp.eq.f32.partialorder %v3661_v62, %v411_v35  ;;  %vm562_vm1 = vcmp.lt.f32.partialorder %v411_v35, inf  ;;  %vm909_vm2 = vcmp.lt.s32.totalorder %v733_v34, %v734_v38 }
  0xfc   : > { %vm4040_vm14 = vmand %vm503_vm13, %vm562_vm1  ;;  %v732_v56 = vsel %vm4002_vm10, %v3896_v4, 256  ;;  %v4052_v48 = vcvt.s32.f32 %v960_v45  ;;  %v944_v60 = vshra.s32 %v4035_v17, 16  ;;  %v729_v58 = vsel %vm4012_vm12, %v3893_v11, 256 }
  0xfd   : > { %vm4047_vm4 = vmand %vm504_vm15, %vm562_vm1  ;;  %v730_v49 = vsel %vm4028_vm11, %v3896_v4, 256  ;;  %vm501_vm0 = vcmp.eq.f32.partialorder %v3664_v63, %v408_v28  ;;  %v4063_v35 = vsel %vm925_vm3, %v735_v53, %v736_v54  ;;  %vm893_vm6 = vcmp.lt.s32.totalorder %v731_v37, %v732_v56 }
  0xfe   : > { %979 = vmin.xlane.f32.xlu0 %v4017_v31  ;;  %v405_v62 = vpop.xlane.xlu0 %404  ;;  %v402_v47 = vpop.xlane.xlu1 %401  ;;  %vm502_vm7 = vcmp.eq.f32.partialorder %v3667_v1, %v408_v28  ;;  %v4068_v45 = vsel %vm909_vm2, %v733_v34, %v734_v38  ;;  %vm561_vm10 = vcmp.lt.f32.partialorder %v408_v28, inf  ;;  %vm877_vm12 = vcmp.lt.s32.totalorder %v729_v58, %v730_v49 }
  0xff   : > { %vm497_vm5 = vcmp.eq.f32.partialorder %v3689_v9, %v402_v47  ;;  %vm498_vm8 = vcmp.eq.f32.partialorder %v3692_v10, %v402_v47  ;;  %vm559_vm9 = vcmp.lt.f32.partialorder %v402_v47, inf  ;;  %6877 = vst [vmem:[#allocation25_spill] sm:$0xff] %v4068_v45  ;;  %v727_v55 = vsel %vm4040_vm14, %v3893_v11, 256  ;;  %vm4095_vm14 = vmand %vm501_vm0, %vm561_vm10 }
 0x100   : > { %v728_v9 = vsel %vm4047_vm4, %v3896_v4, 256  ;;  %vm499_vm11 = vcmp.eq.f32.partialorder %v3679_v7, %v405_v62  ;;  %vm657_vm13 = vmand %vm497_vm5, %vm559_vm9  ;;  %v4080_v34 = vcvt.s32.f32 %v944_v60  ;;  %v928_v38 = vshra.s32 %v4063_v35, 16 }
 0x101   : > { %v4084_v20 = vsel %vm893_vm6, %v731_v37, %v732_v56  ;;  %vm658_vm15 = vmand %vm498_vm8, %vm559_vm9  ;;  %v912_v16 = vshra.s32 %v4068_v45, 16  ;;  %v4090_v59 = vsel %vm877_vm12, %v729_v58, %v730_v49  ;;  %vm861_vm3 = vcmp.lt.s32.totalorder %v727_v55, %v728_v9 }
 0x102   : > { %963 = vmin.xlane.f32.xlu0 %v4052_v48  ;;  %v4078_v53 = vpop.xlane.xlu0 %398  ;;  %v396_v54 = vpop.xlane.xlu1 %395  ;;  %v721_v10 = vsel %vm657_vm13, %v3893_v11, 256  ;;  %v722_v37 = vsel %vm658_vm15, %v3896_v4, 256  ;;  %vm4105_vm5 = vmand %vm502_vm7, %vm561_vm10  ;;  %vm500_vm6 = vcmp.eq.f32.partialorder %v3682_v8, %v405_v62  ;;  %vm560_vm0 = vcmp.lt.f32.partialorder %v405_v62, inf }
 0x103   : > { %vm493_vm1 = vcmp.eq.f32.partialorder %v3699_v14, %v396_v54  ;;  %vm494_vm2 = vcmp.eq.f32.partialorder %v3710_v23, %v396_v54  ;;  %vm557_vm4 = vcmp.lt.f32.partialorder %v396_v54, inf  ;;  %vm813_vm8 = vcmp.lt.s32.totalorder %v721_v10, %v722_v37  ;;  %vm4139_vm15 = vmand %vm499_vm11, %vm560_vm0  ;;  %v6893_v54 = vld [vmem:[#allocation15_spill] sm:$0xff] }
 0x104   : > { %v896_v63 = vshra.s32 %v4084_v20, 16  ;;  %vm4112_vm9 = vmand %vm493_vm1, %vm557_vm4  ;;  %v4119_v28 = vcvt.s32.f32 %v928_v38  ;;  %v4121_v58 = vsel %vm813_vm8, %v721_v10, %v722_v37  ;;  %v880_v49 = vshra.s32 %v4090_v59, 16 }
 0x105   : > { %6884 = vst [vmem:[#allocation26_spill] sm:$0xff] %v4121_v58  ;;  %v4125_v45 = vsel %vm861_vm3, %v727_v55, %v728_v9  ;;  %vm495_vm7 = vcmp.eq.f32.partialorder %v3707_v22, %v4078_v53  ;;  %vm558_vm10 = vcmp.lt.f32.partialorder %v4078_v53, inf  ;;  %vm654_vm12 = vmand %vm494_vm2, %vm557_vm4  ;;  %v4134_v38 = vcvt.s32.f32 %v912_v16 }
 0x106   : > { %947 = vmin.xlane.f32.xlu0 %v4080_v34  ;;  %v4117_v47 = vpop.xlane.xlu0 %488  ;;  %v486_v1 = vpop.xlane.xlu1 %485  ;;  %v816_v23 = vshra.s32 %v4121_v58, 16  ;;  %vm4153_vm2 = vmand %vm500_vm6, %vm560_vm0  ;;  %v718_v55 = vsel %vm654_vm12, %v3896_v4, 256  ;;  %v4158_v9 = vcvt.s32.f32 %v896_v63  ;;  %v4164_v16 = vsel %vm4095_vm14, %v3893_v11, 256  ;;  %v6902_v58 = vld [vmem:[#allocation18_spill] sm:$0xff] }
 0x107   : > { %vm553_vm13 = vcmp.eq.f32.partialorder %v3734_v39, %v486_v1  ;;  %vm554_vm3 = vcmp.eq.f32.partialorder %v3737_v43, %v486_v1  ;;  %vm587_vm8 = vcmp.lt.f32.partialorder %v486_v1, inf  ;;  %v717_v39 = vsel %vm4112_vm9, %v3893_v11, 256 }
 0x108   : > { %vm4167_vm11 = vmand %vm553_vm13, %vm587_vm8  ;;  %v4172_v8 = vcvt.s32.f32 %v816_v23  ;;  %vm781_vm4 = vcmp.lt.s32.totalorder %v717_v39, %v718_v55  ;;  %v4174_v56 = vcvt.s32.f32 %v880_v49  ;;  %v726_v60 = vsel %vm4105_vm5, %v3896_v4, 256  ;;  %v6892_v23 = vld [vmem:[#allocation14_spill] sm:$0xff] }
 0x109   : > { %vm714_vm0 = vmand %vm554_vm3, %vm587_vm8  ;;  %v4187_v49 = vsel %vm781_vm4, %v717_v39, %v718_v55  ;;  %v777_v43 = vsel %vm4167_vm11, %v3893_v11, 256  ;;  %vm845_vm4 = vcmp.lt.s32.totalorder %v4164_v16, %v726_v60 }
 0x10a   : > { %931 = vmin.xlane.f32.xlu0 %v4119_v28  ;;  %6891 = vst [vmem:[#allocation27_spill] sm:$0xff] %v4172_v8  ;;  %v483_v62 = vpop.xlane.xlu0 %482  ;;  %v480_v63 = vpop.xlane.xlu1 %479  ;;  %819 = vmin.xlane.f32.xlu1 %v4172_v8  ;;  %v784_v14 = vshra.s32 %v4187_v49, 16 }
 0x10b   : > { %vm551_vm9 = vcmp.eq.f32.partialorder %v3742_v46, %v483_v62  ;;  %vm552_vm12 = vcmp.eq.f32.partialorder %v3745_v50, %v483_v62  ;;  %vm586_vm13 = vcmp.lt.f32.partialorder %v483_v62, inf  ;;  %vm549_vm14 = vcmp.eq.f32.partialorder %v6892_v23, %v480_v63  ;;  %v6894_v62 = vld [vmem:[#allocation16_spill] sm:$0xff] }
 0x10c   : > { %vm711_vm5 = vmand %vm551_vm9, %vm586_vm13  ;;  %vm550_vm6 = vcmp.eq.f32.partialorder %v6893_v54, %v480_v63  ;;  %vm585_vm3 = vcmp.lt.f32.partialorder %v480_v63, inf  ;;  %v778_v46 = vsel %vm714_vm0, %v3896_v4, 256  ;;  %v4202_v1 = vcvt.s32.f32 %v784_v14  ;;  %v6895_v63 = vld [vmem:[#allocation17_spill] sm:$0xff] }
 0x10d   : > { %vm712_vm8 = vmand %vm552_vm12, %vm586_vm13  ;;  %v775_v50 = vsel %vm711_vm5, %v3893_v11, 256  ;;  %vm1261_vm1 = vcmp.lt.s32.totalorder %v777_v43, %v778_v46  ;;  %v723_v54 = vsel %vm4139_vm15, %v3893_v11, 256 }
 0x10e   : > { %915 = vmin.xlane.f32.xlu0 %v4134_v38  ;;  %vm709_vm9 = vmand %vm549_vm14, %vm585_vm3  ;;  %v477_v39 = vpop.xlane.xlu1 %476  ;;  %v776_v55 = vsel %vm712_vm8, %v3896_v4, 256  ;;  %v4208_v37 = vsel %vm1261_vm1, %v777_v43, %v778_v46  ;;  %787 = vmin.xlane.f32.xlu1 %v4202_v1  ;;  %v724_v46 = vsel %vm4153_vm2, %v3896_v4, 256  ;;  %vm6899_vm2 = vcmp.eq.f32.partialorder %v3713_v24, %v4078_v53 }
 0x10f   : > { %vm710_vm11 = vmand %vm550_vm6, %vm585_vm3  ;;  %vm547_vm0 = vcmp.eq.f32.partialorder %v6894_v62, %v477_v39  ;;  %vm548_vm12 = vcmp.eq.f32.partialorder %v6895_v63, %v477_v39  ;;  %vm584_vm13 = vcmp.lt.f32.partialorder %v477_v39, inf  ;;  %v1264_v14 = vshra.s32 %v4208_v37, 16 }
 0x110   : > { %vm707_vm14 = vmand %vm547_vm0, %vm584_vm13  ;;  %vm1245_vm5 = vcmp.lt.s32.totalorder %v775_v50, %v776_v55  ;;  %v773_v23 = vsel %vm709_vm9, %v3893_v11, 256  ;;  %v774_v8 = vsel %vm710_vm11, %v3896_v4, 256  ;;  %vm829_vm0 = vcmp.lt.s32.totalorder %v723_v54, %v724_v46 }
 0x111   : > { %vm708_vm8 = vmand %vm548_vm12, %vm584_vm13  ;;  %v4216_v10 = vsel %vm1245_vm5, %v775_v50, %v776_v55  ;;  %vm1229_vm15 = vcmp.lt.s32.totalorder %v773_v23, %v774_v8  ;;  %v771_v43 = vsel %vm707_vm14, %v3893_v11, 256  ;;  %v4232_v50 = vcvt.s32.f32 %v1264_v14  ;;  %v6903_v14 = vld [vmem:[#allocation19_spill] sm:$0xff] }
 0x112   : > { %6896 = vst [vmem:[#allocation14_spill] sm:$0xff] %v4216_v10  ;;  %vm4227_vm1 = vmand %vm495_vm7, %vm558_vm10  ;;  %899 = vmin.xlane.f32.xlu0 %v4158_v9  ;;  %v1248_v55 = vshra.s32 %v4216_v10, 16  ;;  %v474_v62 = vpop.xlane.xlu1 %473  ;;  %v4235_v63 = vsel %vm1229_vm15, %v773_v23, %v774_v8  ;;  %v772_v7 = vsel %vm708_vm8, %v3896_v4, 256  ;;  %v4252_v8 = vsel %vm845_vm4, %v4164_v16, %v726_v60  ;;  %v6915_v10 = vld [vmem:[#allocation21_spill] sm:$0xff] }
 0x113   : > { %vm4243_vm7 = vmand %vm6899_vm2, %vm558_vm10  ;;  %vm545_vm6 = vcmp.eq.f32.partialorder %v6902_v58, %v474_v62  ;;  %vm546_vm3 = vcmp.eq.f32.partialorder %v6903_v14, %v474_v62  ;;  %vm583_vm9 = vcmp.lt.f32.partialorder %v474_v62, inf  ;;  %1267 = vmin.xlane.f32.xlu1 %v4232_v50  ;;  %v1232_v24 = vshra.s32 %v4235_v63, 16 }
 0x114   : > { %v4255_v23 = vcvt.s32.f32 %v1248_v55  ;;  %vm705_vm11 = vmand %vm545_vm6, %vm583_vm9  ;;  %vm1213_vm10 = vcmp.lt.s32.totalorder %v771_v43, %v772_v7  ;;  %v6905_v53 = vshra.s32 %v4125_v45, 16  ;;  %v719_v16 = vsel %vm4227_vm1, %v3893_v11, 256 }
 0x115   : > { %vm706_vm12 = vmand %vm546_vm3, %vm583_vm9  ;;  %v4262_v62 = vsel %vm1213_vm10, %v771_v43, %v772_v7  ;;  %v769_v14 = vsel %vm705_vm11, %v3893_v11, 256  ;;  %vm6907_vm4 = vcmp.lt.f32.partialorder %v4117_v47, inf  ;;  %vm6908_vm13 = vcmp.eq.f32.partialorder %v3727_v32, %v4117_v47 }
 0x116   : > { %6904 = vst [vmem:[#allocation15_spill] sm:$0xff] %v4255_v23  ;;  %v4260_v58 = vcvt.s32.f32 %v6905_v53  ;;  %6906 = vst [vmem:[#allocation16_spill] sm:$0xff] %v4262_v62  ;;  %883 = vmin.xlane.f32.xlu0 %v4174_v56  ;;  %v471_v55 = vpop.xlane.xlu1 %470  ;;  %v848_v43 = vshra.s32 %v4252_v8, 16  ;;  %v4279_v7 = vsel %vm829_vm0, %v723_v54, %v724_v46  ;;  %v770_v53 = vsel %vm706_vm12, %v3896_v4, 256 }
 0x117   : > { %vm4273_vm14 = vmand %vm6908_vm13, %vm6907_vm4  ;;  %v720_v39 = vsel %vm4243_vm7, %v3896_v4, 256  ;;  %vm6912_vm8 = vcmp.eq.f32.partialorder %v3730_v33, %v4117_v47  ;;  %vm543_vm1 = vcmp.eq.f32.partialorder %v3841_v18, %v471_v55  ;;  %vm544_vm2 = vcmp.eq.f32.partialorder %v6915_v10, %v471_v55  ;;  %1251 = vmin.xlane.f32.xlu1 %v4255_v23 }
 0x118   : > { %vm6911_vm5 = vmmov %vm6907_vm4  ;;  %vm582_vm6 = vcmp.lt.f32.partialorder %v471_v55, inf  ;;  %vm1197_vm3 = vcmp.lt.s32.totalorder %v769_v14, %v770_v53  ;;  %v4297_v54 = vcvt.s32.f32 %v1232_v24  ;;  %v1216_v46 = vshra.s32 %v4262_v62, 16 }
 0x119   : > { %vm4290_vm15 = vmand %vm6912_vm8, %vm6911_vm5  ;;  %vm797_vm9 = vcmp.lt.s32.totalorder %v719_v16, %v720_v39  ;;  %v4300_v33 = vsel %vm1197_vm3, %v769_v14, %v770_v53  ;;  %v779_v18 = vsel %vm4273_vm14, %v3893_v11, 256  ;;  %v4307_v10 = vcvt.s32.f32 %v848_v43  ;;  %v6916_v53 = vld [vmem:[#allocation22_spill] sm:$0xff] }
 0x11a   : > { %vm703_vm7 = vmand %vm543_vm1, %vm582_vm6  ;;  %867 = vmin.xlane.f32.xlu0 %v4260_v58  ;;  %v468_v22 = vpop.xlane.xlu1 %467  ;;  %v832_v24 = vshra.s32 %v4279_v7, 16  ;;  %v780_v14 = vsel %vm4290_vm15, %v3896_v4, 256  ;;  %v4316_v60 = vsel %vm797_vm9, %v719_v16, %v720_v39  ;;  %v4319_v43 = vcvt.s32.f32 %v1216_v46 }
 0x11b   : > { %vm704_vm11 = vmand %vm544_vm2, %vm582_vm6  ;;  %v767_v47 = vsel %vm703_vm7, %v3893_v11, 256  ;;  %vm541_vm10 = vcmp.eq.f32.partialorder %v3852_v13, %v468_v22  ;;  %vm542_vm0 = vcmp.eq.f32.partialorder %v6916_v53, %v468_v22  ;;  %vm581_vm12 = vcmp.lt.f32.partialorder %v468_v22, inf  ;;  %1235 = vmin.xlane.f32.xlu1 %v4297_v54 }
 0x11c   : > { %v768_v55 = vsel %vm704_vm11, %v3896_v4, 256  ;;  %vm701_vm4 = vmand %vm541_vm10, %vm581_vm12  ;;  %v1200_v62 = vshra.s32 %v4300_v33, 16  ;;  %vm1277_vm14 = vcmp.lt.s32.totalorder %v779_v18, %v780_v14  ;;  %v4326_v13 = vcvt.s32.f32 %v832_v24 }
 0x11d   : > { %vm1181_vm13 = vcmp.lt.s32.totalorder %v767_v47, %v768_v55  ;;  %vm702_vm5 = vmand %vm542_vm0, %vm581_vm12  ;;  %v765_v32 = vsel %vm701_vm4, %v3893_v11, 256  ;;  %v800_v39 = vshra.s32 %v4316_v60, 16  ;;  %v4329_v22 = vsel %vm1277_vm14, %v779_v18, %v780_v14 }
 0x11e   : > { %v4322_v23 = vsel %vm1181_vm13, %v767_v47, %v768_v55  ;;  %851 = vmin.xlane.f32.xlu0 %v4307_v10  ;;  %v465_v16 = vpop.xlane.xlu1 %464  ;;  %v766_v46 = vsel %vm702_vm5, %v3896_v4, 256  ;;  %v4335_v47 = vcvt.s32.f32 %v1200_v62 }
 0x11f   : > { %vm539_vm8 = vcmp.eq.f32.partialorder %v3863_v61, %v465_v16  ;;  %vm540_vm15 = vcmp.eq.f32.partialorder %v3866_v2, %v465_v16  ;;  %vm580_vm1 = vcmp.lt.f32.partialorder %v465_v16, inf  ;;  %vm1165_vm2 = vcmp.lt.s32.totalorder %v765_v32, %v766_v46  ;;  %1219 = vmin.xlane.f32.xlu1 %v4319_v43 }
 0x120   : > { %vm699_vm6 = vmand %vm539_vm8, %vm580_vm1  ;;  %v1184_v24 = vshra.s32 %v4322_v23, 16  ;;  %v4338_v55 = vsel %vm1165_vm2, %v765_v32, %v766_v46  ;;  %v4342_v14 = vcvt.s32.f32 %v800_v39  ;;  %v1280_v2 = vshra.s32 %v4329_v22, 16 }
 0x121   : > { %vm700_vm3 = vmand %vm540_vm15, %vm580_vm1  ;;  %v763_v18 = vsel %vm699_vm6, %v3893_v11, 256  ;;  %v1168_v32 = vshra.s32 %v4338_v55, 16 }
 0x122   : > { %835 = vmin.xlane.f32.xlu0 %v4326_v13  ;;  %v462_v61 = vpop.xlane.xlu1 %461  ;;  %v764_v53 = vsel %vm700_vm3, %v3896_v4, 256  ;;  %v4349_v62 = vcvt.s32.f32 %v1184_v24  ;;  %v4356_v46 = vcvt.s32.f32 %v1280_v2 }
 0x123   : > { %vm537_vm7 = vcmp.eq.f32.partialorder %v3873_v6, %v462_v61  ;;  %vm538_vm9 = vcmp.eq.f32.partialorder %v3876_v3, %v462_v61  ;;  %vm579_vm11 = vcmp.lt.f32.partialorder %v462_v61, inf  ;;  %1203 = vmin.xlane.f32.xlu1 %v4335_v47  ;;  %vm1149_vm0 = vcmp.lt.s32.totalorder %v763_v18, %v764_v53 }
 0x124   : > { %6917 = vst [vmem:[#allocation17_spill] sm:$0xff] %v4349_v62  ;;  %vm697_vm10 = vmand %vm537_vm7, %vm579_vm11  ;;  %v4352_v16 = vsel %vm1149_vm0, %v763_v18, %v764_v53  ;;  %v4362_v24 = vcvt.s32.f32 %v1168_v32 }
 0x125   : > { %vm698_vm12 = vmand %vm538_vm9, %vm579_vm11  ;;  %6918 = vst [vmem:[#allocation18_spill] sm:$0xff] %v4352_v16  ;;  %v761_v39 = vsel %vm697_vm10, %v3893_v11, 256  ;;  %v1152_v18 = vshra.s32 %v4352_v16, 16 }
 0x126   : > { %803 = vmin.xlane.f32.xlu0 %v4342_v14  ;;  %v459_v6 = vpop.xlane.xlu1 %458  ;;  %v762_v3 = vsel %vm698_vm12, %v3896_v4, 256 }
 0x127   : > { %vm535_vm4 = vcmp.eq.f32.partialorder %v3783_v26, %v459_v6  ;;  %vm536_vm13 = vcmp.eq.f32.partialorder %v3786_v27, %v459_v6  ;;  %vm578_vm14 = vcmp.lt.f32.partialorder %v459_v6, inf  ;;  %vm1133_vm5 = vcmp.lt.s32.totalorder %v761_v39, %v762_v3  ;;  %1187 = vmin.xlane.f32.xlu1 %v4349_v62 }
 0x128   : > { %vm695_vm8 = vmand %vm535_vm4, %vm578_vm14  ;;  %v4365_v61 = vsel %vm1133_vm5, %v761_v39, %v762_v3  ;;  %v4373_v27 = vcvt.s32.f32 %v1152_v18 }
 0x129   : > { %vm696_vm15 = vmand %vm536_vm13, %vm578_vm14  ;;  %v759_v2 = vsel %vm695_vm8, %v3893_v11, 256  ;;  %v1136_v32 = vshra.s32 %v4365_v61, 16 }
 0x12a   : > { %1283 = vmin.xlane.f32.xlu0 %v4356_v46  ;;  %v456_v53 = vpop.xlane.xlu1 %455  ;;  %v760_v26 = vsel %vm696_vm15, %v3896_v4, 256 }
 0x12b   : > { %vm533_vm1 = vcmp.eq.f32.partialorder %v3794_v51, %v456_v53  ;;  %vm534_vm2 = vcmp.eq.f32.partialorder %v3798_v52, %v456_v53  ;;  %vm577_vm6 = vcmp.lt.f32.partialorder %v456_v53, inf  ;;  %1171 = vmin.xlane.f32.xlu1 %v4362_v24  ;;  %vm1117_vm7 = vcmp.lt.s32.totalorder %v759_v2, %v760_v26  ;;  %v6919_v51 = vld [vmem:[#allocation20_spill] sm:$0xff] }
 0x12c   : > { %vm693_vm3 = vmand %vm533_vm1, %vm577_vm6  ;;  %v4376_v39 = vsel %vm1117_vm7, %v759_v2, %v760_v26  ;;  %v4383_v52 = vcvt.s32.f32 %v1136_v32 }
 0x12d   : > { %vm694_vm9 = vmand %vm534_vm2, %vm577_vm6  ;;  %v757_v6 = vsel %vm693_vm3, %v3893_v11, 256  ;;  %v1120_v18 = vshra.s32 %v4376_v39, 16 }
 0x12e   : > { %v453_v3 = vpop.xlane.xlu1 %452  ;;  %v758_v16 = vsel %vm694_vm9, %v3896_v4, 256 }
 0x12f   : > { %vm531_vm11 = vcmp.eq.f32.partialorder %v3802_v57, %v453_v3  ;;  %vm532_vm10 = vcmp.eq.f32.partialorder %v6919_v51, %v453_v3  ;;  %vm576_vm0 = vcmp.lt.f32.partialorder %v453_v3, inf  ;;  %vm1101_vm12 = vcmp.lt.s32.totalorder %v757_v6, %v758_v16  ;;  %1155 = vmin.xlane.f32.xlu1 %v4373_v27 }
 0x130   : > { %vm691_vm4 = vmand %vm531_vm11, %vm576_vm0  ;;  %v4386_v2 = vsel %vm1101_vm12, %v757_v6, %v758_v16  ;;  %v4393_v57 = vcvt.s32.f32 %v1120_v18 }
 0x131   : > { %vm692_vm13 = vmand %vm532_vm10, %vm576_vm0  ;;  %v755_v53 = vsel %vm691_vm4, %v3893_v11, 256  ;;  %v1104_v32 = vshra.s32 %v4386_v2, 16 }
 0x132   : > { %v450_v26 = vpop.xlane.xlu1 %449  ;;  %v756_v62 = vsel %vm692_vm13, %v3896_v4, 256 }
 0x133   : > { %vm529_vm14 = vcmp.eq.f32.partialorder %v3812_v0, %v450_v26  ;;  %vm530_vm5 = vcmp.eq.f32.partialorder %v3815_v5, %v450_v26  ;;  %vm575_vm8 = vcmp.lt.f32.partialorder %v450_v26, inf  ;;  %1139 = vmin.xlane.f32.xlu1 %v4383_v52  ;;  %vm1085_vm1 = vcmp.lt.s32.totalorder %v755_v53, %v756_v62 }
 0x134   : > { %vm689_vm15 = vmand %vm529_vm14, %vm575_vm8  ;;  %v4396_v16 = vsel %vm1085_vm1, %v755_v53, %v756_v62  ;;  %v4403_v0 = vcvt.s32.f32 %v1104_v32 }
 0x135   : > { %vm690_vm2 = vmand %vm530_vm5, %vm575_vm8  ;;  %v753_v6 = vsel %vm689_vm15, %v3893_v11, 256  ;;  %v1088_v5 = vshra.s32 %v4396_v16, 16 }
 0x136   : > { %v447_v3 = vpop.xlane.xlu1 %446  ;;  %v754_v51 = vsel %vm690_vm2, %v3896_v4, 256 }
 0x137   : > { %vm527_vm6 = vcmp.eq.f32.partialorder %v3829_v15, %v447_v3  ;;  %vm528_vm3 = vcmp.eq.f32.partialorder %v3832_v36, %v447_v3  ;;  %vm574_vm7 = vcmp.lt.f32.partialorder %v447_v3, inf  ;;  %vm1069_vm9 = vcmp.lt.s32.totalorder %v753_v6, %v754_v51  ;;  %1123 = vmin.xlane.f32.xlu1 %v4393_v57 }
 0x138   : > { %vm687_vm11 = vmand %vm527_vm6, %vm574_vm7  ;;  %v4406_v62 = vsel %vm1069_vm9, %v753_v6, %v754_v51  ;;  %v4413_v36 = vcvt.s32.f32 %v1088_v5 }
 0x139   : > { %vm688_vm10 = vmand %vm528_vm3, %vm574_vm7  ;;  %v751_v18 = vsel %vm687_vm11, %v3893_v11, 256  ;;  %v1072_v15 = vshra.s32 %v4406_v62, 16 }
 0x13a   : > { %v444_v53 = vpop.xlane.xlu1 %443  ;;  %v752_v26 = vsel %vm688_vm10, %v3896_v4, 256 }
 0x13b   : > { %vm525_vm0 = vcmp.eq.f32.partialorder %v3835_v25, %v444_v53  ;;  %vm526_vm12 = vcmp.eq.f32.partialorder %v3838_v19, %v444_v53  ;;  %vm573_vm4 = vcmp.lt.f32.partialorder %v444_v53, inf  ;;  %1107 = vmin.xlane.f32.xlu1 %v4403_v0  ;;  %vm1053_vm14 = vcmp.lt.s32.totalorder %v751_v18, %v752_v26 }
 0x13c   : > { %vm685_vm13 = vmand %vm525_vm0, %vm573_vm4  ;;  %v4416_v32 = vsel %vm1053_vm14, %v751_v18, %v752_v26  ;;  %v4421_v25 = vcvt.s32.f32 %v1072_v15  ;;  %v1023_v26 = vand.u32 65535, %v3909_v29 }
 0x13d   : > { %vm686_vm5 = vmand %vm526_vm12, %vm573_vm4  ;;  %v749_v6 = vsel %vm685_vm13, %v3893_v11, 256  ;;  %v1056_v19 = vshra.s32 %v4416_v32, 16 }
 0x13e   : > { %v750_v3 = vsel %vm686_vm5, %v3896_v4, 256  ;;  %v1025_v11 = vcvt.s32.f32 %v1023_v26 }
 0x13f   : > { %vm1037_vm8 = vcmp.lt.s32.totalorder %v749_v6, %v750_v3  ;;  %1091 = vmin.xlane.f32.xlu1 %v4413_v36  ;;  %v4427_v5 = vcvt.s32.f32 %v1056_v19 }
 0x140   : > { %v4424_v51 = vsel %vm1037_vm8, %v749_v6, %v750_v3  ;;  %v1007_v6 = vand.u32 65535, %v3933_v40  ;;  %v975_v40 = vand.u32 65535, %v3969_v44  ;;  %v943_v44 = vand.u32 65535, %v4035_v17 }
 0x141   : > { %v1040_v18 = vshra.s32 %v4424_v51, 16 }
 0x142   : > { %v1009_v4 = vcvt.s32.f32 %v1007_v6  ;;  %v977_v6 = vcvt.s32.f32 %v975_v40 }
 0x143   : > { %1075 = vmin.xlane.f32.xlu1 %v4421_v25  ;;  %v4431_v53 = vcvt.s32.f32 %v1040_v18  ;;  %v991_v18 = vand.u32 65535, %v3935_v41  ;;  %v959_v41 = vand.u32 65535, %v4000_v30  ;;  %v927_v30 = vand.u32 65535, %v4063_v35 }
 0x145   : > { %6920 = vst [vmem:[#allocation19_spill] sm:$0xff] %v4431_v53  ;;  %v993_v26 = vcvt.s32.f32 %v991_v18  ;;  %v945_v18 = vcvt.s32.f32 %v943_v44  ;;  %v929_v40 = vcvt.s32.f32 %v927_v30 }
 0x147   : > { %1059 = vmin.xlane.f32.xlu1 %v4427_v5 }
 0x14b   : > { %1043 = vmin.xlane.f32.xlu1 %v4431_v53 }
 0x17b   : > { %v4435_v15 = vpop.xlane.xlu0 %1027 }
 0x17c   : > { %vm1029_vm15 = vcmp.eq.f32.partialorder %v3927_v21, %v4435_v15 }
 0x17d   : > { %v1030_v3 = vsel %vm1029_vm15, %v1025_v11, inf }
 0x17e   : > { %1031 = vmin.xlane.f32.xlu0 %v1030_v3 }
 0x17f   : > { %v4440_v19 = vpop.xlane.xlu0 %1011 }
 0x180   : > { %vm1013_vm1 = vcmp.eq.f32.partialorder %v3963_v12, %v4440_v19 }
 0x181   : > { %v1014_v53 = vsel %vm1013_vm1, %v1009_v4, inf }
 0x182   : > { %1015 = vmin.xlane.f32.xlu0 %v1014_v53  ;;  %v961_v53 = vcvt.s32.f32 %v959_v41  ;;  %v783_v41 = vand.u32 65535, %v4187_v49 }
 0x183   : > { %v4445_v29 = vpop.xlane.xlu0 %995 }
 0x184   : > { %vm997_vm2 = vcmp.eq.f32.partialorder %v3983_v42, %v4445_v29 }
 0x185   : > { %v998_v11 = vsel %vm997_vm2, %v993_v26, inf }
 0x186   : > { %999 = vmin.xlane.f32.xlu0 %v998_v11  ;;  %v6921_v11 = vld [vmem:[#allocation25_spill] sm:$0xff] }
 0x187   : > { %v4450_v21 = vpop.xlane.xlu0 %979  ;;  %v911_v17 = vand.u32 65535, %v6921_v11 }
 0x188   : > { %vm981_vm6 = vcmp.eq.f32.partialorder %v4017_v31, %v4450_v21 }
 0x189   : > { %v982_v4 = vsel %vm981_vm6, %v977_v6, inf }
 0x18a   : > { %983 = vmin.xlane.f32.xlu0 %v982_v4  ;;  %v913_v4 = vcvt.s32.f32 %v911_v17  ;;  %v863_v17 = vand.u32 65535, %v4125_v45 }
 0x18b   : > { %v4455_v12 = vpop.xlane.xlu0 %963 }
 0x18c   : > { %vm965_vm3 = vcmp.eq.f32.partialorder %v4052_v48, %v4455_v12 }
 0x18d   : > { %v966_v42 = vsel %vm965_vm3, %v961_v53, inf }
 0x18e   : > { %967 = vmin.xlane.f32.xlu0 %v966_v42  ;;  %v785_v42 = vcvt.s32.f32 %v783_v41 }
 0x18f   : > { %v4460_v3 = vpop.xlane.xlu0 %947 }
 0x190   : > { %vm949_vm7 = vcmp.eq.f32.partialorder %v4080_v34, %v4460_v3  ;;  %v895_v34 = vand.u32 65535, %v4084_v20 }
 0x191   : > { %v950_v31 = vsel %vm949_vm7, %v945_v18, inf }
 0x192   : > { %951 = vmin.xlane.f32.xlu0 %v950_v31  ;;  %v897_v30 = vcvt.s32.f32 %v895_v34  ;;  %v879_v31 = vand.u32 65535, %v4090_v59 }
 0x193   : > { %v4465_v26 = vpop.xlane.xlu0 %931  ;;  %v4470_v48 = vpop.xlane.xlu1 %819 }
 0x194   : > { %vm933_vm9 = vcmp.eq.f32.partialorder %v4119_v28, %v4465_v26  ;;  %v1263_v28 = vand.u32 65535, %v4208_v37  ;;  %v881_v11 = vcvt.s32.f32 %v879_v31 }
 0x195   : > { %v934_v6 = vsel %vm933_vm9, %v929_v40, inf }
 0x196   : > { %935 = vmin.xlane.f32.xlu0 %v934_v6  ;;  %v1265_v40 = vcvt.s32.f32 %v1263_v28  ;;  %v1231_v6 = vand.u32 65535, %v4235_v63  ;;  %v831_v28 = vand.u32 65535, %v4279_v7 }
 0x197   : > { %v4473_v35 = vpop.xlane.xlu0 %915  ;;  %v4478_v53 = vpop.xlane.xlu1 %787 }
 0x198   : > { %vm917_vm11 = vcmp.eq.f32.partialorder %v4134_v38, %v4473_v35  ;;  %vm789_vm10 = vcmp.eq.f32.partialorder %v4202_v1, %v4478_v53  ;;  %v833_v31 = vcvt.s32.f32 %v831_v28  ;;  %v6924_v28 = vld [vmem:[#allocation14_spill] sm:$0xff] }
 0x199   : > { %v918_v44 = vsel %vm917_vm11, %v913_v4, inf  ;;  %v790_v49 = vsel %vm789_vm10, %v785_v42, inf  ;;  %v865_v4 = vcvt.s32.f32 %v863_v17 }
 0x19a   : > { %919 = vmin.xlane.f32.xlu0 %v918_v44  ;;  %791 = vmin.xlane.f32.xlu1 %v790_v49  ;;  %v1233_v44 = vcvt.s32.f32 %v1231_v6  ;;  %v1199_v49 = vand.u32 65535, %v4300_v33 }
 0x19b   : > { %v4483_v18 = vpop.xlane.xlu0 %899 }
 0x19c   : > { %vm901_vm0 = vcmp.eq.f32.partialorder %v4158_v9, %v4483_v18  ;;  %v4488_v20 = vpop.xlane.xlu1 %1267 }
 0x19d   : > { %v902_v38 = vsel %vm901_vm0, %v897_v30, inf  ;;  %vm1269_vm12 = vcmp.eq.f32.partialorder %v4232_v50, %v4488_v20  ;;  %v847_v50 = vand.u32 65535, %v4252_v8 }
 0x19e   : > { %903 = vmin.xlane.f32.xlu0 %v902_v38  ;;  %v1270_v37 = vsel %vm1269_vm12, %v1265_v40, inf }
 0x19f   : > { %v4492_v1 = vpop.xlane.xlu0 %883  ;;  %1271 = vmin.xlane.f32.xlu1 %v1270_v37  ;;  %v849_v63 = vcvt.s32.f32 %v847_v50  ;;  %v1201_v37 = vcvt.s32.f32 %v1199_v49 }
 0x1a0   : > { %vm885_vm4 = vcmp.eq.f32.partialorder %v4174_v56, %v4492_v1  ;;  %v4497_v59 = vpop.xlane.xlu1 %1251 }
 0x1a1   : > { %v886_v9 = vsel %vm885_vm4, %v881_v11, inf }
 0x1a2   : > { %887 = vmin.xlane.f32.xlu0 %v886_v9  ;;  %v799_v9 = vand.u32 65535, %v4316_v60 }
 0x1a3   : > { %v4500_v41 = vpop.xlane.xlu0 %867 }
 0x1a4   : > { %vm869_vm13 = vcmp.eq.f32.partialorder %v4260_v58, %v4500_v41  ;;  %v4505_v34 = vpop.xlane.xlu1 %1235  ;;  %v801_v50 = vcvt.s32.f32 %v799_v9 }
 0x1a5   : > { %v870_v45 = vsel %vm869_vm13, %v865_v4, inf  ;;  %vm1237_vm14 = vcmp.eq.f32.partialorder %v4297_v54, %v4505_v34  ;;  %v6922_v54 = vld [vmem:[#allocation26_spill] sm:$0xff]  ;;  %v1167_v4 = vand.u32 65535, %v4338_v55 }
 0x1a6   : > { %871 = vmin.xlane.f32.xlu0 %v870_v45  ;;  %v1238_v56 = vsel %vm1237_vm14, %v1233_v44, inf  ;;  %v815_v38 = vand.u32 65535, %v6922_v54  ;;  %v1279_v45 = vand.u32 65535, %v4329_v22  ;;  %v1135_v22 = vand.u32 65535, %v4365_v61 }
 0x1a7   : > { %v4509_v42 = vpop.xlane.xlu0 %851  ;;  %1239 = vmin.xlane.f32.xlu1 %v1238_v56 }
 0x1a8   : > { %vm853_vm5 = vcmp.eq.f32.partialorder %v4307_v10, %v4509_v42  ;;  %v4514_v8 = vpop.xlane.xlu1 %1219  ;;  %v6923_v10 = vld [vmem:[#allocation27_spill] sm:$0xff]  ;;  %v817_v17 = vcvt.s32.f32 %v815_v38  ;;  %v1281_v55 = vcvt.s32.f32 %v1279_v45  ;;  %v6926_v38 = vld [vmem:[#allocation16_spill] sm:$0xff]  ;;  %v6928_v45 = vld [vmem:[#allocation18_spill] sm:$0xff] }
 0x1a9   : > { %v854_v58 = vsel %vm853_vm5, %v849_v63, inf  ;;  %vm821_vm1 = vcmp.eq.f32.partialorder %v6923_v10, %v4470_v48  ;;  %v1169_v63 = vcvt.s32.f32 %v1167_v4  ;;  %vm1221_vm11 = vcmp.eq.f32.partialorder %v4319_v43, %v4514_v8  ;;  %v6927_v4 = vld [vmem:[#allocation17_spill] sm:$0xff] }
 0x1aa   : > { %855 = vmin.xlane.f32.xlu0 %v854_v58 }
 0x1ab   : > { %v4517_v30 = vpop.xlane.xlu0 %835 }
 0x1ac   : > { %vm837_vm8 = vcmp.eq.f32.partialorder %v4326_v13, %v4517_v30  ;;  %v4522_v40 = vpop.xlane.xlu1 %1203  ;;  %v822_v13 = vsel %vm821_vm1, %v817_v17, inf }
 0x1ad   : > { %v838_v7 = vsel %vm837_vm8, %v833_v31, inf  ;;  %vm1205_vm15 = vcmp.eq.f32.partialorder %v4335_v47, %v4522_v40  ;;  %v6925_v31 = vld [vmem:[#allocation15_spill] sm:$0xff] }
 0x1ae   : > { %839 = vmin.xlane.f32.xlu0 %v838_v7  ;;  %v1206_v33 = vsel %vm1205_vm15, %v1201_v37, inf  ;;  %vm1253_vm7 = vcmp.eq.f32.partialorder %v6925_v31, %v4497_v59  ;;  %v1137_v37 = vcvt.s32.f32 %v1135_v22 }
 0x1af   : > { %v4528_v11 = vpop.xlane.xlu0 %803  ;;  %1207 = vmin.xlane.f32.xlu1 %v1206_v33  ;;  %v1183_v33 = vand.u32 65535, %v4322_v23 }
 0x1b0   : > { %v4531_v6 = vpop.xlane.xlu1 %1187  ;;  %vm805_vm2 = vcmp.eq.f32.partialorder %v4342_v14, %v4528_v11  ;;  %v1247_v14 = vand.u32 65535, %v6924_v28 }
 0x1b1   : > { %v806_v56 = vsel %vm805_vm2, %v801_v50, inf  ;;  %vm1189_vm10 = vcmp.eq.f32.partialorder %v6927_v4, %v4531_v6  ;;  %v1185_v50 = vcvt.s32.f32 %v1183_v33  ;;  %v986_v33 = vcvt.f32.s32 %v4450_v21 }
 0x1b2   : > { %823 = vmin.xlane.f32.xlu0 %v822_v13  ;;  %v1249_v54 = vcvt.s32.f32 %v1247_v14  ;;  %v1103_v13 = vand.u32 65535, %v4386_v2  ;;  %v1071_v14 = vand.u32 65535, %v4406_v62  ;;  %v906_v21 = vcvt.f32.s32 %v4483_v18 }
 0x1b3   : > { %v4536_v47 = vpop.xlane.xlu0 %1283  ;;  %v1190_v43 = vsel %vm1189_vm10, %v1185_v50, inf  ;;  %v938_v50 = vcvt.f32.s32 %v4465_v26  ;;  %v890_v26 = vcvt.f32.s32 %v4492_v1 }
 0x1b4   : > { %v4539_v44 = vpop.xlane.xlu1 %1171  ;;  %vm1285_vm3 = vcmp.eq.f32.partialorder %v4356_v46, %v4536_v47  ;;  %v1254_v46 = vsel %vm1253_vm7, %v1249_v54, inf  ;;  %v1073_v31 = vcvt.s32.f32 %v1071_v14  ;;  %v1055_v54 = vand.u32 65535, %v4416_v32 }
 0x1b5   : > { %vm1173_vm6 = vcmp.eq.f32.partialorder %v4362_v24, %v4539_v44  ;;  %v1286_v49 = vsel %vm1285_vm3, %v1281_v55, inf  ;;  %v1215_v24 = vand.u32 65535, %v6926_v38  ;;  %v4626_v14 = vshll.u32 %v906_v21, 16 }
 0x1b6   : > { %807 = vmin.xlane.f32.xlu0 %v806_v56  ;;  %v1174_v60 = vsel %vm1173_vm6, %v1169_v63, inf  ;;  %v1105_v63 = vcvt.s32.f32 %v1103_v13 }
 0x1b7   : > { %1175 = vmin.xlane.f32.xlu1 %v1174_v60  ;;  %v1217_v61 = vcvt.s32.f32 %v1215_v24  ;;  %v1119_v60 = vand.u32 65535, %v4376_v39  ;;  %v1057_v24 = vcvt.s32.f32 %v1055_v54 }
 0x1b8   : > { %v4546_v58 = vpop.xlane.xlu1 %1155 }
 0x1b9   : > { %v1222_v9 = vsel %vm1221_vm11, %v1217_v61, inf  ;;  %vm1157_vm12 = vcmp.eq.f32.partialorder %v4373_v27, %v4546_v58  ;;  %v1018_v61 = vcvt.f32.s32 %v4440_v19 }
 0x1ba   : > { %1287 = vmin.xlane.f32.xlu0 %v1286_v49  ;;  %v1121_v49 = vcvt.s32.f32 %v1119_v60 }
 0x1bb   : > { %v1019_v4 = vshll.u32 %v1018_v61, 16 }
 0x1bc   : > { %v4552_v7 = vpop.xlane.xlu1 %1139 }
 0x1bd   : > { %vm1141_vm9 = vcmp.eq.f32.partialorder %v4383_v52, %v4552_v7  ;;  %v1151_v52 = vand.u32 65535, %v6928_v45 }
 0x1be   : > { %1255 = vmin.xlane.f32.xlu0 %v1254_v46  ;;  %v1142_v10 = vsel %vm1141_vm9, %v1137_v37, inf }
 0x1bf   : > { %1143 = vmin.xlane.f32.xlu1 %v1142_v10  ;;  %v1153_v2 = vcvt.s32.f32 %v1151_v52  ;;  %v1034_v10 = vcvt.f32.s32 %v4435_v15  ;;  %v4601_v52 = vshll.u32 %v986_v33, 16  ;;  %v922_v15 = vcvt.f32.s32 %v4473_v35 }
 0x1c0   : > { %v4559_v17 = vpop.xlane.xlu1 %1123  ;;  %v874_v35 = vcvt.f32.s32 %v4500_v41 }
 0x1c1   : > { %v1158_v28 = vsel %vm1157_vm12, %v1153_v2, inf  ;;  %vm1125_vm4 = vcmp.eq.f32.partialorder %v4393_v57, %v4559_v17  ;;  %v1035_v13 = vshll.u32 %v1034_v10, 16  ;;  %v4613_v2 = vshll.u32 %v938_v50, 16 }
 0x1c2   : > { %1223 = vmin.xlane.f32.xlu0 %v1222_v9  ;;  %v1126_v27 = vsel %vm1125_vm4, %v1121_v49, inf  ;;  %v954_v9 = vcvt.f32.s32 %v4460_v3  ;;  %v858_v49 = vcvt.f32.s32 %v4509_v42  ;;  %v6603_v42 = vmov 0.0  }
 0x1c3   : > { %v842_v10 = vcvt.f32.s32 %v4517_v30 }
 0x1c4   : > { %v4565_v56 = vpop.xlane.xlu1 %1107 }
 0x1c5   : > { %vm1109_vm0 = vcmp.eq.f32.partialorder %v4403_v0, %v4565_v56  ;;  %v1087_v0 = vand.u32 65535, %v4396_v16  ;;  %v1039_v16 = vand.u32 65535, %v4424_v51  ;;  %v1002_v51 = vcvt.f32.s32 %v4445_v29 }
 0x1c6   : > { %1191 = vmin.xlane.f32.xlu0 %v1190_v43  ;;  %v1110_v23 = vsel %vm1109_vm0, %v1105_v63, inf  ;;  %v826_v43 = vcvt.f32.s32 %v4470_v48  ;;  %v794_v29 = vcvt.f32.s32 %v4478_v53  ;;  %v4610_v63 = vshll.u32 %v954_v9, 16 }
 0x1c7   : > { %1111 = vmin.xlane.f32.xlu1 %v1110_v23  ;;  %v1089_v62 = vcvt.s32.f32 %v1087_v0  ;;  %v1041_v37 = vcvt.s32.f32 %v1039_v16  ;;  %v1003_v45 = vshll.u32 %v1002_v51, 16  ;;  %v1258_v48 = vcvt.f32.s32 %v4497_v59  ;;  %v3278_v51 = vld [vmem:[%s3495_s26 + $0x8] sm:$0xff] }
 0x1c8   : > { %v4572_v55 = vpop.xlane.xlu1 %1091  ;;  %v4617_v60 = vshll.u32 %v826_v43, 16  ;;  %v1242_v53 = vcvt.f32.s32 %v4505_v34  ;;  %v4631_v59 = vshll.u32 %v890_v26, 16  ;;  %v4670_v33 = vand.u32 4294901760, %v3278_v51 }
 0x1c9   : > { %vm1093_vm14 = vcmp.eq.f32.partialorder %v4413_v36, %v4572_v55  ;;  %v6929_v36 = vld [vmem:[#allocation19_spill] sm:$0xff]  ;;  %v4637_v34 = vshll.u32 %v1258_v48, 16 }
 0x1ca   : > { %1159 = vmin.xlane.f32.xlu0 %v1158_v28  ;;  %v1094_v38 = vsel %vm1093_vm14, %v1089_v62, inf  ;;  %v4619_v28 = vshll.u32 %v922_v15, 16  ;;  %v6697_v62 = vmov 1.0   ;;  %v4653_v16 = vshll.u32 %v1242_v53, 16  ;;  %6932 = vst [vmem:[#allocation21_spill] sm:$0xff] %v4670_v33  ;;  %2015 = vmatprep.mubr.f32.mxu1 %v4670_v33 }
 0x1cc   : > { %v4578_v22 = vpop.xlane.xlu1 %1075 }
 0x1cd   : > { %vm1077_vm13 = vcmp.eq.f32.partialorder %v4421_v25, %v4578_v22 }
 0x1ce   : > { %1127 = vmin.xlane.f32.xlu0 %v1126_v27  ;;  %v1078_v39 = vsel %vm1077_vm13, %v1073_v31, inf  ;;  %v6930_v27 = vld [vmem:[#allocation24_spill] sm:$0xff]  ;;  %v6931_v31 = vld [vmem:[#allocation23_spill] sm:$0xff] }
 0x1cf   : > { %1079 = vmin.xlane.f32.xlu1 %v1078_v39  ;;  %v4639_v39 = vshll.u32 %v874_v35, 16 }
 0x1d0   : > { %v4585_v57 = vpop.xlane.xlu1 %1059 }
 0x1d1   : > { %vm1061_vm5 = vcmp.eq.f32.partialorder %v4427_v5, %v4585_v57  ;;  %v970_v5 = vcvt.f32.s32 %v4455_v12  ;;  %v1274_v12 = vcvt.f32.s32 %v4488_v20  ;;  %v4624_v20 = vshll.u32 %v794_v29, 16 }
 0x1d2   : > { %1095 = vmin.xlane.f32.xlu0 %v1094_v38  ;;  %v1062_v25 = vsel %vm1061_vm5, %v1057_v24, inf }
 0x1d3   : > { %v4605_v19 = vshll.u32 %v970_v5, 16  ;;  %v4628_v1 = vshll.u32 %v1274_v12, 16  ;;  %v1210_v12 = vcvt.f32.s32 %v4522_v40 }
 0x1d4   : > { %v4590_v46 = vpop.xlane.xlu1 %1043 }
 0x1d5   : > { %vm1045_vm8 = vcmp.eq.f32.partialorder %v6929_v36, %v4590_v46  ;;  %v4665_v36 = vshll.u32 %v858_v49, 16 }
 0x1d6   : > { %1063 = vmin.xlane.f32.xlu0 %v1062_v25  ;;  %v1046_v32 = vsel %vm1045_vm8, %v1041_v37, inf }
 0x1d7   : > { %1047 = vmin.xlane.f32.xlu1 %v1046_v32  ;;  %v1226_v32 = vcvt.f32.s32 %v4514_v8 }
 0x1d9   : > { %v4707_v21 = vshll.u32 %v1226_v32, 16  ;;  %v4743_v32 = vshll.u32 %v1210_v12, 16 }
 0x207   : > { %v1032_v3 = vpop.xlane.xlu0 %1031 }
 0x208   : > { %v1033_v23 = vcvt.f32.s32 %v1032_v3 }
 0x20a   : > { %v4622_v18 = vadd.s32 %v1035_v13, %v1033_v23 }
 0x20b   : > { %v1016_v0 = vpop.xlane.xlu0 %1015 }
 0x20c   : > { %v1017_v41 = vcvt.f32.s32 %v1016_v0  ;;  %vm1324_vm15 = vcmp.eq.s32.totalorder %v6930_v27, %v4622_v18  ;;  %vm1323_vm1 = vcmp.eq.s32.totalorder %v6931_v31, %v4622_v18  ;;  %v4731_v0 = vshll.u32 %v842_v10, 16 }
 0x20d   : > { %3015 = vmatprep.subr.msk.mxu0 %vm1324_vm15, %v6697_v62  ;;  %v2982_v54 = vsel %vm1324_vm15, 1.0, %v6603_v42  ;;  %v2981_v38 = vsel %vm1323_vm1, 1.0, %v6603_v42 }
 0x20e   : > { %v4655_v24 = vadd.s32 %v1019_v4, %v1017_v41  ;;  %3016 = vmatpush1.xpose.msk.msra.mxu0 %vm1323_vm1, %v6697_v62  ;;  %v4661_v25 = vsub.f32 %v2982_v54, %v2982_v54  ;;  %v4663_v37 = vsub.f32 %v2981_v38, %v2981_v38  ;;  %v4691_v4 = vsub.f32 %v3278_v51, %v4670_v33 }
 0x20f   : > { %v1000_v61 = vpop.xlane.xlu0 %999 }
 0x210   : > { %v1001_v5 = vcvt.f32.s32 %v1000_v61  ;;  %vm1322_vm2 = vcmp.eq.s32.totalorder %v6930_v27, %v4655_v24  ;;  %vm1321_vm6 = vcmp.eq.s32.totalorder %v6931_v31, %v4655_v24  ;;  %v6598_v9 = vand.u32 4294901760, %v4661_v25 }
 0x211   : > { %v2980_v8 = vsel %vm1322_vm2, 1.0, %v6603_v42  ;;  %3017 = vmatprep.subr.msk.mxu0 %vm1322_vm2, %v6697_v62  ;;  %v2979_v30 = vsel %vm1321_vm6, 1.0, %v6603_v42  ;;  %v6595_v13 = vand.u32 4294901760, %v4663_v37  ;;  %v6599_v26 = vand.u32 4294901760, %v4691_v4 }
 0x212   : > { %v4694_v50 = vadd.s32 %v1003_v45, %v1001_v5  ;;  %v4696_v43 = vsub.f32 %v2980_v8, %v2980_v8  ;;  %3018 = vmatpush1.xpose.msk.msra.mxu0 %vm1321_vm6, %v6697_v62  ;;  %v4702_v15 = vsub.f32 %v2979_v30, %v2979_v30  ;;  %v1633_v29 = vsub.f32 %v4661_v25, %v6598_v9 }
 0x213   : > { %v984_v3 = vpop.xlane.xlu0 %983  ;;  %v1639_v45 = vsub.f32 %v4663_v37, %v6595_v13  ;;  %v1616_v51 = vsub.f32 %v4691_v4, %v6599_v26 }
 0x214   : > { %v985_v23 = vcvt.f32.s32 %v984_v3  ;;  %vm1320_vm3 = vcmp.eq.s32.totalorder %v6930_v27, %v4694_v50  ;;  %vm1319_vm7 = vcmp.eq.s32.totalorder %v6931_v31, %v4694_v50  ;;  %v1634_v48 = vand.u32 4294901760, %v1633_v29 }
 0x215   : > { %v2978_v40 = vsel %vm1320_vm3, 1.0, %v6603_v42  ;;  %3019 = vmatprep.subr.msk.mxu0 %vm1320_vm3, %v6697_v62  ;;  %v2977_v35 = vsel %vm1319_vm7, 1.0, %v6603_v42  ;;  %v1640_v53 = vand.u32 4294901760, %v1639_v45  ;;  %v6594_v49 = vand.u32 4294901760, %v4696_v43 }
 0x216   : > { %v4734_v41 = vadd.s32 %v4601_v52, %v985_v23  ;;  %v4736_v54 = vsub.f32 %v2978_v40, %v2978_v40  ;;  %3020 = vmatpush1.xpose.msk.msra.mxu0 %vm1319_vm7, %v6697_v62  ;;  %1635 = vmatprep.subr.mxu1 %v1634_v48  ;;  %v6592_v38 = vand.u32 4294901760, %v4702_v15  ;;  %v4745_v61 = vsub.f32 %v2977_v35, %v2977_v35 }
 0x217   : > { %1641 = vmatpush1.xpose.msra.mxu1 %v1640_v53  ;;  %v968_v10 = vpop.xlane.xlu0 %967  ;;  %v1645_v52 = vsub.f32 %v4696_v43, %v6594_v49  ;;  %v810_v45 = vcvt.f32.s32 %v4528_v11 }
 0x218   : > { %v969_v5 = vcvt.f32.s32 %v968_v10  ;;  %vm1318_vm9 = vcmp.eq.s32.totalorder %v6930_v27, %v4734_v41  ;;  %vm6795_vm11 = vcmp.eq.s32.totalorder %v6931_v31, %v4734_v41  ;;  %v1651_v8 = vsub.f32 %v4702_v15, %v6592_v38 }
 0x219   : > { %v2976_v30 = vsel %vm1318_vm9, 1.0, %v6603_v42  ;;  %3021 = vmatprep.subr.msk.mxu0 %vm1318_vm9, %v6697_v62  ;;  %v2975_v29 = vsel %vm6795_vm11, 1.0, %v6603_v42  ;;  %v1646_v12 = vand.u32 4294901760, %v1645_v52  ;;  %v6589_v3 = vand.u32 4294901760, %v4736_v54 }
 0x21a   : > { %v4775_v23 = vadd.s32 %v4605_v19, %v969_v5  ;;  %v4777_v48 = vsub.f32 %v2976_v30, %v2976_v30  ;;  %3022 = vmatpush1.xpose.msk.msra.mxu0 %vm6795_vm11, %v6697_v62  ;;  %v1652_v40 = vand.u32 4294901760, %v1651_v8  ;;  %v4783_v35 = vsub.f32 %v2975_v29, %v2975_v29 }
 0x21b   : > { %1647 = vmatprep.subr.mxu1 %v1646_v12  ;;  %v952_v53 = vpop.xlane.xlu0 %951  ;;  %v1657_v10 = vsub.f32 %v4736_v54, %v6589_v3  ;;  %v6590_v11 = vand.u32 4294901760, %v4745_v61  ;;  %v1617_v19 = vand.u32 4294901760, %v1616_v51  ;;  %v4823_v3 = vshll.u32 %v810_v45, 16 }
 0x21c   : > { %1653 = vmatpush1.xpose.msra.mxu1 %v1652_v40  ;;  %v953_v52 = vcvt.f32.s32 %v952_v53  ;;  %vm6796_vm10 = vcmp.eq.s32.totalorder %v6930_v27, %v4775_v23  ;;  %vm6797_vm0 = vcmp.eq.s32.totalorder %v6931_v31, %v4775_v23  ;;  %v6591_v5 = vand.u32 4294901760, %v4777_v48 }
 0x21d   : > { %v2974_v8 = vsel %vm6796_vm10, 1.0, %v6603_v42  ;;  %3023 = vmatprep.subr.msk.mxu0 %vm6796_vm10, %v6697_v62  ;;  %v2973_v51 = vsel %vm6797_vm0, 1.0, %v6603_v42  ;;  %v1658_v30 = vand.u32 4294901760, %v1657_v10  ;;  %v1663_v29 = vsub.f32 %v4745_v61, %v6590_v11  ;;  %1618 = vmatprep.mubr.f32.mxu0 %v1617_v19 }
 0x21e   : > { %v4810_v12 = vadd.s32 %v4610_v63, %v953_v52  ;;  %v4812_v40 = vsub.f32 %v2974_v8, %v2974_v8  ;;  %3024 = vmatpush1.xpose.msk.msra.mxu0 %vm6797_vm0, %v6697_v62  ;;  %v4818_v53 = vsub.f32 %v2973_v51, %v2973_v51  ;;  %v1669_v10 = vsub.f32 %v4777_v48, %v6591_v5 }
 0x21f   : > { %v1194_v19 = vcvt.f32.s32 %v4531_v6  ;;  %1659 = vmatprep.subr.mxu1 %v1658_v30  ;;  %v1664_v63 = vand.u32 4294901760, %v1663_v29  ;;  %v936_v52 = vpop.xlane.xlu0 %935  ;;  %v6593_v8 = vand.u32 4294901760, %v4783_v35  ;;  %v1178_v38 = vcvt.f32.s32 %v4539_v44 }
 0x220   : > { %6933 = vst [vmem:[#allocation22_spill] sm:$0xff] %v4810_v12  ;;  %v937_v11 = vcvt.f32.s32 %v936_v52  ;;  %vm6738_vm12 = vcmp.eq.s32.totalorder %v6930_v27, %v4810_v12  ;;  %vm6664_vm4 = vcmp.eq.s32.totalorder %v6931_v31, %v4810_v12  ;;  %v1670_v51 = vand.u32 4294901760, %v1669_v10 }
 0x221   : > { %1665 = vmatpush1.xpose.msra.mxu1 %v1664_v63  ;;  %v2972_v45 = vsel %vm6738_vm12, 1.0, %v6603_v42  ;;  %3025 = vmatprep.subr.msk.mxu0 %vm6738_vm12, %v6697_v62  ;;  %v2971_v6 = vsel %vm6664_vm4, 1.0, %v6603_v42  ;;  %v1675_v30 = vsub.f32 %v4783_v35, %v6593_v8  ;;  %v6597_v29 = vand.u32 4294901760, %v4812_v40 }
 0x222   : > { %v1290_v10 = vcvt.f32.s32 %v4536_v47  ;;  %v4849_v63 = vadd.s32 %v4613_v2, %v937_v11  ;;  %v4851_v52 = vsub.f32 %v2972_v45, %v2972_v45  ;;  %3026 = vmatpush1.xpose.msk.msra.mxu0 %vm6664_vm4, %v6697_v62  ;;  %1671 = vmatprep.subr.mxu1 %v1670_v51  ;;  %v6596_v5 = vand.u32 4294901760, %v4818_v53 }
 0x223   : > { %v4859_v8 = vsub.f32 %v2971_v6, %v2971_v6  ;;  %v1676_v49 = vand.u32 4294901760, %v1675_v30  ;;  %v920_v13 = vpop.xlane.xlu0 %919  ;;  %v1681_v47 = vsub.f32 %v4812_v40, %v6597_v29  ;;  %v4884_v6 = vshll.u32 %v1194_v19, 16  ;;  %v792_v29 = vpop.xlane.xlu1 %791 }
 0x224   : > { %6934 = vst [vmem:[#allocation20_spill] sm:$0xff] %v4849_v63  ;;  %v921_v2 = vcvt.f32.s32 %v920_v13  ;;  %vm6635_vm13 = vcmp.eq.s32.totalorder %v6930_v27, %v4849_v63  ;;  %vm6607_vm14 = vcmp.eq.s32.totalorder %v6931_v31, %v4849_v63  ;;  %v1687_v11 = vsub.f32 %v4818_v53, %v6596_v5 }
 0x225   : > { %1677 = vmatpush1.xpose.msra.mxu1 %v1676_v49  ;;  %v2970_v44 = vsel %vm6635_vm13, 1.0, %v6603_v42  ;;  %3027 = vmatprep.subr.msk.mxu0 %vm6635_vm13, %v6697_v62  ;;  %v2969_v13 = vsel %vm6607_vm14, 1.0, %v6603_v42  ;;  %v1682_v51 = vand.u32 4294901760, %v1681_v47  ;;  %v6600_v45 = vand.u32 4294901760, %v4851_v52 }
 0x226   : > { %v4886_v49 = vshll.u32 %v1290_v10, 16  ;;  %v4889_v30 = vadd.s32 %v4619_v28, %v921_v2  ;;  %v4891_v5 = vsub.f32 %v2970_v44, %v2970_v44  ;;  %3028 = vmatpush1.xpose.msk.msra.mxu0 %vm6607_vm14, %v6697_v62  ;;  %v4897_v9 = vsub.f32 %v2969_v13, %v2969_v13 }
 0x227   : > { %1683 = vmatprep.subr.mxu1 %v1682_v51  ;;  %v1688_v47 = vand.u32 4294901760, %v1687_v11  ;;  %v904_v26 = vpop.xlane.xlu0 %903  ;;  %v1693_v19 = vsub.f32 %v4851_v52, %v6600_v45  ;;  %v6605_v28 = vand.u32 4294901760, %v4859_v8  ;;  %v4903_v10 = vshll.u32 %v1178_v38, 16 }
 0x228   : > { %6935 = vst [vmem:[#allocation25_spill] sm:$0xff] %v4889_v30  ;;  %v905_v2 = vcvt.f32.s32 %v904_v26  ;;  %vm6606_vm5 = vcmp.eq.s32.totalorder %v6930_v27, %v4889_v30  ;;  %vm6617_vm8 = vcmp.eq.s32.totalorder %v6931_v31, %v4889_v30  ;;  %v1162_v13 = vcvt.f32.s32 %v4546_v58 }
 0x229   : > { %1689 = vmatpush1.xpose.msra.mxu1 %v1688_v47  ;;  %v2968_v11 = vsel %vm6606_vm5, 1.0, %v6603_v42  ;;  %3029 = vmatprep.subr.msk.mxu0 %vm6606_vm5, %v6697_v62  ;;  %v2967_v26 = vsel %vm6617_vm8, 1.0, %v6603_v42  ;;  %v1694_v38 = vand.u32 4294901760, %v1693_v19  ;;  %v1699_v44 = vsub.f32 %v4859_v8, %v6605_v28 }
 0x22a   : > { %v793_v51 = vcvt.f32.s32 %v792_v29  ;;  %v4926_v47 = vadd.s32 %v4626_v14, %v905_v2  ;;  %v4928_v45 = vsub.f32 %v2968_v11, %v2968_v11  ;;  %3030 = vmatpush1.xpose.msk.msra.mxu0 %vm6617_vm8, %v6697_v62  ;;  %v4934_v33 = vsub.f32 %v2967_v26, %v2967_v26 }
 0x22b   : > { %1695 = vmatprep.subr.mxu1 %v1694_v38  ;;  %v1700_v19 = vand.u32 4294901760, %v1699_v44  ;;  %v888_v42 = vpop.xlane.xlu0 %887  ;;  %v6610_v28 = vand.u32 4294901760, %v4891_v5  ;;  %v6615_v58 = vand.u32 4294901760, %v4897_v9  ;;  %v1146_v29 = vcvt.f32.s32 %v4552_v7 }
 0x22c   : > { %6936 = vst [vmem:[#allocation26_spill] sm:$0xff] %v4926_v47  ;;  %6937 = vst [vmem:[#allocation27_spill] sm:$0xff] %v4928_v45  ;;  %v889_v14 = vcvt.f32.s32 %v888_v42  ;;  %vm6616_vm5 = vcmp.eq.s32.totalorder %v6930_v27, %v4926_v47  ;;  %vm6634_vm14 = vcmp.eq.s32.totalorder %v6931_v31, %v4926_v47  ;;  %v6939_v2 = vmov 0.0   ;;  %v1272_v47 = vpop.xlane.xlu1 %1271 }
 0x22d   : > { %6938 = vst [vmem:[#allocation14_spill] sm:$0xff] %v4934_v33  ;;  %1701 = vmatpush1.xpose.msra.mxu1 %v1700_v19  ;;  %v2966_v11 = vsel %vm6616_vm5, 1.0, %v6939_v2  ;;  %3031 = vmatprep.subr.msk.mxu0 %vm6616_vm5, %v6697_v62  ;;  %v2965_v7 = vsel %vm6634_vm14, 1.0, %v6939_v2  ;;  %v1705_v42 = vsub.f32 %v4891_v5, %v6610_v28  ;;  %v1711_v26 = vsub.f32 %v4897_v9, %v6615_v58 }
 0x22e   : > { %v4962_v38 = vadd.s32 %v4624_v20, %v793_v51  ;;  %v4965_v44 = vadd.s32 %v4631_v59, %v889_v14  ;;  %v4967_v19 = vsub.f32 %v2966_v11, %v2966_v11  ;;  %3032 = vmatpush1.xpose.msk.msra.mxu0 %vm6634_vm14, %v6697_v62  ;;  %v6618_v30 = vand.u32 4294901760, %v4928_v45 }
 0x22f   : > { %v4974_v28 = vsub.f32 %v2965_v7, %v2965_v7  ;;  %v1706_v63 = vand.u32 4294901760, %v1705_v42  ;;  %v1712_v12 = vand.u32 4294901760, %v1711_v26  ;;  %v872_v58 = vpop.xlane.xlu0 %871  ;;  %v6623_v20 = vand.u32 4294901760, %v4934_v33 }
 0x230   : > { %6940 = vst [vmem:[#allocation15_spill] sm:$0xff] %v4962_v38  ;;  %6941 = vst [vmem:[#allocation16_spill] sm:$0xff] %v4965_v44  ;;  %v873_v51 = vcvt.f32.s32 %v872_v58  ;;  %vm6626_vm5 = vcmp.eq.s32.totalorder %v6930_v27, %v4965_v44  ;;  %vm6627_vm8 = vcmp.eq.s32.totalorder %v6931_v31, %v4965_v44  ;;  %v1717_v59 = vsub.f32 %v4928_v45, %v6618_v30 }
 0x231   : > { %6942 = vst [vmem:[#allocation17_spill] sm:$0xff] %v4967_v19  ;;  %1707 = vmatprep.subr.mxu1 %v1706_v63  ;;  %v2964_v14 = vsel %vm6626_vm5, 1.0, %v6939_v2  ;;  %3033 = vmatprep.subr.msk.mxu0 %vm6626_vm5, %v6697_v62  ;;  %v2963_v58 = vsel %vm6627_vm8, 1.0, %v6939_v2  ;;  %v1723_v11 = vsub.f32 %v4934_v33, %v6623_v20  ;;  %v6628_v63 = vand.u32 4294901760, %v4967_v19 }
 0x232   : > { %v5000_v7 = vshll.u32 %v1162_v13, 16  ;;  %1713 = vmatpush1.xpose.msra.mxu1 %v1712_v12  ;;  %v5003_v42 = vadd.s32 %v4639_v39, %v873_v51  ;;  %v5005_v26 = vsub.f32 %v2964_v14, %v2964_v14  ;;  %3034 = vmatpush1.xpose.msk.msra.mxu0 %vm6627_vm8, %v6697_v62  ;;  %v5011_v30 = vsub.f32 %v2963_v58, %v2963_v58 }
 0x233   : > { %v1718_v45 = vand.u32 4294901760, %v1717_v59  ;;  %v1724_v20 = vand.u32 4294901760, %v1723_v11  ;;  %v856_v33 = vpop.xlane.xlu0 %855  ;;  %v1729_v12 = vsub.f32 %v4967_v19, %v6628_v63  ;;  %v6637_v39 = vand.u32 4294901760, %v4974_v28 }
 0x234   : > { %6943 = vst [vmem:[#allocation18_spill] sm:$0xff] %v5003_v42  ;;  %6944 = vst [vmem:[#allocation19_spill] sm:$0xff] %v5005_v26  ;;  %v5017_v13 = vshll.u32 %v1146_v29, 16  ;;  %v857_v51 = vcvt.f32.s32 %v856_v33  ;;  %vm6633_vm5 = vcmp.eq.s32.totalorder %v6930_v27, %v5003_v42  ;;  %vm6648_vm8 = vcmp.eq.s32.totalorder %v6931_v31, %v5003_v42 }
 0x235   : > { %6945 = vst [vmem:[#allocation24_spill] sm:$0xff] %v5011_v30  ;;  %1719 = vmatprep.subr.mxu1 %v1718_v45  ;;  %v2962_v59 = vsel %vm6633_vm5, 1.0, %v6939_v2  ;;  %3035 = vmatprep.subr.msk.mxu0 %vm6633_vm5, %v6697_v62  ;;  %v2961_v33 = vsel %vm6648_vm8, 1.0, %v6939_v2  ;;  %v1730_v29 = vand.u32 4294901760, %v1729_v12  ;;  %v1735_v45 = vsub.f32 %v4974_v28, %v6637_v39 }
 0x236   : > { %v1273_v14 = vcvt.f32.s32 %v1272_v47  ;;  %1725 = vmatpush1.xpose.msra.mxu1 %v1724_v20  ;;  %v5039_v58 = vadd.s32 %v4665_v36, %v857_v51  ;;  %v5041_v11 = vsub.f32 %v2962_v59, %v2962_v59  ;;  %3036 = vmatpush1.xpose.msk.msra.mxu0 %vm6648_vm8, %v6697_v62  ;;  %v6636_v63 = vand.u32 4294901760, %v5005_v26 }
 0x237   : > { %v5048_v44 = vsub.f32 %v2961_v33, %v2961_v33  ;;  %1731 = vmatprep.subr.mxu1 %v1730_v29  ;;  %v1736_v12 = vand.u32 4294901760, %v1735_v45  ;;  %v840_v19 = vpop.xlane.xlu0 %839  ;;  %v6642_v47 = vand.u32 4294901760, %v5011_v30  ;;  %vm6721_vm5 = vcmp.eq.s32.totalorder %v6930_v27, %v4962_v38 }
 0x238   : > { %6946 = vst [vmem:[#allocation23_spill] sm:$0xff] %v5039_v58  ;;  %6947 = vst [vmem:[#allocation28_spill] sm:$0xff] %v5041_v11  ;;  %v841_v36 = vcvt.f32.s32 %v840_v19  ;;  %vm6643_vm14 = vcmp.eq.s32.totalorder %v6930_v27, %v5039_v58  ;;  %vm6644_vm13 = vcmp.eq.s32.totalorder %v6931_v31, %v5039_v58  ;;  %v1741_v20 = vsub.f32 %v5005_v26, %v6636_v63 }
 0x239   : > { %6948 = vst [vmem:[#allocation29_spill] sm:$0xff] %v5048_v44  ;;  %v2960_v51 = vsel %vm6643_vm14, 1.0, %v6939_v2  ;;  %3037 = vmatprep.subr.msk.mxu0 %vm6643_vm14, %v6697_v62  ;;  %v2959_v19 = vsel %vm6644_vm13, 1.0, %v6939_v2  ;;  %v1747_v59 = vsub.f32 %v5011_v30, %v6642_v47  ;;  %v6650_v33 = vand.u32 4294901760, %v5041_v11 }
 0x23a   : > { %1737 = vmatpush1.xpose.msra.mxu1 %v1736_v12  ;;  %v5078_v45 = vadd.s32 %v4731_v0, %v841_v36  ;;  %v5080_v63 = vsub.f32 %v2960_v51, %v2960_v51  ;;  %3038 = vmatpush1.xpose.msk.msra.mxu0 %vm6644_vm13, %v6697_v62  ;;  %v5086_v39 = vsub.f32 %v2959_v19, %v2959_v19  ;;  %v1742_v42 = vand.u32 4294901760, %v1741_v20 }
 0x23b   : > { %v1748_v26 = vand.u32 4294901760, %v1747_v59  ;;  %v824_v47 = vpop.xlane.xlu0 %823  ;;  %v1753_v29 = vsub.f32 %v5041_v11, %v6650_v33  ;;  %v6645_v12 = vand.u32 4294901760, %v5048_v44  ;;  %v5093_v0 = vadd.s32 %v4628_v1, %v1273_v14 }
 0x23c   : > { %6949 = vst [vmem:[#allocation30_spill] sm:$0xff] %v5078_v45  ;;  %6950 = vst [vmem:[#allocation31_spill] sm:$0xff] %v5080_v63  ;;  %v825_v36 = vcvt.f32.s32 %v824_v47  ;;  %vm6646_vm14 = vcmp.eq.s32.totalorder %v6930_v27, %v5078_v45  ;;  %vm6647_vm13 = vcmp.eq.s32.totalorder %v6931_v31, %v5078_v45  ;;  %1743 = vmatprep.subr.mxu1 %v1742_v42  ;;  %v6649_v19 = vand.u32 4294901760, %v5080_v63 }
 0x23d   : > { %6951 = vst [vmem:[#allocation32_spill] sm:$0xff] %v5093_v0  ;;  %v2958_v20 = vsel %vm6646_vm14, 1.0, %v6939_v2  ;;  %3039 = vmatprep.subr.msk.mxu0 %vm6646_vm14, %v6697_v62  ;;  %v2957_v1 = vsel %vm6647_vm13, 1.0, %v6939_v2  ;;  %v1754_v14 = vand.u32 4294901760, %v1753_v29  ;;  %v1759_v42 = vsub.f32 %v5048_v44, %v6645_v12  ;;  %v1240_v29 = vpop.xlane.xlu1 %1239 }
 0x23e   : > { %1749 = vmatpush1.xpose.msra.mxu1 %v1748_v26  ;;  %v5115_v47 = vadd.s32 %v4617_v60, %v825_v36  ;;  %v5117_v51 = vsub.f32 %v2958_v20, %v2958_v20  ;;  %3040 = vmatpush1.xpose.msk.msra.mxu0 %vm6647_vm13, %v6697_v62  ;;  %v2952_v59 = vsel %vm6721_vm5, 1.0, %v6939_v2  ;;  %v5128_v12 = vsub.f32 %v2957_v1, %v2957_v1 }
 0x23f   : > { %1755 = vmatprep.subr.mxu1 %v1754_v14  ;;  %v1760_v60 = vand.u32 4294901760, %v1759_v42  ;;  %v808_v26 = vpop.xlane.xlu0 %807  ;;  %v6671_v36 = vand.u32 4294901760, %v5086_v39  ;;  %vm6683_vm14 = vcmp.eq.s32.totalorder %v6931_v31, %v4962_v38  ;;  %v1765_v1 = vsub.f32 %v5080_v63, %v6649_v19 }
 0x240   : > { %6952 = vst [vmem:[#allocation33_spill] sm:$0xff] %v5115_v47  ;;  %6953 = vst [vmem:[#allocation34_spill] sm:$0xff] %v5117_v51  ;;  %v809_v20 = vcvt.f32.s32 %v808_v26  ;;  %vm6663_vm13 = vcmp.eq.s32.totalorder %v6930_v27, %v5115_v47  ;;  %vm6669_vm8 = vcmp.eq.s32.totalorder %v6931_v31, %v5115_v47  ;;  %v6665_v19 = vand.u32 4294901760, %v5117_v51 }
 0x241   : > { %v2956_v14 = vsel %vm6663_vm13, 1.0, %v6939_v2  ;;  %3041 = vmatprep.subr.msk.mxu0 %vm6663_vm13, %v6697_v62  ;;  %v2955_v42 = vsel %vm6669_vm8, 1.0, %v6939_v2  ;;  %v1771_v26 = vsub.f32 %v5086_v39, %v6671_v36  ;;  %v1241_v33 = vcvt.f32.s32 %v1240_v29  ;;  %v1208_v47 = vpop.xlane.xlu1 %1207 }
 0x242   : > { %1761 = vmatpush1.xpose.msra.mxu1 %v1760_v60  ;;  %v5157_v45 = vadd.s32 %v4823_v3, %v809_v20  ;;  %v5159_v58 = vsub.f32 %v2956_v14, %v2956_v14  ;;  %3042 = vmatpush1.xpose.msk.msra.mxu0 %vm6669_vm8, %v6697_v62  ;;  %v5165_v63 = vsub.f32 %v2955_v42, %v2955_v42  ;;  %v1766_v44 = vand.u32 4294901760, %v1765_v1 }
 0x243   : > { %v1772_v11 = vand.u32 4294901760, %v1771_v26  ;;  %v1288_v30 = vpop.xlane.xlu0 %1287  ;;  %v1777_v29 = vsub.f32 %v5117_v51, %v6665_v19  ;;  %v6667_v60 = vand.u32 4294901760, %v5128_v12  ;;  %v5175_v20 = vsub.f32 %v2952_v59, %v2952_v59 }
 0x244   : > { %6954 = vst [vmem:[#allocation35_spill] sm:$0xff] %v5157_v45  ;;  %6955 = vst [vmem:[#allocation36_spill] sm:$0xff] %v5159_v58  ;;  %v1289_v3 = vcvt.f32.s32 %v1288_v30  ;;  %vm6668_vm13 = vcmp.eq.s32.totalorder %v6930_v27, %v5157_v45  ;;  %vm6666_vm4 = vcmp.eq.s32.totalorder %v6931_v31, %v5157_v45  ;;  %1767 = vmatprep.subr.mxu1 %v1766_v44  ;;  %v2951_v26 = vsel %vm6683_vm14, 1.0, %v6939_v2 }
 0x245   : > { %6956 = vst [vmem:[#allocation37_spill] sm:$0xff] %v5165_v63  ;;  %6957 = vst [vmem:[#allocation38_spill] sm:$0xff] %v5175_v20  ;;  %v2954_v1 = vsel %vm6668_vm13, 1.0, %v6939_v2  ;;  %3043 = vmatprep.subr.msk.mxu0 %vm6668_vm13, %v6697_v62  ;;  %v2953_v30 = vsel %vm6666_vm4, 1.0, %v6939_v2  ;;  %v1778_v14 = vand.u32 4294901760, %v1777_v29  ;;  %v1783_v44 = vsub.f32 %v5128_v12, %v6667_v60 }
 0x246   : > { %1773 = vmatpush1.xpose.msra.mxu1 %v1772_v11  ;;  %v5193_v59 = vadd.s32 %v4886_v49, %v1289_v3  ;;  %v5195_v42 = vsub.f32 %v2954_v1, %v2954_v1  ;;  %3044 = vmatpush1.xpose.msk.msra.mxu0 %vm6666_vm4, %v6697_v62  ;;  %v6670_v29 = vand.u32 4294901760, %v5159_v58  ;;  %v5206_v19 = vsub.f32 %v2953_v30, %v2953_v30 }
 0x247   : > { %1779 = vmatprep.subr.mxu1 %v1778_v14  ;;  %v1784_v11 = vand.u32 4294901760, %v1783_v44  ;;  %v1256_v49 = vpop.xlane.xlu0 %1255  ;;  %3045 = vmatprep.subr.msk.mxu0 %vm6721_vm5, %v6697_v62  ;;  %v6672_v3 = vand.u32 4294901760, %v5165_v63  ;;  %vm6686_vm4 = vcmp.eq.s32.totalorder %v6930_v27, %v5093_v0  ;;  %v7128_v18 = vand.u32 4294901760, %v4818_v53 }
 0x248   : > { %6958 = vst [vmem:[#allocation39_spill] sm:$0xff] %v5193_v59  ;;  %6959 = vst [vmem:[#allocation40_spill] sm:$0xff] %v5195_v42  ;;  %v1257_v1 = vcvt.f32.s32 %v1256_v49  ;;  %v1789_v60 = vsub.f32 %v5159_v58, %v6670_v29  ;;  %vm6682_vm13 = vcmp.eq.s32.totalorder %v6930_v27, %v5193_v59  ;;  %vm6685_vm8 = vcmp.eq.s32.totalorder %v6931_v31, %v5193_v59 }
 0x249   : > { %v1795_v30 = vsub.f32 %v5165_v63, %v6672_v3  ;;  %v3014_v14 = vsel %vm6682_vm13, 1.0, %v6939_v2  ;;  %v3013_v44 = vsel %vm6685_vm8, 1.0, %v6939_v2  ;;  %v6681_v49 = vand.u32 4294901760, %v5195_v42 }
 0x24a   : > { %v5235_v29 = vadd.s32 %v4653_v16, %v1241_v33  ;;  %1785 = vmatpush1.xpose.msra.mxu1 %v1784_v11  ;;  %v5238_v36 = vadd.s32 %v4637_v34, %v1257_v1  ;;  %3046 = vmatpush1.xpose.msk.msra.mxu0 %vm6683_vm14, %v6697_v62  ;;  %v5244_v3 = vsub.f32 %v2951_v26, %v2951_v26  ;;  %v1790_v45 = vand.u32 4294901760, %v1789_v60 }
 0x24b   : > { %v1796_v63 = vand.u32 4294901760, %v1795_v30  ;;  %v1224_v58 = vpop.xlane.xlu0 %1223  ;;  %3047 = vmatprep.subr.msk.mxu0 %vm6682_vm13, %v6697_v62  ;;  %v1801_v34 = vsub.f32 %v5195_v42, %v6681_v49  ;;  %v6684_v16 = vand.u32 4294901760, %v5206_v19  ;;  %v3012_v33 = vsel %vm6686_vm4, 1.0, %v6939_v2 }
 0x24c   : > { %6960 = vst [vmem:[#allocation41_spill] sm:$0xff] %v5235_v29  ;;  %6961 = vst [vmem:[#allocation42_spill] sm:$0xff] %v5238_v36  ;;  %1791 = vmatprep.subr.mxu1 %v1790_v45  ;;  %v1225_v60 = vcvt.f32.s32 %v1224_v58  ;;  %v5258_v26 = vsub.f32 %v3014_v14, %v3014_v14  ;;  %v5260_v11 = vsub.f32 %v3013_v44, %v3013_v44  ;;  %v6687_v1 = vand.u32 4294901760, %v5175_v20 }
 0x24d   : > { %6962 = vst [vmem:[#allocation43_spill] sm:$0xff] %v5244_v3  ;;  %v1802_v30 = vand.u32 4294901760, %v1801_v34  ;;  %v1807_v49 = vsub.f32 %v5206_v19, %v6684_v16  ;;  %vm6702_vm13 = vcmp.eq.s32.totalorder %v6931_v31, %v5093_v0  ;;  %vm6701_vm14 = vcmp.eq.s32.totalorder %v6930_v27, %v5238_v36 }
 0x24e   : > { %6963 = vst [vmem:[#allocation44_spill] sm:$0xff] %v5258_v26  ;;  %6964 = vst [vmem:[#allocation45_spill] sm:$0xff] %v5260_v11  ;;  %v6965_v45 = vcvt.f32.s32 %v4559_v17  ;;  %v1209_v14 = vcvt.f32.s32 %v1208_v47  ;;  %1797 = vmatpush1.xpose.msra.mxu1 %v1796_v63  ;;  %3048 = vmatpush2.xpose.msk.msra.mxu0 %vm6685_vm8, %v6697_v62  ;;  %v5278_v44 = vsub.f32 %v3012_v33, %v3012_v33  ;;  %v3011_v63 = vsel %vm6702_vm13, 1.0, %v6939_v2 }
 0x24f   : > { %v1813_v34 = vsub.f32 %v5175_v20, %v6687_v1  ;;  %v5284_v16 = vadd.s32 %v4707_v21, %v1225_v60  ;;  %1803 = vmatprep.subr.mxu1 %v1802_v30  ;;  %v1808_v17 = vand.u32 4294901760, %v1807_v49  ;;  %3049 = vmatprep.subr.msk.mxu0 %vm6686_vm4, %v6697_v62  ;;  %v6688_v47 = vand.u32 4294901760, %v5244_v3  ;;  %v1176_v20 = vpop.xlane.xlu1 %1175 }
 0x250   : > { %v5272_v58 = vshll.u32 %v6965_v45, 16  ;;  %6966 = vst [vmem:[#allocation46_spill] sm:$0xff] %v5278_v44  ;;  %v1192_v45 = vpop.xlane.xlu0 %1191  ;;  %v3010_v21 = vsel %vm6701_vm14, 1.0, %v6939_v2  ;;  %vm6705_vm8 = vcmp.eq.s32.totalorder %v6931_v31, %v5238_v36  ;;  %vm6704_vm4 = vcmp.eq.s32.totalorder %v6930_v27, %v5235_v29 }
 0x251   : > { %6967 = vst [vmem:[#allocation47_spill] sm:$0xff] %v5284_v16  ;;  %v1814_v33 = vand.u32 4294901760, %v1813_v34  ;;  %v1819_v60 = vsub.f32 %v5244_v3, %v6688_v47  ;;  %v3009_v30 = vsel %vm6705_vm8, 1.0, %v6939_v2  ;;  %v6706_v34 = vand.u32 4294901760, %v5260_v11 }
 0x252   : > { %v1114_v1 = vcvt.f32.s32 %v4565_v56  ;;  %1809 = vmatpush1.xpose.msra.mxu1 %v1808_v17  ;;  %v1193_v49 = vcvt.f32.s32 %v1192_v45  ;;  %3050 = vmatpush2.xpose.msk.msra.mxu0 %vm6702_vm13, %v6697_v62  ;;  %v5317_v47 = vsub.f32 %v3011_v63, %v3011_v63  ;;  %v6969_v59 = vand.u32 4294901760, %v5258_v26 }
 0x253   : > { %v1098_v3 = vcvt.f32.s32 %v4572_v55  ;;  %1815 = vmatprep.subr.mxu1 %v1814_v33  ;;  %3051 = vmatprep.subr.msk.mxu0 %vm6701_vm14, %v6697_v62  ;;  %v5327_v56 = vsub.f32 %v3010_v21, %v3010_v21  ;;  %v1831_v17 = vsub.f32 %v5260_v11, %v6706_v34  ;;  %v6703_v45 = vand.u32 4294901760, %v5278_v44 }
 0x254   : > { %6968 = vst [vmem:[#allocation48_spill] sm:$0xff] %v5317_v47  ;;  %v1825_v38 = vsub.f32 %v5258_v26, %v6969_v59  ;;  %v5334_v63 = vadd.s32 %v4743_v32, %v1209_v14  ;;  %v1820_v59 = vand.u32 4294901760, %v1819_v60  ;;  %v5336_v55 = vsub.f32 %v3009_v30, %v3009_v30  ;;  %v1160_v62 = vpop.xlane.xlu0 %1159 }
 0x255   : > { %6970 = vst [vmem:[#allocation49_spill] sm:$0xff] %v5327_v56  ;;  %v3008_v33 = vsel %vm6704_vm4, 1.0, %v6939_v2  ;;  %v1837_v0 = vsub.f32 %v5278_v44, %v6703_v45  ;;  %vm6715_vm14 = vcmp.eq.s32.totalorder %v6931_v31, %v5235_v29  ;;  %vm6716_vm13 = vcmp.eq.s32.totalorder %v6930_v27, %v5284_v16 }
 0x256   : > { %6971 = vst [vmem:[#allocation50_spill] sm:$0xff] %v5334_v63  ;;  %6972 = vst [vmem:[#allocation51_spill] sm:$0xff] %v5336_v55  ;;  %v1826_v21 = vand.u32 4294901760, %v1825_v38  ;;  %v5349_v32 = vshll.u32 %v1114_v1, 16  ;;  %v1177_v14 = vcvt.f32.s32 %v1176_v20  ;;  %v5352_v60 = vadd.s32 %v4884_v6, %v1193_v49  ;;  %1821 = vmatpush1.xpose.msra.mxu1 %v1820_v59  ;;  %v1144_v59 = vpop.xlane.xlu1 %1143 }
 0x257   : > { %v6974_v30 = vmov 1.0   ;;  %v6713_v38 = vand.u32 4294901760, %v5317_v47  ;;  %v5363_v1 = vsub.f32 %v3008_v33, %v3008_v33  ;;  %v1832_v20 = vand.u32 4294901760, %v1831_v17 }
 0x258   : > { %6973 = vst [vmem:[#allocation52_spill] sm:$0xff] %v5352_v60  ;;  %3052 = vmatpush2.xpose.msk.msra.mxu0 %vm6705_vm8, %v6974_v30  ;;  %1827 = vmatprep.subr.mxu1 %v1826_v21  ;;  %v3007_v6 = vsel %vm6715_vm14, 1.0, %v6939_v2  ;;  %v6714_v49 = vand.u32 4294901760, %v5327_v56  ;;  %v3006_v21 = vsel %vm6716_vm13, 1.0, %v6939_v2  ;;  %vm6733_vm8 = vcmp.eq.s32.totalorder %v6930_v27, %v5334_v63 }
 0x259   : > { %3053 = vmatprep.subr.msk.mxu0 %vm6704_vm4, %v6974_v30  ;;  %6975 = vst [vmem:[#allocation53_spill] sm:$0xff] %v5363_v1  ;;  %v1843_v45 = vsub.f32 %v5317_v47, %v6713_v38  ;;  %vm6720_vm4 = vcmp.eq.s32.totalorder %v6931_v31, %v5284_v16  ;;  %v5381_v17 = vshll.u32 %v1098_v3, 16  ;;  %v1838_v33 = vand.u32 4294901760, %v1837_v0 }
 0x25a   : > { %v1849_v34 = vsub.f32 %v5327_v56, %v6714_v49  ;;  %v6717_v36 = vand.u32 4294901760, %v5336_v55  ;;  %v5388_v44 = vadd.s32 %v4903_v10, %v1177_v14  ;;  %v1161_v11 = vcvt.f32.s32 %v1160_v62  ;;  %1833 = vmatpush2.xpose.msra.mxu1 %v1832_v20  ;;  %v1128_v49 = vpop.xlane.xlu0 %1127 }
 0x25b   : > { %v5394_v38 = vsub.f32 %v3007_v6, %v3007_v6  ;;  %v3005_v0 = vsel %vm6720_vm4, 1.0, %v6939_v2  ;;  %v1145_v3 = vcvt.f32.s32 %v1144_v59  ;;  %1839 = vmatprep.subr.mxu1 %v1838_v33  ;;  %v5404_v62 = vsub.f32 %v3006_v21, %v3006_v21 }
 0x25c   : > { %6976 = vst [vmem:[#allocation54_spill] sm:$0xff] %v5388_v44  ;;  %3054 = vmatpush2.xpose.msk.msra.mxu0 %vm6715_vm14, %v6974_v30  ;;  %v3004_v10 = vsel %vm6733_vm8, 1.0, %v6939_v2  ;;  %v6722_v14 = vand.u32 4294901760, %v5363_v1  ;;  %v1844_v20 = vand.u32 4294901760, %v1843_v45  ;;  %v1855_v6 = vsub.f32 %v5336_v55, %v6717_v36 }
 0x25d   : > { %6977 = vst [vmem:[#allocation55_spill] sm:$0xff] %v5394_v38  ;;  %3055 = vmatprep.subr.msk.mxu0 %vm6716_vm13, %v6974_v30  ;;  %6978 = vst [vmem:[#allocation56_spill] sm:$0xff] %v5404_v62  ;;  %vm6732_vm14 = vcmp.eq.s32.totalorder %v6931_v31, %v5334_v63  ;;  %vm6737_vm13 = vcmp.eq.s32.totalorder %v6930_v27, %v5352_v60  ;;  %v1850_v59 = vand.u32 4294901760, %v1849_v34  ;;  %v1129_v29 = vcvt.f32.s32 %v1128_v49 }
 0x25e   : > { %v5418_v21 = vsub.f32 %v3005_v0, %v3005_v0  ;;  %v1861_v33 = vsub.f32 %v5363_v1, %v6722_v14  ;;  %v3003_v45 = vsel %vm6732_vm14, 1.0, %v6939_v2  ;;  %v5428_v36 = vadd.s32 %v5000_v7, %v1161_v11  ;;  %1845 = vmatpush2.xpose.msra.mxu1 %v1844_v20  ;;  %v1112_v14 = vpop.xlane.xlu1 %1111 }
 0x25f   : > { %v5434_v34 = vsub.f32 %v3004_v10, %v3004_v10  ;;  %v6727_v0 = vand.u32 4294901760, %v5394_v38  ;;  %1851 = vmatprep.subr.mxu1 %v1850_v59  ;;  %v3002_v7 = vsel %vm6737_vm13, 1.0, %v6939_v2  ;;  %vm6750_vm5 = vcmp.eq.s32.totalorder %v6930_v27, %v5388_v44 }
 0x260   : > { %6979 = vst [vmem:[#allocation57_spill] sm:$0xff] %v5418_v21  ;;  %6980 = vst [vmem:[#allocation58_spill] sm:$0xff] %v5428_v36  ;;  %3056 = vmatpush2.xpose.msk.msra.mxu0 %vm6720_vm4, %v6974_v30  ;;  %vm6751_vm4 = vcmp.eq.s32.totalorder %v6931_v31, %v5352_v60  ;;  %v1856_v49 = vand.u32 4294901760, %v1855_v6  ;;  %v5450_v10 = vsub.f32 %v3003_v45, %v3003_v45  ;;  %v1862_v11 = vand.u32 4294901760, %v1861_v33 }
 0x261   : > { %6981 = vst [vmem:[#allocation59_spill] sm:$0xff] %v5434_v34  ;;  %3057 = vmatprep.subr.msk.mxu0 %vm6733_vm8, %v6974_v30  ;;  %v1867_v20 = vsub.f32 %v5394_v38, %v6727_v0  ;;  %v3001_v59 = vsel %vm6751_vm4, 1.0, %v6939_v2  ;;  %v6983_v16 = vand.u32 4294901760, %v5404_v62  ;;  %v3000_v6 = vsel %vm6750_vm5, 1.0, %v6939_v2 }
 0x262   : > { %6982 = vst [vmem:[#allocation60_spill] sm:$0xff] %v5450_v10  ;;  %v6734_v45 = vand.u32 4294901760, %v5418_v21  ;;  %v5468_v0 = vadd.s32 %v5017_v13, %v1145_v3  ;;  %1857 = vmatpush2.xpose.msra.mxu1 %v1856_v49  ;;  %v5474_v33 = vsub.f32 %v3002_v7, %v3002_v7  ;;  %v5476_v38 = vsub.f32 %v3001_v59, %v3001_v59 }
 0x263   : > { %v1873_v1 = vsub.f32 %v5404_v62, %v6983_v16  ;;  %v6739_v16 = vand.u32 4294901760, %v5434_v34  ;;  %v1082_v62 = vcvt.f32.s32 %v4578_v22  ;;  %1863 = vmatprep.subr.mxu1 %v1862_v11  ;;  %vm6753_vm8 = vcmp.eq.s32.totalorder %v6930_v27, %v5428_v36 }
 0x264   : > { %6984 = vst [vmem:[#allocation61_spill] sm:$0xff] %v5468_v0  ;;  %3058 = vmatpush2.xpose.msk.msra.mxu0 %vm6732_vm14, %v6974_v30  ;;  %6985 = vst [vmem:[#allocation62_spill] sm:$0xff] %v5474_v33  ;;  %v1879_v13 = vsub.f32 %v5418_v21, %v6734_v45  ;;  %vm6752_vm14 = vcmp.eq.s32.totalorder %v6931_v31, %v5388_v44  ;;  %v1113_v3 = vcvt.f32.s32 %v1112_v14  ;;  %v1868_v7 = vand.u32 4294901760, %v1867_v20 }
 0x265   : > { %3059 = vmatprep.subr.msk.mxu0 %vm6737_vm13, %v6974_v30  ;;  %v5491_v49 = vsub.f32 %v3000_v6, %v3000_v6  ;;  %v2999_v22 = vsel %vm6752_vm14, 1.0, %v6939_v2  ;;  %v5498_v11 = vadd.s32 %v5272_v58, %v1129_v29  ;;  %v1874_v59 = vand.u32 4294901760, %v1873_v1  ;;  %v1080_v58 = vpop.xlane.xlu1 %1079  ;;  %v1096_v1 = vpop.xlane.xlu0 %1095 }
 0x266   : > { %v1885_v45 = vsub.f32 %v5434_v34, %v6739_v16  ;;  %v6744_v63 = vand.u32 4294901760, %v5450_v10  ;;  %1869 = vmatpush2.xpose.msra.mxu1 %v1868_v7  ;;  %v2998_v14 = vsel %vm6753_vm8, 1.0, %v6939_v2  ;;  %v6747_v29 = vand.u32 4294901760, %v5474_v33 }
 0x267   : > { %6986 = vst [vmem:[#allocation63_spill] sm:$0xff] %v5491_v49  ;;  %6987 = vst [vmem:[#allocation64_spill] sm:$0xff] %v5498_v11  ;;  %vm6765_vm13 = vcmp.eq.s32.totalorder %v6931_v31, %v5428_v36  ;;  %vm6757_vm12 = vcmp.eq.s32.totalorder %v6930_v27, %v5468_v0  ;;  %1875 = vmatprep.subr.mxu1 %v1874_v59  ;;  %v1880_v20 = vand.u32 4294901760, %v1879_v13  ;;  %v1083_v34 = vshll.u32 %v1082_v62, 16 }
 0x268   : > { %3060 = vmatpush2.xpose.msk.msra.mxu0 %vm6751_vm4, %v6974_v30  ;;  %v5521_v6 = vsub.f32 %v2999_v22, %v2999_v22  ;;  %v1891_v7 = vsub.f32 %v5450_v10, %v6744_v63  ;;  %v1897_v60 = vsub.f32 %v5474_v33, %v6747_v29  ;;  %v2997_v59 = vsel %vm6765_vm13, 1.0, %v6939_v2 }
 0x269   : > { %3061 = vmatprep.subr.msk.mxu0 %vm6750_vm5, %v6974_v30  ;;  %v2996_v13 = vsel %vm6757_vm12, 1.0, %v6939_v2  ;;  %v6754_v22 = vand.u32 4294901760, %v5491_v49  ;;  %v5540_v63 = vadd.s32 %v5349_v32, %v1113_v3  ;;  %v1886_v16 = vand.u32 4294901760, %v1885_v45  ;;  %v1048_v44 = vpop.xlane.xlu1 %1047 }
 0x26a   : > { %6988 = vst [vmem:[#allocation65_spill] sm:$0xff] %v5521_v6  ;;  %v5542_v10 = vsub.f32 %v2998_v14, %v2998_v14  ;;  %v1081_v29 = vcvt.f32.s32 %v1080_v58  ;;  %v1097_v33 = vcvt.f32.s32 %v1096_v1  ;;  %1881 = vmatpush2.xpose.msra.mxu1 %v1880_v20  ;;  %vm6761_vm5 = vcmp.eq.s32.totalorder %v6931_v31, %v5468_v0 }
 0x26b   : > { %6989 = vst [vmem:[#allocation66_spill] sm:$0xff] %v5540_v63  ;;  %vm6764_vm4 = vcmp.eq.s32.totalorder %v6930_v27, %v5498_v11  ;;  %1887 = vmatprep.subr.mxu1 %v1886_v16  ;;  %v1892_v32 = vand.u32 4294901760, %v1891_v7  ;;  %v5556_v62 = vsub.f32 %v2997_v59, %v2997_v59  ;;  %v5558_v45 = vsub.f32 %v2996_v13, %v2996_v13 }
 0x26c   : > { %6990 = vst [vmem:[#allocation67_spill] sm:$0xff] %v5542_v10  ;;  %3062 = vmatpush2.xpose.msk.msra.mxu0 %vm6752_vm14, %v6974_v30  ;;  %v6993_v3 = vand.u32 4294901760, %v5476_v38  ;;  %v1898_v58 = vand.u32 4294901760, %v1897_v60  ;;  %v1909_v1 = vsub.f32 %v5491_v49, %v6754_v22  ;;  %v6758_v16 = vand.u32 4294901760, %v5521_v6  ;;  %v1064_v22 = vpop.xlane.xlu0 %1063 }
 0x26d   : > { %3063 = vmatprep.subr.msk.mxu0 %vm6753_vm8, %v6974_v30  ;;  %6991 = vst [vmem:[#allocation68_spill] sm:$0xff] %v5556_v62  ;;  %6992 = vst [vmem:[#allocation69_spill] sm:$0xff] %v5558_v45  ;;  %vm6774_vm14 = vcmp.eq.s32.totalorder %v6931_v31, %v5498_v11  ;;  %v2995_v20 = vsel %vm6761_vm5, 1.0, %v6939_v2  ;;  %v2994_v7 = vsel %vm6764_vm4, 1.0, %v6939_v2  ;;  %vm6773_vm8 = vcmp.eq.s32.totalorder %v6930_v27, %v5540_v63 }
 0x26e   : > { %v1903_v14 = vsub.f32 %v5476_v38, %v6993_v3  ;;  %v1066_v59 = vcvt.f32.s32 %v4585_v57  ;;  %v5581_v13 = vadd.s32 %v1083_v34, %v1081_v29  ;;  %1893 = vmatpush2.xpose.msra.mxu1 %v1892_v32  ;;  %v5588_v3 = vadd.s32 %v5381_v17, %v1097_v33 }
 0x26f   : > { %1899 = vmatprep.subr.mxu1 %v1898_v58  ;;  %v2993_v57 = vsel %vm6774_vm14, 1.0, %v6939_v2  ;;  %v5599_v29 = vsub.f32 %v2995_v20, %v2995_v20  ;;  %v5601_v32 = vsub.f32 %v2994_v7, %v2994_v7  ;;  %v1915_v17 = vsub.f32 %v5521_v6, %v6758_v16 }
 0x270   : > { %6994 = vst [vmem:[#allocation70_spill] sm:$0xff] %v5581_v13  ;;  %3064 = vmatpush2.xpose.msk.msra.mxu0 %vm6765_vm13, %v6974_v30  ;;  %6995 = vst [vmem:[#allocation71_spill] sm:$0xff] %v5588_v3  ;;  %v1904_v60 = vand.u32 4294901760, %v1903_v14  ;;  %v2992_v33 = vsel %vm6773_vm8, 1.0, %v6939_v2  ;;  %v1910_v14 = vand.u32 4294901760, %v1909_v1  ;;  %v6998_v58 = vand.u32 4294901760, %v5542_v10 }
 0x271   : > { %3065 = vmatprep.subr.msk.mxu0 %vm6757_vm12, %v6974_v30  ;;  %6996 = vst [vmem:[#allocation72_spill] sm:$0xff] %v5599_v29  ;;  %6997 = vst [vmem:[#allocation73_spill] sm:$0xff] %v5601_v32  ;;  %v6766_v34 = vand.u32 4294901760, %v5558_v45  ;;  %vm6778_vm12 = vcmp.eq.s32.totalorder %v6931_v31, %v5540_v63  ;;  %v1067_v20 = vshll.u32 %v1066_v59, 16  ;;  %v1065_v7 = vcvt.f32.s32 %v1064_v22 }
 0x272   : > { %v1921_v36 = vsub.f32 %v5542_v10, %v6998_v58  ;;  %1905 = vmatpush2.xpose.msra.mxu1 %v1904_v60  ;;  %v5620_v16 = vsub.f32 %v2993_v57, %v2993_v57  ;;  %v1050_v1 = vcvt.f32.s32 %v4590_v46  ;;  %v5627_v58 = vsub.f32 %v2992_v33, %v2992_v33 }
 0x273   : > { %1911 = vmatprep.subr.mxu1 %v1910_v14  ;;  %v7001_v22 = vand.u32 4294901760, %v5556_v62  ;;  %v1916_v59 = vand.u32 4294901760, %v1915_v17  ;;  %v2991_v46 = vsel %vm6778_vm12, 1.0, %v6939_v2  ;;  %v1933_v0 = vsub.f32 %v5558_v45, %v6766_v34  ;;  %v3279_v34 = vld [vmem:[%s3495_s26] sm:$0xff] }
 0x274   : > { %3066 = vmatpush2.xpose.msk.msra.mxu0 %vm6761_vm5, %v6974_v30  ;;  %6999 = vst [vmem:[#allocation74_spill] sm:$0xff] %v5620_v16  ;;  %7000 = vst [vmem:[#allocation75_spill] sm:$0xff] %v5627_v58  ;;  %vm6777_vm5 = vcmp.eq.s32.totalorder %v6930_v27, %v5588_v3  ;;  %v1922_v33 = vand.u32 4294901760, %v1921_v36  ;;  %vm6783_vm13 = vcmp.eq.s32.totalorder %v6930_v27, %v5581_v13  ;;  %v5658_v14 = vand.u32 4294901760, %v3279_v34 }
 0x275   : > { %3067 = vmatprep.subr.msk.mxu0 %vm6764_vm4, %v6974_v30  ;;  %v1927_v60 = vsub.f32 %v5556_v62, %v7001_v22  ;;  %vm1331_vm4 = vcmp.eq.s32.totalorder %v6931_v31, %v5588_v3  ;;  %v5647_v17 = vadd.s32 %v1067_v20, %v1065_v7  ;;  %v1049_v22 = vcvt.f32.s32 %v1048_v44 }
 0x276   : > { %1917 = vmatpush2.xpose.msra.mxu1 %v1916_v59  ;;  %v2990_v36 = vsel %vm6777_vm5, 1.0, %v6939_v2  ;;  %7002 = vst [vmem:[#allocation76_spill] sm:$0xff] %v5658_v14  ;;  %v1051_v57 = vshll.u32 %v1050_v1, 16  ;;  %v5664_v20 = vsub.f32 %v2991_v46, %v2991_v46  ;;  %v7004_v59 = vand.u32 4294901760, %v5599_v29 }
 0x277   : > { %1923 = vmatprep.subr.mxu1 %v1922_v33  ;;  %v1928_v44 = vand.u32 4294901760, %v1927_v60  ;;  %v7005_v45 = vand.u32 4294901760, %v5601_v32  ;;  %v2989_v1 = vsel %vm1331_vm4, 1.0, %v6939_v2  ;;  %v2988_v60 = vsel %vm6783_vm13, 1.0, %v6939_v2 }
 0x278   : > { %3068 = vmatpush2.xpose.msk.msra.mxu0 %vm6774_vm14, %v6974_v30  ;;  %7003 = vst [vmem:[#allocation77_spill] sm:$0xff] %v5664_v20  ;;  %v1939_v11 = vsub.f32 %v5599_v29, %v7004_v59  ;;  %v1934_v46 = vand.u32 4294901760, %v1933_v0  ;;  %v5681_v33 = vsub.f32 %v2990_v36, %v2990_v36  ;;  %v5686_v59 = vadd.s32 %v1051_v57, %v1049_v22 }
 0x279   : > { %3069 = vmatprep.subr.msk.mxu0 %vm6773_vm8, %v6974_v30  ;;  %v1945_v62 = vsub.f32 %v5601_v32, %v7005_v45  ;;  %vm1329_vm8 = vcmp.eq.s32.totalorder %v6931_v31, %v5581_v13  ;;  %vm1328_vm14 = vcmp.eq.s32.totalorder %v6930_v27, %v5647_v17  ;;  %v5695_v0 = vsub.f32 %v3279_v34, %v5658_v14 }
 0x27a   : > { %7006 = vst [vmem:[#allocation78_spill] sm:$0xff] %v5681_v33  ;;  %1929 = vmatpush2.xpose.msra.mxu1 %v1928_v44  ;;  %v5701_v45 = vsub.f32 %v2989_v1, %v2989_v1  ;;  %v5703_v57 = vsub.f32 %v2988_v60, %v2988_v60  ;;  %v7008_v22 = vand.u32 4294901760, %v5620_v16  ;;  %v1940_v44 = vand.u32 4294901760, %v1939_v11 }
 0x27b   : > { %1935 = vmatprep.subr.mxu1 %v1934_v46  ;;  %v1946_v7 = vand.u32 4294901760, %v1945_v62  ;;  %v2987_v34 = vsel %vm1329_vm8, 1.0, %v6939_v2  ;;  %v6784_v46 = vand.u32 4294901760, %v5664_v20  ;;  %v7009_v63 = vand.u32 4294901760, %v5627_v58 }
 0x27c   : > { %3070 = vmatpush2.xpose.msk.msra.mxu0 %vm6778_vm12, %v6974_v30  ;;  %7007 = vst [vmem:[#allocation79_spill] sm:$0xff] %v5703_v57  ;;  %v1951_v36 = vsub.f32 %v5620_v16, %v7008_v22  ;;  %v2986_v60 = vsel %vm1328_vm14, 1.0, %v6939_v2  ;;  %vm1326_vm12 = vcmp.eq.s32.totalorder %v6930_v27, %v5686_v59  ;;  %v5733_v11 = vsub.f32 %v2987_v34, %v2987_v34 }
 0x27d   : > { %3071 = vmatprep.subr.msk.mxu0 %vm6777_vm5, %v6974_v30  ;;  %v1957_v1 = vsub.f32 %v5627_v58, %v7009_v63  ;;  %vm1327_vm5 = vcmp.eq.s32.totalorder %v6931_v31, %v5647_v17  ;;  %v1963_v22 = vsub.f32 %v5664_v20, %v6784_v46  ;;  %v6793_v3 = vand.u32 4294901760, %v5701_v45 }
 0x27e   : > { %1941 = vmatpush2.xpose.msra.mxu1 %v1940_v44  ;;  %v1952_v63 = vand.u32 4294901760, %v1951_v36  ;;  %v5736_v44 = vsub.f32 %v2986_v60, %v2986_v60  ;;  %v7011_v36 = vand.u32 4294901760, %v5681_v33  ;;  %v2984_v60 = vsel %vm1326_vm12, 1.0, %v6939_v2 }
 0x27f   : > { %1947 = vmatprep.subr.mxu1 %v1946_v7  ;;  %v2985_v7 = vsel %vm1327_vm5, 1.0, %v6939_v2  ;;  %v1958_v58 = vand.u32 4294901760, %v1957_v1  ;;  %v1964_v46 = vand.u32 4294901760, %v1963_v22  ;;  %v5769_v62 = vsub.f32 %v2984_v60, %v2984_v60 }
 0x280   : > { %3072 = vmatpush2.xpose.msk.msra.mxu0 %vm1331_vm4, %v6974_v30  ;;  %7010 = vst [vmem:[#allocation80_spill] sm:$0xff] %v5736_v44  ;;  %v1969_v34 = vsub.f32 %v5681_v33, %v7011_v36  ;;  %v5764_v1 = vsub.f32 %v2985_v7, %v2985_v7  ;;  %v7013_v36 = vand.u32 4294901760, %v5695_v0  ;;  %v1975_v13 = vsub.f32 %v5701_v45, %v6793_v3 }
 0x281   : > { %3073 = vmatprep.subr.msk.mxu0 %vm6783_vm13, %v6974_v30  ;;  %vm1325_vm13 = vcmp.eq.s32.totalorder %v6931_v31, %v5686_v59  ;;  %7014 = vst [vmem:[#allocation82_spill] sm:$0xff] %v5769_v62  ;;  %v7015_v20 = vand.u32 4294901760, %v5703_v57  ;;  %v6794_v22 = vand.u32 4294901760, %v5736_v44  ;;  %v6799_v3 = vand.u32 4294901760, %v5769_v62 }
 0x282   : > { %1953 = vmatpush2.xpose.msra.mxu1 %v1952_v63  ;;  %7012 = vst [vmem:[#allocation81_spill] sm:$0xff] %v5764_v1  ;;  %v1622_v63 = vsub.f32 %v5695_v0, %v7013_v36  ;;  %v1970_v33 = vand.u32 4294901760, %v1969_v34  ;;  %v2983_v7 = vsel %vm1325_vm13, 1.0, %v6939_v2  ;;  %v7131_v24 = vand.u32 4294901760, %v4891_v5 }
 0x283   : > { %1959 = vmatprep.subr.mxu1 %v1958_v58  ;;  %v6801_v58 = vand.u32 4294901760, %v5733_v11  ;;  %v1981_v16 = vsub.f32 %v5703_v57, %v7015_v20  ;;  %v1976_v20 = vand.u32 4294901760, %v1975_v13  ;;  %v5791_v34 = vsub.f32 %v2983_v7, %v2983_v7 }
 0x284   : > { %3074 = vmatpush2.xpose.msk.msra.mxu0 %vm1329_vm8, %v6974_v30  ;;  %v1993_v36 = vsub.f32 %v5736_v44, %v6794_v22 }
 0x285   : > { %3075 = vmatprep.subr.msk.mxu0 %vm1328_vm14, %v6974_v30  ;;  %7016 = vst [vmem:[#allocation83_spill] sm:$0xff] %v5791_v34  ;;  %v1987_v2 = vsub.f32 %v5733_v11, %v6801_v58  ;;  %v1982_v60 = vand.u32 4294901760, %v1981_v16  ;;  %v6798_v7 = vand.u32 4294901760, %v5791_v34  ;;  %v7041_v58 = vld [vmem:[#allocation18_spill] sm:$0xff] }
 0x286   : > { %1965 = vmatpush2.xpose.msra.mxu1 %v1964_v46  ;;  %v6800_v46 = vand.u32 4294901760, %v5764_v1  ;;  %v1994_v22 = vand.u32 4294901760, %v1993_v36 }
 0x287   : > { %1971 = vmatprep.subr.mxu1 %v1970_v33  ;;  %v1623_v33 = vand.u32 4294901760, %v1622_v63  ;;  %v1988_v13 = vand.u32 4294901760, %v1987_v2  ;;  %v2005_v63 = vsub.f32 %v5769_v62, %v6799_v3  ;;  %v2011_v2 = vsub.f32 %v5791_v34, %v6798_v7  ;;  %v7034_v7 = vld [vmem:[#allocation26_spill] sm:$0xff]  ;;  %v7036_v3 = vld [vmem:[#allocation31_spill] sm:$0xff] }
 0x288   : > { %3076 = vmatpush2.xpose.msk.msra.mxu0 %vm1327_vm5, %v6974_v30  ;;  %v1999_v16 = vsub.f32 %v5764_v1, %v6800_v46  ;;  %v7038_v46 = vld [vmem:[#allocation16_spill] sm:$0xff] }
 0x289   : > { %3077 = vmatprep.subr.msk.mxu0 %vm1326_vm12, %v6974_v30  ;;  %v2012_v36 = vand.u32 4294901760, %v2011_v2  ;;  %v7028_v2 = vld [vmem:[#allocation24_spill] sm:$0xff] }
 0x28a   : > { %1977 = vmatpush2.xpose.msra.mxu1 %v1976_v20  ;;  %v2000_v20 = vand.u32 4294901760, %v1999_v16  ;;  %v7022_v16 = vld [vmem:[#allocation17_spill] sm:$0xff] }
 0x28b   : > { %1983 = vmatprep.subr.mxu1 %v1982_v60  ;;  %v2006_v60 = vand.u32 4294901760, %v2005_v63  ;;  %v7024_v63 = vld [vmem:[#allocation20_spill] sm:$0xff] }
 0x28c   : > { %3078 = vmatpush2.xpose.msk.msra.mxu0 %vm1325_vm13, %v6974_v30 }
 0x28d   : > { %2025 = vmatprep.subr.mxu0 %v4661_v25 }
 0x28e   : > { %1989 = vmatpush2.xpose.msra.mxu1 %v1988_v13  ;;  %v7020_v13 = vld [vmem:[#allocation22_spill] sm:$0xff] }
 0x28f   : > { %1624 = vmatmul.mubr.f32.vlgmr.msra.gmra.mxu0 %v1623_v33  ;;  %1995 = vmatprep.subr.mxu1 %v1994_v22  ;;  %v7017_v22 = vand.u32 4294901760, %v4691_v4  ;;  %v7019_v33 = vld [vmem:[#allocation14_spill] sm:$0xff] }
 0x290   : > { %2028 = vmatpush1.xpose.msra.mxu0 %v4663_v37  ;;  %2217 = vmatprep.mubr.f32.mxu0 %v4691_v4  ;;  %v7018_v4 = vld [vmem:[#allocation27_spill] sm:$0xff] }
 0x291   : > { %2031 = vmatprep.subr.mxu0 %v4696_v43  ;;  %v7135_v50 = vand.u32 4294901760, %v7018_v4 }
 0x292   : > { %2001 = vmatpush2.xpose.msra.mxu1 %v2000_v20  ;;  %v7026_v20 = vld [vmem:[#allocation19_spill] sm:$0xff] }
 0x293   : > { %2007 = vmatprep.subr.mxu1 %v2006_v60  ;;  %v7029_v60 = vld [vmem:[#allocation25_spill] sm:$0xff] }
 0x294   : > { %2034 = vmatpush1.xpose.msra.mxu0 %v4702_v15 }
 0x295   : > { %2037 = vmatprep.subr.mxu0 %v4736_v54 }
 0x296   : > { %2013 = vmatpush2.xpose.msra.mxu1 %v2012_v36  ;;  %v7031_v36 = vld [vmem:[#allocation28_spill] sm:$0xff] }
 0x297   : > { %3079 = vmatprep.subr.msk.mxu1 %vm1324_vm15, %v6974_v30 }
 0x298   : > { %2040 = vmatpush1.xpose.msra.mxu0 %v4745_v61 }
 0x299   : > { %2043 = vmatprep.subr.mxu0 %v4777_v48  ;;  %2017 = vmatmul.mubr.f32.vlgmr.msra.gmra.mxu1 %v5658_v14  ;;  %v7043_v14 = vld [vmem:[#allocation36_spill] sm:$0xff] }
 0x29a   : > { %3080 = vmatpush1.xpose.msk.msra.mxu1 %vm1323_vm1, %v6974_v30  ;;  %2357 = vmatprep.mubr.f32.mxu1 %v7017_v22  ;;  %v7033_v22 = vld [vmem:[#allocation29_spill] sm:$0xff] }
 0x29b   : > { %3081 = vmatprep.subr.msk.mxu1 %vm1322_vm2, %v6974_v30 }
 0x29c   : > { %2046 = vmatpush1.xpose.msra.mxu0 %v4783_v35 }
 0x29d   : > { %2049 = vmatprep.subr.mxu0 %v4812_v40 }
 0x29e   : > { %3082 = vmatpush1.xpose.msk.msra.mxu1 %vm1321_vm6, %v6974_v30 }
 0x29f   : > { %3083 = vmatprep.subr.msk.mxu1 %vm1320_vm3, %v6974_v30 }
 0x2a0   : > { %2052 = vmatpush1.xpose.msra.mxu0 %v4818_v53  ;;  %v7145_v53 = vand.u32 4294901760, %v7028_v2 }
 0x2a1   : > { %2055 = vmatprep.subr.mxu0 %v4851_v52 }
 0x2a2   : > { %3084 = vmatpush1.xpose.msk.msra.mxu1 %vm1319_vm7, %v6974_v30 }
 0x2a3   : > { %3085 = vmatprep.subr.msk.mxu1 %vm1318_vm9, %v6974_v30 }
 0x2a4   : > { %2058 = vmatpush1.xpose.msra.mxu0 %v4859_v8 }
 0x2a5   : > { %2061 = vmatprep.subr.mxu0 %v4891_v5  ;;  %v7137_v5 = vand.u32 4294901760, %v7019_v33 }
 0x2a6   : > { %3086 = vmatpush1.xpose.msk.msra.mxu1 %vm6795_vm11, %v6974_v30  ;;  %vm7021_vm11 = vcmp.eq.s32.totalorder %v6930_v27, %v7020_v13 }
 0x2a7   : > { %3087 = vmatprep.subr.msk.mxu1 %vm6796_vm10, %v6974_v30  ;;  %vm7023_vm10 = vcmp.eq.s32.totalorder %v6931_v31, %v7020_v13 }
 0x2a8   : > { %2064 = vmatpush1.xpose.msra.mxu0 %v4897_v9 }
 0x2a9   : > { %2067 = vmatprep.subr.mxu0 %v7018_v4  ;;  %v7156_v4 = vld [vmem:[#allocation34_spill] sm:$0xff] }
 0x2aa   : > { %3088 = vmatpush1.xpose.msk.msra.mxu1 %vm6797_vm0, %v6974_v30  ;;  %vm7025_vm0 = vcmp.eq.s32.totalorder %v6930_v27, %v7024_v63 }
 0x2ab   : > { %3089 = vmatprep.subr.msk.mxu1 %vm7021_vm11, %v6974_v30  ;;  %vm7027_vm11 = vcmp.eq.s32.totalorder %v6931_v31, %v7024_v63 }
 0x2ac   : > { %2070 = vmatpush1.xpose.msra.mxu0 %v7019_v33  ;;  %v7157_v33 = vand.u32 4294901760, %v7156_v4  ;;  %v7225_v4 = vld [vmem:[#allocation65_spill] sm:$0xff] }
 0x2ad   : > { %2073 = vmatprep.subr.mxu0 %v7022_v16 }
 0x2ae   : > { %3090 = vmatpush1.xpose.msk.msra.mxu1 %vm7023_vm10, %v6974_v30  ;;  %vm7030_vm10 = vcmp.eq.s32.totalorder %v6930_v27, %v7029_v60 }
 0x2af   : > { %3091 = vmatprep.subr.msk.mxu1 %vm7025_vm0, %v6974_v30  ;;  %vm7032_vm0 = vcmp.eq.s32.totalorder %v6931_v31, %v7029_v60 }
 0x2b0   : > { %2076 = vmatpush1.xpose.msra.mxu0 %v4974_v28 }
 0x2b1   : > { %2079 = vmatprep.subr.mxu0 %v7026_v20 }
 0x2b2   : > { %3092 = vmatpush1.xpose.msk.msra.mxu1 %vm7027_vm11, %v6974_v30  ;;  %vm7035_vm11 = vcmp.eq.s32.totalorder %v6930_v27, %v7034_v7 }
 0x2b3   : > { %3093 = vmatprep.subr.msk.mxu1 %vm7030_vm10, %v6974_v30  ;;  %vm7037_vm10 = vcmp.eq.s32.totalorder %v6931_v31, %v7034_v7 }
 0x2b4   : > { %2082 = vmatpush1.xpose.msra.mxu0 %v7028_v2  ;;  %v7171_v2 = vand.u32 4294901760, %v5206_v19 }
 0x2b5   : > { %2085 = vmatprep.subr.mxu0 %v7031_v36 }
 0x2b6   : > { %3094 = vmatpush1.xpose.msk.msra.mxu1 %vm7032_vm0, %v6974_v30  ;;  %vm7039_vm0 = vcmp.eq.s32.totalorder %v6930_v27, %v7038_v46 }
 0x2b7   : > { %3095 = vmatprep.subr.msk.mxu1 %vm7035_vm11, %v6974_v30  ;;  %vm7040_vm11 = vcmp.eq.s32.totalorder %v6931_v31, %v7038_v46  ;;  %v7046_v46 = vld [vmem:[#allocation23_spill] sm:$0xff] }
 0x2b8   : > { %2088 = vmatpush1.xpose.msra.mxu0 %v7033_v22 }
 0x2b9   : > { %2091 = vmatprep.subr.mxu0 %v7036_v3 }
 0x2ba   : > { %3096 = vmatpush1.xpose.msk.msra.mxu1 %vm7037_vm10, %v6974_v30  ;;  %vm7042_vm10 = vcmp.eq.s32.totalorder %v6930_v27, %v7041_v58 }
 0x2bb   : > { %3097 = vmatprep.subr.msk.mxu1 %vm7039_vm0, %v6974_v30  ;;  %vm7044_vm0 = vcmp.eq.s32.totalorder %v6931_v31, %v7041_v58 }
 0x2bc   : > { %2094 = vmatpush1.xpose.msra.mxu0 %v5086_v39 }
 0x2bd   : > { %2097 = vmatprep.subr.mxu0 %v5117_v51  ;;  %v7045_v51 = vld [vmem:[#allocation37_spill] sm:$0xff] }
 0x2be   : > { %3098 = vmatpush1.xpose.msk.msra.mxu1 %vm7040_vm11, %v6974_v30  ;;  %vm7047_vm11 = vcmp.eq.s32.totalorder %v6930_v27, %v7046_v46 }
 0x2bf   : > { %3099 = vmatprep.subr.msk.mxu1 %vm7042_vm10, %v6974_v30  ;;  %vm7048_vm10 = vcmp.eq.s32.totalorder %v6931_v31, %v7046_v46  ;;  %v7054_v46 = vld [vmem:[#allocation33_spill] sm:$0xff] }
 0x2c0   : > { %2100 = vmatpush1.xpose.msra.mxu0 %v5128_v12 }
 0x2c1   : > { %2103 = vmatprep.subr.mxu0 %v7043_v14  ;;  %v7049_v14 = vld [vmem:[#allocation30_spill] sm:$0xff] }
 0x2c2   : > { %3100 = vmatpush1.xpose.msk.msra.mxu1 %vm7044_vm0, %v6974_v30  ;;  %vm7050_vm0 = vcmp.eq.s32.totalorder %v6930_v27, %v7049_v14 }
 0x2c3   : > { %3101 = vmatprep.subr.msk.mxu1 %vm7047_vm11, %v6974_v30  ;;  %vm7052_vm11 = vcmp.eq.s32.totalorder %v6931_v31, %v7049_v14  ;;  %v7058_v14 = vld [vmem:[#allocation35_spill] sm:$0xff] }
 0x2c4   : > { %2106 = vmatpush1.xpose.msra.mxu0 %v7045_v51  ;;  %v7051_v51 = vld [vmem:[#allocation38_spill] sm:$0xff] }
 0x2c5   : > { %2109 = vmatprep.subr.mxu0 %v5195_v42  ;;  %v7053_v42 = vld [vmem:[#allocation43_spill] sm:$0xff] }
 0x2c6   : > { %3102 = vmatpush1.xpose.msk.msra.mxu1 %vm7048_vm10, %v6974_v30  ;;  %vm7055_vm10 = vcmp.eq.s32.totalorder %v6930_v27, %v7054_v46 }
 0x2c7   : > { %3103 = vmatprep.subr.msk.mxu1 %vm7050_vm0, %v6974_v30  ;;  %vm7056_vm0 = vcmp.eq.s32.totalorder %v6931_v31, %v7054_v46 }
 0x2c8   : > { %2112 = vmatpush1.xpose.msra.mxu0 %v5206_v19  ;;  %v7180_v19 = vld [vmem:[#allocation44_spill] sm:$0xff] }
 0x2c9   : > { %2115 = vmatprep.subr.mxu0 %v7051_v51  ;;  %v7057_v51 = vld [vmem:[#allocation45_spill] sm:$0xff] }
 0x2ca   : > { %3104 = vmatpush1.xpose.msk.msra.mxu1 %vm7052_vm11, %v6974_v30  ;;  %vm7059_vm11 = vcmp.eq.s32.totalorder %v6930_v27, %v7058_v14 }
 0x2cb   : > { %3105 = vmatprep.subr.msk.mxu1 %vm7055_vm10, %v6974_v30  ;;  %vm7061_vm10 = vcmp.eq.s32.totalorder %v6931_v31, %v7058_v14 }
 0x2cc   : > { %2118 = vmatpush1.xpose.msra.mxu0 %v7053_v42  ;;  %v7060_v42 = vld [vmem:[#allocation46_spill] sm:$0xff] }
 0x2cd   : > { %2121 = vmatprep.subr.mxu0 %v5258_v26  ;;  %v7062_v26 = vld [vmem:[#allocation15_spill] sm:$0xff] }
 0x2ce   : > { %3106 = vmatpush1.xpose.msk.msra.mxu1 %vm7056_vm0, %v6974_v30  ;;  %vm7063_vm0 = vcmp.eq.s32.totalorder %v6930_v27, %v7062_v26 }
 0x2cf   : > { %3107 = vmatprep.subr.msk.mxu1 %vm7059_vm11, %v6974_v30  ;;  %vm7064_vm11 = vcmp.eq.s32.totalorder %v6931_v31, %v7062_v26  ;;  %v7070_v26 = vld [vmem:[#allocation32_spill] sm:$0xff] }
 0x2d0   : > { %2124 = vmatpush2.xpose.msra.mxu0 %v7057_v51 }
 0x2d1   : > { %2127 = vmatprep.subr.mxu0 %v7060_v42  ;;  %v7065_v42 = vld [vmem:[#allocation39_spill] sm:$0xff] }
 0x2d2   : > { %3108 = vmatpush1.xpose.msk.msra.mxu1 %vm7061_vm10, %v6974_v30  ;;  %vm7066_vm10 = vcmp.eq.s32.totalorder %v6930_v27, %v7065_v42 }
 0x2d3   : > { %3109 = vmatprep.subr.msk.mxu1 %vm7063_vm0, %v6974_v30  ;;  %vm7068_vm0 = vcmp.eq.s32.totalorder %v6931_v31, %v7065_v42 }
 0x2d4   : > { %2130 = vmatpush2.xpose.msra.mxu0 %v5317_v47  ;;  %v7067_v47 = vld [vmem:[#allocation53_spill] sm:$0xff] }
 0x2d5   : > { %2133 = vmatprep.subr.mxu0 %v5327_v56  ;;  %v7069_v56 = vld [vmem:[#allocation55_spill] sm:$0xff] }
 0x2d6   : > { %3110 = vmatpush1.xpose.msk.msra.mxu1 %vm7064_vm11, %v6974_v30  ;;  %vm7071_vm11 = vcmp.eq.s32.totalorder %v6930_v27, %v7070_v26 }
 0x2d7   : > { %3111 = vmatprep.subr.msk.mxu1 %vm7066_vm10, %v6974_v30  ;;  %vm7073_vm10 = vcmp.eq.s32.totalorder %v6931_v31, %v7070_v26  ;;  %v7079_v26 = vld [vmem:[#allocation41_spill] sm:$0xff] }
 0x2d8   : > { %2136 = vmatpush2.xpose.msra.mxu0 %v5336_v55  ;;  %v7072_v55 = vld [vmem:[#allocation56_spill] sm:$0xff] }
 0x2d9   : > { %2139 = vmatprep.subr.mxu0 %v7067_v47  ;;  %v7074_v47 = vld [vmem:[#allocation42_spill] sm:$0xff] }
 0x2da   : > { %3112 = vmatpush2.xpose.msk.msra.mxu1 %vm7068_vm0, %v6974_v30  ;;  %vm7075_vm0 = vcmp.eq.s32.totalorder %v6930_v27, %v7074_v47 }
 0x2db   : > { %3113 = vmatprep.subr.msk.mxu1 %vm7071_vm11, %v6974_v30  ;;  %vm7077_vm11 = vcmp.eq.s32.totalorder %v6931_v31, %v7074_v47 }
 0x2dc   : > { %2142 = vmatpush2.xpose.msra.mxu0 %v7069_v56  ;;  %v7076_v56 = vld [vmem:[#allocation59_spill] sm:$0xff] }
 0x2dd   : > { %2145 = vmatprep.subr.mxu0 %v7072_v55  ;;  %v7078_v55 = vld [vmem:[#allocation60_spill] sm:$0xff] }
 0x2de   : > { %3114 = vmatpush2.xpose.msk.msra.mxu1 %vm7073_vm10, %v6974_v30  ;;  %vm7080_vm10 = vcmp.eq.s32.totalorder %v6930_v27, %v7079_v26 }
 0x2df   : > { %3115 = vmatprep.subr.msk.mxu1 %vm7075_vm0, %v6974_v30  ;;  %vm7082_vm0 = vcmp.eq.s32.totalorder %v6931_v31, %v7079_v26 }
 0x2e0   : > { %2148 = vmatpush2.xpose.msra.mxu0 %v5418_v21  ;;  %v7081_v21 = vld [vmem:[#allocation62_spill] sm:$0xff] }
 0x2e1   : > { %2151 = vmatprep.subr.mxu0 %v7076_v56  ;;  %v7083_v56 = vld [vmem:[#allocation47_spill] sm:$0xff] }
 0x2e2   : > { %3116 = vmatpush2.xpose.msk.msra.mxu1 %vm7077_vm11, %v6974_v30  ;;  %vm7084_vm11 = vcmp.eq.s32.totalorder %v6930_v27, %v7083_v56 }
 0x2e3   : > { %3117 = vmatprep.subr.msk.mxu1 %vm7080_vm10, %v6974_v30  ;;  %vm7085_vm10 = vcmp.eq.s32.totalorder %v6931_v31, %v7083_v56  ;;  %v7090_v56 = vld [vmem:[#allocation52_spill] sm:$0xff] }
 0x2e4   : > { %2154 = vmatpush2.xpose.msra.mxu0 %v7078_v55 }
 0x2e5   : > { %2157 = vmatprep.subr.mxu0 %v7081_v21  ;;  %v7086_v21 = vld [vmem:[#allocation50_spill] sm:$0xff] }
 0x2e6   : > { %3118 = vmatpush2.xpose.msk.msra.mxu1 %vm7082_vm0, %v6974_v30  ;;  %vm7087_vm0 = vcmp.eq.s32.totalorder %v6930_v27, %v7086_v21 }
 0x2e7   : > { %3119 = vmatprep.subr.msk.mxu1 %vm7084_vm11, %v6974_v30  ;;  %vm7088_vm11 = vcmp.eq.s32.totalorder %v6931_v31, %v7086_v21 }
 0x2e8   : > { %2160 = vmatpush2.xpose.msra.mxu0 %v5476_v38 }
 0x2e9   : > { %2163 = vmatprep.subr.mxu0 %v5491_v49  ;;  %v7089_v49 = vld [vmem:[#allocation68_spill] sm:$0xff] }
 0x2ea   : > { %3120 = vmatpush2.xpose.msk.msra.mxu1 %vm7085_vm10, %v6974_v30  ;;  %vm7091_vm10 = vcmp.eq.s32.totalorder %v6930_v27, %v7090_v56 }
 0x2eb   : > { %3121 = vmatprep.subr.msk.mxu1 %vm7087_vm0, %v6974_v30  ;;  %vm7093_vm0 = vcmp.eq.s32.totalorder %v6931_v31, %v7090_v56  ;;  %v7098_v56 = vld [vmem:[#allocation58_spill] sm:$0xff] }
 0x2ec   : > { %2166 = vmatpush2.xpose.msra.mxu0 %v5521_v6  ;;  %v7092_v6 = vld [vmem:[#allocation69_spill] sm:$0xff] }
 0x2ed   : > { %2169 = vmatprep.subr.mxu0 %v5542_v10  ;;  %v7094_v10 = vld [vmem:[#allocation54_spill] sm:$0xff] }
 0x2ee   : > { %3122 = vmatpush2.xpose.msk.msra.mxu1 %vm7088_vm11, %v6974_v30  ;;  %vm7095_vm11 = vcmp.eq.s32.totalorder %v6930_v27, %v7094_v10 }
 0x2ef   : > { %3123 = vmatprep.subr.msk.mxu1 %vm7091_vm10, %v6974_v30  ;;  %vm7096_vm10 = vcmp.eq.s32.totalorder %v6931_v31, %v7094_v10  ;;  %v7103_v10 = vld [vmem:[#allocation61_spill] sm:$0xff] }
 0x2f0   : > { %2172 = vmatpush2.xpose.msra.mxu0 %v7089_v49 }
 0x2f1   : > { %2175 = vmatprep.subr.mxu0 %v7092_v6  ;;  %v7097_v6 = vld [vmem:[#allocation74_spill] sm:$0xff] }
 0x2f2   : > { %3124 = vmatpush2.xpose.msk.msra.mxu1 %vm7093_vm0, %v6974_v30  ;;  %vm7099_vm0 = vcmp.eq.s32.totalorder %v6930_v27, %v7098_v56 }
 0x2f3   : > { %3125 = vmatprep.subr.msk.mxu1 %vm7095_vm11, %v6974_v30  ;;  %vm7101_vm11 = vcmp.eq.s32.totalorder %v6931_v31, %v7098_v56 }
 0x2f4   : > { %2178 = vmatpush2.xpose.msra.mxu0 %v5599_v29  ;;  %v7100_v29 = vld [vmem:[#allocation75_spill] sm:$0xff] }
 0x2f5   : > { %2181 = vmatprep.subr.mxu0 %v5601_v32  ;;  %v7102_v32 = vld [vmem:[#allocation77_spill] sm:$0xff] }
 0x2f6   : > { %3126 = vmatpush2.xpose.msk.msra.mxu1 %vm7096_vm10, %v6974_v30  ;;  %vm7104_vm10 = vcmp.eq.s32.totalorder %v6930_v27, %v7103_v10 }
 0x2f7   : > { %3127 = vmatprep.subr.msk.mxu1 %vm7099_vm0, %v6974_v30  ;;  %vm7106_vm0 = vcmp.eq.s32.totalorder %v6931_v31, %v7103_v10 }
 0x2f8   : > { %2184 = vmatpush2.xpose.msra.mxu0 %v7097_v6  ;;  %v7105_v6 = vld [vmem:[#allocation78_spill] sm:$0xff] }
 0x2f9   : > { %2187 = vmatprep.subr.mxu0 %v7100_v29  ;;  %v7107_v29 = vld [vmem:[#allocation64_spill] sm:$0xff] }
 0x2fa   : > { %3128 = vmatpush2.xpose.msk.msra.mxu1 %vm7101_vm11, %v6974_v30  ;;  %vm7108_vm11 = vcmp.eq.s32.totalorder %v6930_v27, %v7107_v29 }
 0x2fb   : > { %3129 = vmatprep.subr.msk.mxu1 %vm7104_vm10, %v6974_v30  ;;  %vm7109_vm10 = vcmp.eq.s32.totalorder %v6931_v31, %v7107_v29 }
 0x2fc   : > { %2190 = vmatpush2.xpose.msra.mxu0 %v7102_v32 }
 0x2fd   : > { %2193 = vmatprep.subr.mxu0 %v7105_v6  ;;  %v7110_v6 = vld [vmem:[#allocation66_spill] sm:$0xff] }
 0x2fe   : > { %3130 = vmatpush2.xpose.msk.msra.mxu1 %vm7106_vm0, %v6974_v30  ;;  %vm7111_vm0 = vcmp.eq.s32.totalorder %v6930_v27, %v7110_v6 }
 0x2ff   : > { %3131 = vmatprep.subr.msk.mxu1 %vm7108_vm11, %v6974_v30  ;;  %vm7112_vm11 = vcmp.eq.s32.totalorder %v6931_v31, %v7110_v6 }
 0x300   : > { %2196 = vmatpush2.xpose.msra.mxu0 %v5701_v45 }
 0x301   : > { %2199 = vmatprep.subr.mxu0 %v5703_v57  ;;  %v7113_v57 = vld [vmem:[#allocation71_spill] sm:$0xff] }
 0x302   : > { %3132 = vmatpush2.xpose.msk.msra.mxu1 %vm7109_vm10, %v6974_v30  ;;  %vm7114_vm10 = vcmp.eq.s32.totalorder %v6930_v27, %v7113_v57 }
 0x303   : > { %3133 = vmatprep.subr.msk.mxu1 %vm7111_vm0, %v6974_v30 }
 0x304   : > { %2202 = vmatpush2.xpose.msra.mxu0 %v5733_v11 }
 0x305   : > { %2205 = vmatprep.subr.mxu0 %v5736_v44  ;;  %v7115_v44 = vld [vmem:[#allocation70_spill] sm:$0xff] }
 0x306   : > { %3134 = vmatpush2.xpose.msk.msra.mxu1 %vm7112_vm11, %v6974_v30  ;;  %vm7116_vm0 = vcmp.eq.s32.totalorder %v6930_v27, %v7115_v44  ;;  %vm7146_vm11 = vcmp.eq.s32.totalorder %v6930_v27, %v7029_v60 }
 0x307   : > { %3135 = vmatprep.subr.msk.mxu1 %vm7114_vm10, %v6974_v30  ;;  %vm7148_vm10 = vcmp.eq.s32.totalorder %v6931_v31, %v7029_v60  ;;  %v7174_v60 = vld [vmem:[#allocation38_spill] sm:$0xff] }
 0x308   : > { %2208 = vmatpush2.xpose.msra.mxu0 %v5764_v1  ;;  %v7117_v1 = vand.u32 4294901760, %v4661_v25  ;;  %v7120_v25 = vld [vmem:[#allocation21_spill] sm:$0xff] }
 0x309   : > { %2211 = vmatprep.subr.mxu0 %v5769_v62  ;;  %v7118_v62 = vand.u32 4294901760, %v4663_v37  ;;  %v7122_v37 = vand.u32 4294901760, %v4736_v54  ;;  %v7126_v54 = vand.u32 4294901760, %v4783_v35  ;;  %v7130_v35 = vand.u32 4294901760, %v4859_v8 }
 0x30a   : > { %3136 = vmatpush2.xpose.msk.msra.mxu1 %vm1331_vm4, %v6974_v30  ;;  %v7147_v8 = vand.u32 4294901760, %v7031_v36  ;;  %v7175_v36 = vand.u32 4294901760, %v7174_v60 }
 0x30b   : > { %3137 = vmatprep.subr.msk.mxu1 %vm7116_vm0, %v6974_v30  ;;  %vm7150_vm0 = vcmp.eq.s32.totalorder %v6930_v27, %v7034_v7 }
 0x30c   : > { %2214 = vmatpush2.xpose.msra.mxu0 %v5791_v34  ;;  %v7119_v34 = vand.u32 4294901760, %v4696_v43  ;;  %v7123_v43 = vand.u32 4294901760, %v4745_v61  ;;  %v7127_v61 = vand.u32 4294901760, %v4812_v40  ;;  %v7133_v40 = vand.u32 4294901760, %v4897_v9 }
 0x30d   : > { %2370 = vmatprep.subr.mxu0 %v7117_v1  ;;  %v7121_v1 = vand.u32 4294901760, %v4702_v15  ;;  %v7124_v15 = vand.u32 4294901760, %v4777_v48  ;;  %v7129_v48 = vand.u32 4294901760, %v4851_v52  ;;  %v7139_v9 = vand.u32 4294901760, %v7022_v16 }
 0x30e   : > { %3138 = vmatpush2.xpose.msk.msra.mxu1 %vm1329_vm8, %v6974_v30  ;;  %v7149_v52 = vand.u32 4294901760, %v7033_v22  ;;  %v7177_v22 = vld [vmem:[#allocation43_spill] sm:$0xff] }
 0x30f   : > { %2220 = vmatmul.mubr.f32.vlgmr.msra.gmra.mxu0 %v5695_v0  ;;  %3139 = vmatprep.subr.msk.mxu1 %vm1328_vm14, %v6974_v30 }
 0x310   : > { %2374 = vmatpush1.xpose.msra.mxu0 %v7118_v62  ;;  %2624 = vmatprep.mubr.f32.mxu0 %v7120_v25  ;;  %v7125_v62 = vand.u32 4294901760, %v5695_v0  ;;  %v7153_v0 = vand.u32 4294901760, %v5086_v39  ;;  %v7161_v39 = vld [vmem:[#allocation36_spill] sm:$0xff] }
 0x311   : > { %2378 = vmatprep.subr.mxu0 %v7119_v34  ;;  %v7154_v34 = vld [vmem:[#allocation16_spill] sm:$0xff] }
 0x312   : > { %3140 = vmatpush2.xpose.msk.msra.mxu1 %vm1327_vm5, %v6974_v30 }
 0x313   : > { %3141 = vmatprep.subr.msk.mxu1 %vm1326_vm12, %v6974_v30 }
 0x314   : > { %2382 = vmatpush1.xpose.msra.mxu0 %v7121_v1  ;;  %v7181_v1 = vand.u32 4294901760, %v7180_v19  ;;  %v7255_v19 = vand.u32 4294901760, %v5701_v45 }
 0x315   : > { %2386 = vmatprep.subr.mxu0 %v7122_v37  ;;  %v7183_v37 = vand.u32 4294901760, %v7057_v51  ;;  %v7190_v51 = vld [vmem:[#allocation15_spill] sm:$0xff] }
 0x316   : > { %3142 = vmatpush2.xpose.msk.msra.mxu1 %vm1325_vm13, %v6974_v30 }
 0x317   : > { %3143 = vmatprep.subr.msk.mxu1 %vm1324_vm15, %v6974_v30  ;;  %vm7132_vm15 = vcmp.eq.s32.totalorder %v6931_v31, %v4734_v41  ;;  %v7141_v41 = vand.u32 4294901760, %v4974_v28  ;;  %v7151_v28 = vand.u32 4294901760, %v7036_v3  ;;  %v7159_v3 = vand.u32 4294901760, %v5128_v12  ;;  %v7166_v12 = vld [vmem:[#allocation23_spill] sm:$0xff] }
 0x318   : > { %2390 = vmatpush1.xpose.msra.mxu0 %v7123_v43  ;;  %v7185_v43 = vld [vmem:[#allocation46_spill] sm:$0xff] }
 0x319   : > { %2394 = vmatprep.subr.mxu0 %v7124_v15  ;;  %2361 = vmatmul.mubr.f32.vlgmr.msra.gmra.mxu1 %v7125_v62  ;;  %v7186_v15 = vand.u32 4294901760, %v7185_v43  ;;  %v7188_v62 = vld [vmem:[#allocation48_spill] sm:$0xff] }
 0x31a   : > { %3144 = vmatpush1.xpose.msk.msra.mxu1 %vm1323_vm1, %v6974_v30  ;;  %2761 = vmatprep.mubr.f32.mxu1 %v7120_v25  ;;  %vm7134_vm1 = vcmp.eq.s32.totalorder %v6930_v27, %v4775_v23  ;;  %v7178_v25 = vand.u32 4294901760, %v7177_v22  ;;  %v7252_v22 = vld [vmem:[#allocation78_spill] sm:$0xff] }
 0x31b   : > { %3145 = vmatprep.subr.msk.mxu1 %vm1322_vm2, %v6974_v30  ;;  %vm7136_vm2 = vcmp.eq.s32.totalorder %v6931_v31, %v4775_v23  ;;  %v7143_v23 = vand.u32 4294901760, %v7026_v20 }
 0x31c   : > { %2398 = vmatpush1.xpose.msra.mxu0 %v7126_v54  ;;  %v7189_v54 = vand.u32 4294901760, %v7188_v62 }
 0x31d   : > { %2402 = vmatprep.subr.mxu0 %v7127_v61 }
 0x31e   : > { %3146 = vmatpush1.xpose.msk.msra.mxu1 %vm1321_vm6, %v6974_v30  ;;  %vm7138_vm6 = vcmp.eq.s32.totalorder %v6930_v27, %v7020_v13 }
 0x31f   : > { %3147 = vmatprep.subr.msk.mxu1 %vm1320_vm3, %v6974_v30  ;;  %vm7140_vm3 = vcmp.eq.s32.totalorder %v6931_v31, %v7020_v13  ;;  %v7164_v13 = vld [vmem:[#allocation37_spill] sm:$0xff] }
 0x320   : > { %2406 = vmatpush1.xpose.msra.mxu0 %v7128_v18  ;;  %v7165_v16 = vand.u32 4294901760, %v7164_v13  ;;  %v7195_v18 = vld [vmem:[#allocation51_spill] sm:$0xff] }
 0x321   : > { %2410 = vmatprep.subr.mxu0 %v7129_v48  ;;  %v7196_v48 = vand.u32 4294901760, %v7195_v18 }
 0x322   : > { %3148 = vmatpush1.xpose.msk.msra.mxu1 %vm1319_vm7, %v6974_v30  ;;  %vm7142_vm7 = vcmp.eq.s32.totalorder %v6930_v27, %v7024_v63 }
 0x323   : > { %3149 = vmatprep.subr.msk.mxu1 %vm1318_vm9, %v6974_v30  ;;  %vm7144_vm9 = vcmp.eq.s32.totalorder %v6931_v31, %v7024_v63  ;;  %v7168_v63 = vld [vmem:[#allocation40_spill] sm:$0xff] }
 0x324   : > { %2414 = vmatpush1.xpose.msra.mxu0 %v7130_v35  ;;  %v7169_v20 = vand.u32 4294901760, %v7168_v63 }
 0x325   : > { %2418 = vmatprep.subr.mxu0 %v7131_v24  ;;  %v7201_v24 = vld [vmem:[#allocation55_spill] sm:$0xff] }
 0x326   : > { %3150 = vmatpush1.xpose.msk.msra.mxu1 %vm7132_vm15, %v6974_v30  ;;  %vm7152_vm15 = vcmp.eq.s32.totalorder %v6931_v31, %v7034_v7  ;;  %v7162_v7 = vand.u32 4294901760, %v7161_v39  ;;  %v7232_v39 = vld [vmem:[#allocation52_spill] sm:$0xff] }
 0x327   : > { %3151 = vmatprep.subr.msk.mxu1 %vm7134_vm1, %v6974_v30  ;;  %vm7155_vm1 = vcmp.eq.s32.totalorder %v6930_v27, %v7154_v34 }
 0x328   : > { %2422 = vmatpush1.xpose.msra.mxu0 %v7133_v40  ;;  %v7202_v40 = vand.u32 4294901760, %v7201_v24 }
 0x329   : > { %2426 = vmatprep.subr.mxu0 %v7135_v50  ;;  %v7203_v50 = vld [vmem:[#allocation32_spill] sm:$0xff] }
 0x32a   : > { %3152 = vmatpush1.xpose.msk.msra.mxu1 %vm7136_vm2, %v6974_v30  ;;  %vm7158_vm2 = vcmp.eq.s32.totalorder %v6931_v31, %v7154_v34 }
 0x32b   : > { %3153 = vmatprep.subr.msk.mxu1 %vm7138_vm6, %v6974_v30  ;;  %vm7160_vm6 = vcmp.eq.s32.totalorder %v6930_v27, %v7041_v58 }
 0x32c   : > { %2430 = vmatpush1.xpose.msra.mxu0 %v7137_v5  ;;  %v7205_v5 = vld [vmem:[#allocation56_spill] sm:$0xff] }
 0x32d   : > { %2434 = vmatprep.subr.mxu0 %v7139_v9  ;;  %v7206_v9 = vand.u32 4294901760, %v7205_v5 }
 0x32e   : > { %3154 = vmatpush1.xpose.msk.msra.mxu1 %vm7140_vm3, %v6974_v30  ;;  %vm7163_vm3 = vcmp.eq.s32.totalorder %v6931_v31, %v7041_v58  ;;  %v7172_v58 = vld [vmem:[#allocation30_spill] sm:$0xff] }
 0x32f   : > { %3155 = vmatprep.subr.msk.mxu1 %vm7142_vm7, %v6974_v30  ;;  %vm7167_vm7 = vcmp.eq.s32.totalorder %v6930_v27, %v7166_v12 }
 0x330   : > { %2438 = vmatpush1.xpose.msra.mxu0 %v7141_v41  ;;  %v7208_v41 = vld [vmem:[#allocation57_spill] sm:$0xff] }
 0x331   : > { %2442 = vmatprep.subr.mxu0 %v7143_v23  ;;  %v7209_v23 = vand.u32 4294901760, %v7208_v41 }
 0x332   : > { %3156 = vmatpush1.xpose.msk.msra.mxu1 %vm7144_vm9, %v6974_v30  ;;  %vm7170_vm9 = vcmp.eq.s32.totalorder %v6931_v31, %v7166_v12 }
 0x333   : > { %3157 = vmatprep.subr.msk.mxu1 %vm7146_vm11, %v6974_v30  ;;  %vm7173_vm11 = vcmp.eq.s32.totalorder %v6930_v27, %v7172_v58 }
 0x334   : > { %2446 = vmatpush1.xpose.msra.mxu0 %v7145_v53 }
 0x335   : > { %2450 = vmatprep.subr.mxu0 %v7147_v8  ;;  %v7214_v8 = vand.u32 4294901760, %v7078_v55  ;;  %v7222_v55 = vld [vmem:[#allocation63_spill] sm:$0xff] }
 0x336   : > { %3158 = vmatpush1.xpose.msk.msra.mxu1 %vm7148_vm10, %v6974_v30  ;;  %vm7176_vm10 = vcmp.eq.s32.totalorder %v6931_v31, %v7172_v58  ;;  %v7223_v34 = vand.u32 4294901760, %v7222_v55  ;;  %v7247_v58 = vld [vmem:[#allocation75_spill] sm:$0xff] }
 0x337   : > { %3159 = vmatprep.subr.msk.mxu1 %vm7150_vm0, %v6974_v30  ;;  %vm7179_vm0 = vcmp.eq.s32.totalorder %v6930_v27, %v7054_v46  ;;  %v7248_v60 = vand.u32 4294901760, %v7247_v58 }
 0x338   : > { %2454 = vmatpush1.xpose.msra.mxu0 %v7149_v52  ;;  %v7216_v52 = vld [vmem:[#allocation62_spill] sm:$0xff] }
 0x339   : > { %2458 = vmatprep.subr.mxu0 %v7151_v28  ;;  %v7217_v28 = vand.u32 4294901760, %v7216_v52 }
 0x33a   : > { %3160 = vmatpush1.xpose.msk.msra.mxu1 %vm7152_vm15, %v6974_v30  ;;  %vm7182_vm15 = vcmp.eq.s32.totalorder %v6931_v31, %v7054_v46  ;;  %v7192_v46 = vld [vmem:[#allocation49_spill] sm:$0xff] }
 0x33b   : > { %3161 = vmatprep.subr.msk.mxu1 %vm7155_vm1, %v6974_v30  ;;  %vm7184_vm1 = vcmp.eq.s32.totalorder %v6930_v27, %v7058_v14  ;;  %v7193_v61 = vand.u32 4294901760, %v7192_v46 }
 0x33c   : > { %2462 = vmatpush1.xpose.msra.mxu0 %v7153_v0  ;;  %v7219_v0 = vand.u32 4294901760, %v5476_v38 }
 0x33d   : > { %2466 = vmatprep.subr.mxu0 %v7157_v33  ;;  %v7226_v33 = vand.u32 4294901760, %v7225_v4  ;;  %v3395_v4 = vmov 0  }
 0x33e   : > { %3162 = vmatpush1.xpose.msk.msra.mxu1 %vm7158_vm2, %v6974_v30  ;;  %vm7187_vm2 = vcmp.eq.s32.totalorder %v6931_v31, %v7058_v14  ;;  %v7198_v14 = vld [vmem:[#allocation53_spill] sm:$0xff] }
 0x33f   : > { %3163 = vmatprep.subr.msk.mxu1 %vm7160_vm6, %v6974_v30  ;;  %vm7191_vm6 = vcmp.eq.s32.totalorder %v6930_v27, %v7190_v51  ;;  %v7199_v35 = vand.u32 4294901760, %v7198_v14 }
 0x340   : > { %2470 = vmatpush1.xpose.msra.mxu0 %v7159_v3  ;;  %v7231_v3 = vand.u32 4294901760, %v7089_v49  ;;  %v7241_v49 = vld [vmem:[#allocation73_spill] sm:$0xff] }
 0x341   : > { %2474 = vmatprep.subr.mxu0 %v7162_v7  ;;  %v7234_v7 = vld [vmem:[#allocation69_spill] sm:$0xff]  ;;  %v7242_v63 = vand.u32 4294901760, %v7241_v49 }
 0x342   : > { %3164 = vmatpush1.xpose.msk.msra.mxu1 %vm7163_vm3, %v6974_v30  ;;  %vm7194_vm3 = vcmp.eq.s32.totalorder %v6931_v31, %v7190_v51  ;;  %v7235_v13 = vand.u32 4294901760, %v7234_v7 }
 0x343   : > { %3165 = vmatprep.subr.msk.mxu1 %vm7167_vm7, %v6974_v30  ;;  %vm7197_vm7 = vcmp.eq.s32.totalorder %v6930_v27, %v7065_v42 }
 0x344   : > { %2478 = vmatpush1.xpose.msra.mxu0 %v7165_v16  ;;  %v7237_v16 = vld [vmem:[#allocation72_spill] sm:$0xff] }
 0x345   : > { %2482 = vmatprep.subr.mxu0 %v7169_v20  ;;  %v7238_v12 = vand.u32 4294901760, %v7237_v16  ;;  %v7244_v20 = vld [vmem:[#allocation74_spill] sm:$0xff] }
 0x346   : > { %3166 = vmatpush1.xpose.msk.msra.mxu1 %vm7170_vm9, %v6974_v30  ;;  %vm7200_vm9 = vcmp.eq.s32.totalorder %v6931_v31, %v7065_v42  ;;  %v7211_v42 = vld [vmem:[#allocation59_spill] sm:$0xff] }
 0x347   : > { %3167 = vmatprep.subr.msk.mxu1 %vm7173_vm11, %v6974_v30  ;;  %vm7204_vm11 = vcmp.eq.s32.totalorder %v6930_v27, %v7203_v50  ;;  %v7212_v53 = vand.u32 4294901760, %v7211_v42 }
 0x348   : > { %2486 = vmatpush1.xpose.msra.mxu0 %v7171_v2  ;;  %v7245_v2 = vand.u32 4294901760, %v7244_v20 }
 0x349   : > { %2490 = vmatprep.subr.mxu0 %v7175_v36  ;;  %v7250_v36 = vand.u32 4294901760, %v7102_v32 }
 0x34a   : > { %3168 = vmatpush1.xpose.msk.msra.mxu1 %vm7176_vm10, %v6974_v30  ;;  %vm7207_vm10 = vcmp.eq.s32.totalorder %v6931_v31, %v7203_v50  ;;  %v2771_v50 = vld [vmem:[#allocation2] sm:$0x3] }
 0x34b   : > { %3169 = vmatprep.subr.msk.mxu1 %vm7179_vm0, %v6974_v30  ;;  %vm7210_vm0 = vcmp.eq.s32.totalorder %v6930_v27, %v7074_v47 }
 0x34c   : > { %2494 = vmatpush1.xpose.msra.mxu0 %v7178_v25  ;;  %v7253_v25 = vand.u32 4294901760, %v7252_v22 }
 0x34d   : > { %2498 = vmatprep.subr.mxu0 %v7181_v1  ;;  %v7260_v1 = vand.u32 4294901760, %v5733_v11 }
 0x34e   : > { %3170 = vmatpush1.xpose.msk.msra.mxu1 %vm7182_vm15, %v6974_v30  ;;  %vm7213_vm15 = vcmp.eq.s32.totalorder %v6931_v31, %v7074_v47  ;;  %v7220_v47 = vld [vmem:[#allocation47_spill] sm:$0xff] }
 0x34f   : > { %3171 = vmatprep.subr.msk.mxu1 %vm7184_vm1, %v6974_v30  ;;  %vm7215_vm1 = vcmp.eq.s32.totalorder %v6930_v27, %v7079_v26 }
 0x350   : > { %2502 = vmatpush2.xpose.msra.mxu0 %v7183_v37  ;;  %v7265_v37 = vld [vmem:[#allocation81_spill] sm:$0xff] }
 0x351   : > { %2506 = vmatprep.subr.mxu0 %v7186_v15  ;;  %v7266_v43 = vand.u32 4294901760, %v7265_v37  ;;  %v7270_v15 = vld [vmem:[#allocation83_spill] sm:$0xff] }
 0x352   : > { %3172 = vmatpush1.xpose.msk.msra.mxu1 %vm7187_vm2, %v6974_v30  ;;  %vm7218_vm2 = vcmp.eq.s32.totalorder %v6931_v31, %v7079_v26  ;;  %v7228_v26 = vld [vmem:[#allocation67_spill] sm:$0xff]  ;;  %v7271_v62 = vand.u32 4294901760, %v7270_v15 }
 0x353   : > { %3173 = vmatprep.subr.msk.mxu1 %vm7191_vm6, %v6974_v30  ;;  %vm7221_vm6 = vcmp.eq.s32.totalorder %v6930_v27, %v7220_v47  ;;  %v7229_v38 = vand.u32 4294901760, %v7228_v26  ;;  %v2813_v26 = vld [vmem:[#allocation3] sm:$0xff] }
 0x354   : > { %2510 = vmatpush2.xpose.msra.mxu0 %v7189_v54 }
 0x355   : > { %2514 = vmatprep.subr.mxu0 %v7193_v61 }
 0x356   : > { %3174 = vmatpush1.xpose.msk.msra.mxu1 %vm7194_vm3, %v6974_v30  ;;  %vm7224_vm3 = vcmp.eq.s32.totalorder %v6931_v31, %v7220_v47 }
 0x357   : > { %3175 = vmatprep.subr.msk.mxu1 %vm7197_vm7, %v6974_v30  ;;  %vm7227_vm7 = vcmp.eq.s32.totalorder %v6930_v27, %v7086_v21 }
 0x358   : > { %2518 = vmatpush2.xpose.msra.mxu0 %v7196_v48 }
 0x359   : > { %2522 = vmatprep.subr.mxu0 %v7199_v35  ;;  %v2018_v54 = vpop.f32.mrf.mxu1 }
 0x35a   : > { %3176 = vmatpush2.xpose.msk.msra.mxu1 %vm7200_vm9, %v6974_v30  ;;  %vm7230_vm9 = vcmp.eq.s32.totalorder %v6931_v31, %v7086_v21  ;;  %v7239_v21 = vld [vmem:[#allocation54_spill] sm:$0xff] }
 0x35b   : > { %3177 = vmatprep.subr.msk.mxu1 %vm7204_vm11, %v6974_v30  ;;  %vm7233_vm11 = vcmp.eq.s32.totalorder %v6930_v27, %v7232_v39  ;;  %v2020_v46 = vpop.f32.mrf.mxu1 }
 0x35c   : > { %2526 = vmatpush2.xpose.msra.mxu0 %v7202_v40 }
 0x35d   : > { %2530 = vmatprep.subr.mxu0 %v7206_v9  ;;  %v3394_v9 = vmov 1966171168  }
 0x35e   : > { %3178 = vmatpush2.xpose.msk.msra.mxu1 %vm7207_vm10, %v6974_v30  ;;  %vm7236_vm10 = vcmp.eq.s32.totalorder %v6931_v31, %v7232_v39  ;;  %v2793_v41 = vunpack.c.l.s4 %v3394_v9 }
 0x35f   : > { %3179 = vmatprep.subr.msk.mxu1 %vm7210_vm0, %v6974_v30  ;;  %vm7240_vm0 = vcmp.eq.s32.totalorder %v6930_v27, %v7239_v21 }
 0x360   : > { %2534 = vmatpush2.xpose.msra.mxu0 %v7209_v23  ;;  %v2794_v55 = vunpack.c.0.s8 %v2793_v41 }
 0x361   : > { %2538 = vmatprep.subr.mxu0 %v7212_v53 }
 0x362   : > { %3180 = vmatpush2.xpose.msk.msra.mxu1 %vm7213_vm15, %v6974_v30  ;;  %vm7243_vm15 = vcmp.eq.s32.totalorder %v6931_v31, %v7239_v21  ;;  %v2814_v21 = vld [vmem:[#allocation3 + $0x8] sm:$0xff] }
 0x363   : > { %3181 = vmatprep.subr.msk.mxu1 %vm7215_vm1, %v6974_v30  ;;  %vm7246_vm1 = vcmp.eq.s32.totalorder %v6930_v27, %v7098_v56 }
 0x364   : > { %2542 = vmatpush2.xpose.msra.mxu0 %v7214_v8 }
 0x365   : > { %2546 = vmatprep.subr.mxu0 %v7217_v28 }
 0x366   : > { %3182 = vmatpush2.xpose.msk.msra.mxu1 %vm7218_vm2, %v6974_v30  ;;  %vm7249_vm2 = vcmp.eq.s32.totalorder %v6931_v31, %v7098_v56  ;;  %v7257_v56 = vld [vmem:[#allocation79_spill] sm:$0xff] }
 0x367   : > { %3183 = vmatprep.subr.msk.mxu1 %vm7221_vm6, %v6974_v30  ;;  %vm7251_vm6 = vcmp.eq.s32.totalorder %v6930_v27, %v7103_v10  ;;  %v7258_v32 = vand.u32 4294901760, %v7257_v56 }
 0x368   : > { %2550 = vmatpush2.xpose.msra.mxu0 %v7219_v0 }
 0x369   : > { %2554 = vmatprep.subr.mxu0 %v7223_v34 }
 0x36a   : > { %3184 = vmatpush2.xpose.msk.msra.mxu1 %vm7224_vm3, %v6974_v30  ;;  %vm7254_vm3 = vcmp.eq.s32.totalorder %v6931_v31, %v7103_v10  ;;  %v7262_v10 = vld [vmem:[#allocation80_spill] sm:$0xff] }
 0x36b   : > { %3185 = vmatprep.subr.msk.mxu1 %vm7227_vm7, %v6974_v30  ;;  %vm7256_vm7 = vcmp.eq.s32.totalorder %v6930_v27, %v7107_v29  ;;  %v7263_v45 = vand.u32 4294901760, %v7262_v10 }
 0x36c   : > { %2558 = vmatpush2.xpose.msra.mxu0 %v7226_v33 }
 0x36d   : > { %2562 = vmatprep.subr.mxu0 %v7229_v38  ;;  %v7275_v38 = vld [vmem:[#allocation13_spill] sm:$0xff] }
 0x36e   : > { %3186 = vmatpush2.xpose.msk.msra.mxu1 %vm7230_vm9, %v6974_v30  ;;  %vm7259_vm9 = vcmp.eq.s32.totalorder %v6931_v31, %v7107_v29  ;;  %v7268_v29 = vld [vmem:[#allocation82_spill] sm:$0xff] }
 0x36f   : > { %3187 = vmatprep.subr.msk.mxu1 %vm7233_vm11, %v6974_v30  ;;  %vm7261_vm11 = vcmp.eq.s32.totalorder %v6930_v27, %v7110_v6  ;;  %v7269_v11 = vand.u32 4294901760, %v7268_v29 }
 0x370   : > { %2566 = vmatpush2.xpose.msra.mxu0 %v7231_v3 }
 0x371   : > { %2570 = vmatprep.subr.mxu0 %v7235_v13 }
 0x372   : > { %3188 = vmatpush2.xpose.msk.msra.mxu1 %vm7236_vm10, %v6974_v30  ;;  %vm7264_vm10 = vcmp.eq.s32.totalorder %v6931_v31, %v7110_v6  ;;  %v7273_v6 = vld [vmem:[#allocation76_spill] sm:$0xff] }
 0x373   : > { %3189 = vmatprep.subr.msk.mxu1 %vm7240_vm0, %v6974_v30  ;;  %vm7267_vm0 = vcmp.eq.s32.totalorder %v6930_v27, %v7113_v57  ;;  %v1625_v57 = vpop.f32.mrf.mxu0 }
 0x374   : > { %2574 = vmatpush2.xpose.msra.mxu0 %v7238_v12  ;;  %v2019_v18 = vadd.f32 %v2018_v54, %v1625_v57 }
 0x375   : > { %2578 = vmatprep.subr.mxu0 %v7242_v63 }
 0x376   : > { %3190 = vmatpush2.xpose.msk.msra.mxu1 %vm7243_vm15, %v6974_v30  ;;  %vm7272_vm15 = vcmp.eq.s32.totalorder %v6930_v27, %v7115_v44  ;;  %v1627_v44 = vpop.f32.mrf.mxu0  ;;  %v7274_v27 = vld [vmem:[#allocation12_spill] sm:$0xff] }
 0x377   : > { %3191 = vmatprep.subr.msk.mxu1 %vm7246_vm1, %v6974_v30  ;;  %v2021_v14 = vadd.f32 %v2020_v46, %v1627_v44  ;;  %v2775_v24 = vsub.s32 0, %v7274_v27  ;;  %v2797_v39 = vsub.s32 %v2794_v55, %v7274_v27 }
 0x378   : > { %2582 = vmatpush2.xpose.msra.mxu0 %v7245_v2 }
 0x379   : > { %2586 = vmatprep.subr.mxu0 %v7248_v60  ;;  %v2776_v53 = vrot.slane %v2771_v50, %v2775_v24 }
 0x37a   : > { %3192 = vmatpush2.xpose.msk.msra.mxu1 %vm7249_vm2, %v6974_v30 }
 0x37b   : > { %3193 = vmatprep.subr.msk.mxu1 %vm7251_vm6, %v6974_v30 }
 0x37c   : > { %2590 = vmatpush2.xpose.msra.mxu0 %v7250_v36  ;;  %v7276_v36 = vld [vmem:[#allocation11_spill] sm:$0xff] }
 0x37d   : > { %2594 = vmatprep.subr.mxu0 %v7253_v25  ;;  %vm7277_vm6 = vnez %v7276_v36 }
 0x37e   : > { %3194 = vmatpush2.xpose.msk.msra.mxu1 %vm7254_vm3, %v6974_v30 }
 0x37f   : > { %3195 = vmatprep.subr.msk.mxu1 %vm7256_vm7, %v6974_v30 }
 0x380   : > { %2598 = vmatpush2.xpose.msra.mxu0 %v7255_v19 }
 0x381   : > { %2602 = vmatprep.subr.mxu0 %v7258_v32 }
 0x382   : > { %3196 = vmatpush2.xpose.msk.msra.mxu1 %vm7259_vm9, %v6974_v30 }
 0x383   : > { %3197 = vmatprep.subr.msk.mxu1 %vm7261_vm11, %v6974_v30 }
 0x384   : > { %2606 = vmatpush2.xpose.msra.mxu0 %v7260_v1 }
 0x385   : > { %2610 = vmatprep.subr.mxu0 %v7263_v45 }
 0x386   : > { %3198 = vmatpush2.xpose.msk.msra.mxu1 %vm7264_vm10, %v6974_v30 }
 0x387   : > { %3199 = vmatprep.subr.msk.mxu1 %vm7267_vm0, %v6974_v30 }
 0x388   : > { %2614 = vmatpush2.xpose.msra.mxu0 %v7266_v43 }
 0x389   : > { %2618 = vmatprep.subr.mxu0 %v7269_v11 }
 0x38a   : > { %3200 = vmatpush2.xpose.msk.msra.mxu1 %vm1331_vm4, %v6974_v30 }
 0x38b   : > { %3201 = vmatprep.subr.msk.mxu1 %vm7272_vm15, %v6974_v30 }
 0x38c   : > { %2622 = vmatpush2.xpose.msra.mxu0 %v7271_v62 }
 0x38e   : > { %3202 = vmatpush2.xpose.msk.msra.mxu1 %vm1329_vm8, %v6974_v30 }
 0x38f   : > { %2626 = vmatmul.mubr.f32.vlgmr.msra.gmra.mxu0 %v7273_v6  ;;  %3203 = vmatprep.subr.msk.mxu1 %vm1328_vm14, %v6974_v30 }
 0x392   : > { %3204 = vmatpush2.xpose.msk.msra.mxu1 %vm1327_vm5, %v6974_v30 }
 0x393   : > { %3205 = vmatprep.subr.msk.mxu1 %vm1326_vm12, %v6974_v30 }
 0x396   : > { %3206 = vmatpush2.xpose.msk.msra.mxu1 %vm1325_vm13, %v6974_v30  ;;  %v2779_v30 = vsub.s32 1, %v7274_v27 }
 0x398   : > { %v2780_v0 = vrot.slane %v2771_v50, %v2779_v30 }
 0x399   : > { %2763 = vmatmul.mubr.f32.vlgmr.msra.gmra.mxu1 %v7273_v6 }
 0x3cf   : > { %v2221_v51 = vpop.f32.mrf.mxu0 }
 0x3d0   : > { %v2222_v35 = vadd.f32 %v2221_v51, %v2019_v18 }
 0x3d1   : > { %v2223_v61 = vpop.f32.mrf.mxu0 }
 0x3d2   : > { %v2224_v5 = vadd.f32 %v2223_v61, %v2021_v14 }
 0x3d9   : > { %v2362_v17 = vpop.f32.mrf.mxu1 }
 0x3da   : > { %v2363_v31 = vadd.f32 %v2362_v17, %v2222_v35 }
 0x3db   : > { %v2364_v40 = vpop.f32.mrf.mxu1 }
 0x3dc   : > { %v2365_v23 = vadd.f32 %v2364_v40, %v2224_v5 }
 0x44f   : > { %v2627_v48 = vpop.f32.mrf.mxu0 }
 0x450   : > { %v2628_v42 = vadd.f32 %v2627_v48, %v2363_v31 }
 0x451   : > { %v2629_v59 = vpop.f32.mrf.mxu0 }
 0x452   : > { %v2630_v52 = vadd.f32 %v2629_v59, %v2365_v23 }
 0x459   : > { %v2764_v8 = vpop.f32.mrf.mxu1 }
 0x45a   : > { %v2765_v28 = vadd.f32 %v2764_v8, %v2628_v42 }
 0x45b   : > { %v2766_v47 = vpop.f32.mrf.mxu1 }
 0x45c   : > { %vm2769_vm12 = vcmp.gt.f32.partialorder %v2765_v28, 0.0  ;;  %vm2783_vm4 = vcmp.lt.f32.partialorder %v2765_v28, %v2776_v53  ;;  %v2767_v34 = vadd.f32 %v2766_v47, %v2630_v52 }
 0x45d   : > { %vm2785_vm13 = vmand %vm2769_vm12, %vm2783_vm4 }
 0x45e   : > { %v2815_v33 = vsel %vm2785_vm13, 1, %v3395_v4  ;;  %vm2770_vm14 = vcmp.gt.f32.partialorder %v2767_v34, 0.0  ;;  %vm2784_vm5 = vcmp.lt.f32.partialorder %v2767_v34, %v2780_v0  ;;  %v2787_v7 = vsel %vm2785_vm13, %v2765_v28, %v2776_v53 }
 0x45f   : > { %v2820_v3 = vrot.slane %v2815_v33, %v7275_v38  ;;  %vm2786_vm8 = vmand %vm2770_vm14, %vm2784_vm5 }
 0x460   : > { %v2788_v13 = vsel %vm2786_vm8, %v2767_v34, %v2780_v0  ;;  %v2816_v16 = vsel %vm2786_vm8, 1, %v3395_v4 }
 0x461   : > { %vm2825_vm1 = vcmp.eq.s32.totalorder %v2820_v3, 1  ;;  %v2791_v12 = vcombine.low %v2787_v7, %v2788_v13  ;;  %v2824_v49 = vrot.slane %v2816_v16, %v7275_v38 }
 0x462   : > { %v2827_v63 = vsel %vm2825_vm1, %v2765_v28, %v2813_v26 }
 0x463   : > { %2829 = vst [vmem:[#allocation3] sm:$0xff] %v2827_v63  ;;  %v2798_v20 = vrot.slane %v2791_v12, %v2797_v39  ;;  %vm2826_vm2 = vcmp.eq.s32.totalorder %v2824_v49, 1 }
 0x464   : > { %v2828_v2 = vsel %vm2826_vm2, %v2767_v34, %v2814_v21 }
 0x465   : > { %v2805_v58 = vrot.slane %v2798_v20, %v2797_v39  ;;  %2830 = vst [vmem:[#allocation3 + $0x8] sm:$0xff] %v2828_v2 }
 0x467   : > { %v2806_v60 = vcombine.high %v2805_v58, %v2805_v58 }
 0x469   : > { %2812 = vst.msk [vmem:[#allocation2] sm:$0x3] %vm7277_vm6, %v2806_v60 }
 0x46a PF:  {}
 0x46c   : > { %v3280_v22 = vld [vmem:[#allocation3] ss:$8 sps:$4 sm:$0x77]  }
 0x46d   : > { %2840 = vst [vmem:[%s3514_s8] sm:$0x77] %v3280_v22 }
 0x46e PF: > { %s26_s25 = sadd.s32 1, %s3385_s25   ;;  %s7278_s1 = smov %s3369_s21 }
 0x46f   : > { %p23_p7 = scmp.ge.s32.totalorder %s26_s25, 4   ;;  %s7279_s21 = smov %s3373_s22 }
 0x470   : > { %s7280_s22 = smov %s3471_s5  ;;  %s7281_s23 = smov %s3381_s24 }
 0x471   : > { %s7282_s24 = smov %s7284_s27  ;;  %25 = sbr.rel (!%p23_p7) target bundleno = 29 (0x1d), region = 76 }
 0x476   :  { %2871 = vsyncpa [#allocation8], 1 }
 0x477   :  { %2873 = vsyncpa [#allocation8 + $0x1], 1 }

</bundles_post_ra>
